<compile_context>
chip_gen: v5e
topology: v5e:2x2
jax: 0.10.0
libtpu: 0.0.40
codegen_flags: <defaults>
</compile_context>

<pallas_src>
import functools

import jax
import jax.numpy as jnp
from jax.experimental import pallas as pl
from jax.experimental.pallas import tpu as pltpu

NEG_SLOPE = 0.2
BN_EPS = 1e-5
ACC_BUDGET_BYTES = 4 * 1024 * 1024       # target f32 accumulator bytes per M tile


def _device_kind():
    try:
        return jax.devices()[0].device_kind.lower()
    except Exception:
        return ""


_KIND = _device_kind()
_IS_OLD_GEN = ("v4" in _KIND) or ("v5" in _KIND) or ("v6" in _KIND)
# v5e/v6e: 128 MiB physical VMEM, 1 TensorCore.  v7x: 64 MiB, 2 TensorCores.
VMEM_LIMIT = (100 * 1024 * 1024) if _IS_OLD_GEN else (48 * 1024 * 1024)
PREFER_SPLIT_M = not _IS_OLD_GEN          # keep >=2 M tiles for dual-TC parts


def _round_up(x, m):
    return ((x + m - 1) // m) * m


def _pick_batch_group(n, rows_per_elem, cp, prefer_split):
    """Batch elements per M tile.

    Legal block: (nb*rows) % 16 == 0 (sublane-clean bf16 output tile) or nb == n
    (full-extent block).  Sized so the f32 accumulator stays ~ACC_BUDGET_BYTES;
    on dual-TC parts prefer >=2 M tiles so the "parallel" axis megacore-splits.
    """
    max_rows = max(rows_per_elem, ACC_BUDGET_BYTES // (cp * 4))
    cands = [d for d in range(1, n + 1)
             if n % d == 0 and ((d * rows_per_elem) % 16 == 0 or d == n)]
    fitting = [d for d in cands if d * rows_per_elem <= max_rows]
    if not fitting:
        return min(cands)
    if prefer_split:
        split = [d for d in fitting if d < n]
        if split:
            return max(split)
    return max(fitting)


# ----------------------------------------------------------------------------
# Pallas kernels
# ----------------------------------------------------------------------------
def _tap_gemm_stats_kernel(p0_ref, p1_ref, w_ref, z_ref, s_ref, ss_ref, acc_ref,
                           *, nb, ho, wo):
    """Pass 1: tap-fused conv-as-GEMM + per-M-tile per-channel BN partials.

    Grid = (M tiles, 5 kx taps).  p0_ref/p1_ref: (1, nb, (Ho+2)*Wo, Cin) bf16
    row-parity phase blocks for the current kx.  w_ref: (1, 5, Cin, Cp) bf16
    weights for the current kx.  Each ky tap is a static row-shifted slice of
    the matching parity block; every tap is one MXU matmul accumulated into the
    f32 scratch that persists across the kx ("arbitrary") axis.
    """
    kx = pl.program_id(1)
    rows = ho * wo

    @pl.when(kx == 0)
    def _():
        acc_ref[...] = jnp.zeros_like(acc_ref)

    for b in range(nb):
        partial = None
        for ky in range(5):
            dy = ky // 2
            pref = p0_ref if ky % 2 == 0 else p1_ref
            p = pref[0, b, pl.ds(dy * wo, rows), :]            # (rows, Cin) bf16
            c = jnp.dot(p, w_ref[0, ky],
                        preferred_element_type=jnp.float32)    # (rows, Cp) f32
            partial = c if partial is None else partial + c
        acc_ref[pl.ds(b * rows, rows), :] += partial

    @pl.when(kx == pl.num_programs(1) - 1)
    def _():
        z = acc_ref[...]                                       # f32
        z_ref[...] = z.astype(z_ref.dtype)                     # bf16 pre-BN out
        s = jnp.sum(z, axis=0, keepdims=True)                  # (1, Cp)
        ss = jnp.sum(z * z, axis=0, keepdims=True)
        s_ref[...] = jnp.broadcast_to(s[None], s_ref.shape)
        ss_ref[...] = jnp.broadcast_to(ss[None], ss_ref.shape)


def _bn_lrelu_kernel(z_ref, scale_ref, shift_ref, o_ref):
    """Pass 2: folded BatchNorm affine + LeakyReLU(0.2); bf16 in / bf16 out."""
    y = z_ref[...].astype(jnp.float32) * scale_ref[...] + shift_ref[...]
    o_ref[...] = jnp.where(y >= 0, y, NEG_SLOPE * y).astype(o_ref.dtype)


def _linear_sigmoid_kernel(x_ref, w_ref, b_ref, o_ref):
    """Linear(F -> 1) + Sigmoid as a VPU multiply + lane reduction."""
    xw = x_ref[...].astype(jnp.float32) * w_ref[...]
    z = jnp.sum(xw, axis=1, keepdims=True) + b_ref[0, 0]
    o_ref[...] = 1.0 / (1.0 + jnp.exp(-z))


# ----------------------------------------------------------------------------
# Phase decomposition (pure strided slicing in plain JAX, bf16)
# ----------------------------------------------------------------------------
def _phase_views(x_bf16, ho, wo):
    """A[r][kx][n, i*Wo + ox, :] = x_padded[n, 2*i + r, 2*ox + kx, :].

    Returns two (5, N, (Ho+2)*Wo, Cin) arrays (row parity 0 / 1)."""
    n, _, _, c = x_bf16.shape
    xp = jnp.pad(x_bf16, ((0, 0), (2, 2), (2, 2), (0, 0)))
    views = []
    for r in (0, 1):
        slabs = [xp[:, r: r + 2 * (ho + 2): 2, kx: kx + 2 * wo: 2, :]
                 for kx in range(5)]                            # (N, Ho+2, Wo, C)
        views.append(jnp.stack(slabs, axis=0).reshape(5, n, (ho + 2) * wo, c))
    return views[0], views[1]


# ----------------------------------------------------------------------------
# One fused conv + BN(batch stats) + LeakyReLU layer (two pallas_calls)
# ----------------------------------------------------------------------------
def conv_bn_lrelu_layer(x_nhwc, w, gamma, beta):
    n, h, wdim, cin = x_nhwc.shape
    cout = w.shape[0]
    cp = _round_up(cout, 128)                  # lane-dense output channels
    ho = (h + 4 - 5) // 2 + 1
    wo = (wdim + 4 - 5) // 2 + 1

    xb = x_nhwc.astype(jnp.bfloat16)
    cin_p = max(cin, 8)                        # layout-friendly contraction dim
    if cin_p != cin:
        xb = jnp.pad(xb, ((0, 0), (0, 0), (0, 0), (0, cin_p - cin)))

    p0, p1 = _phase_views(xb, ho, wo)          # (5, N, (Ho+2)*Wo, Cin_p) bf16

    # torch weight (Cout, Cin, ky, kx) -> (kx, ky, Cin_p, Cp), bf16, zero pad.
    wt = jnp.transpose(w, (3, 2, 1, 0)).astype(jnp.bfloat16)
    wt = jnp.pad(wt, ((0, 0), (0, 0), (0, cin_p - cin), (0, cp - cout)))

    nb = _pick_batch_group(n, ho * wo, cp, PREFER_SPLIT_M)
    num_m = n // nb
    rows_blk = nb * ho * wo
    m_out = n * ho * wo
    ph_rows = (ho + 2) * wo

    z, psum, psumsq = pl.pallas_call(
        functools.partial(_tap_gemm_stats_kernel, nb=nb, ho=ho, wo=wo),
        out_shape=(
            jax.ShapeDtypeStruct((m_out, cp), jnp.bfloat16),    # pre-BN z
            jax.ShapeDtypeStruct((num_m, 8, cp), jnp.float32),  # per-tile sum
            jax.ShapeDtypeStruct((num_m, 8, cp), jnp.float32),  # per-tile sumsq
        ),
        grid_spec=pltpu.PrefetchScalarGridSpec(
            num_scalar_prefetch=0,
            grid=(num_m, 5),                   # (M tiles, kx); kx = reduction, last
            in_specs=[
                pl.BlockSpec((1, nb, ph_rows, cin_p), lambda i, kx: (kx, i, 0, 0)),
                pl.BlockSpec((1, nb, ph_rows, cin_p), lambda i, kx: (kx, i, 0, 0)),
                pl.BlockSpec((1, 5, cin_p, cp), lambda i, kx: (kx, 0, 0, 0)),
            ],
            out_specs=[
                pl.BlockSpec((rows_blk, cp), lambda i, kx: (i, 0)),
                pl.BlockSpec((1, 8, cp), lambda i, kx: (i, 0, 0)),
                pl.BlockSpec((1, 8, cp), lambda i, kx: (i, 0, 0)),
            ],
            scratch_shapes=[pltpu.VMEM((rows_blk, cp), jnp.float32)],
        ),
        compiler_params=pltpu.CompilerParams(
            dimension_semantics=("parallel", "arbitrary"),
            vmem_limit_bytes=VMEM_LIMIT,
        ),
    )(p0, p1, wt)

    # Finalize BN statistics ((C,)-sized math; biased variance, torch training).
    ch_sum = psum[:, 0, :].sum(axis=0)
    ch_sumsq = psumsq[:, 0, :].sum(axis=0)
    mean = ch_sum / m_out
    var = jnp.maximum(ch_sumsq / m_out - mean * mean, 0.0)
    gamma_p = jnp.pad(gamma, (0, cp - cout)) if cp != cout else gamma
    beta_p = jnp.pad(beta, (0, cp - cout)) if cp != cout else beta
    scale = gamma_p * jax.lax.rsqrt(var + BN_EPS)
    shift = beta_p - mean * scale

    y = pl.pallas_call(
        _bn_lrelu_kernel,
        out_shape=jax.ShapeDtypeStruct((m_out, cp), jnp.bfloat16),
        grid_spec=pltpu.PrefetchScalarGridSpec(
            num_scalar_prefetch=0,
            grid=(num_m,),
            in_specs=[
                pl.BlockSpec((rows_blk, cp), lambda i: (i, 0)),
                pl.BlockSpec((1, cp), lambda i: (0, 0)),
                pl.BlockSpec((1, cp), lambda i: (0, 0)),
            ],
            out_specs=pl.BlockSpec((rows_blk, cp), lambda i: (i, 0)),
        ),
        compiler_params=pltpu.CompilerParams(
            dimension_semantics=("parallel",),
            vmem_limit_bytes=VMEM_LIMIT,
        ),
    )(z,
      scale.reshape(1, cp).astype(jnp.float32),
      shift.reshape(1, cp).astype(jnp.float32))

    y = y[:, :cout]                            # drop padded channels
    return y.reshape(n, ho, wo, cout)          # NHWC for the next layer


def linear_sigmoid(x, w, b):
    n, f = x.shape
    return pl.pallas_call(
        _linear_sigmoid_kernel,
        out_shape=jax.ShapeDtypeStruct((n, 1), jnp.float32),
        in_specs=[
            pl.BlockSpec(memory_space=pltpu.MemorySpace.VMEM),
            pl.BlockSpec(memory_space=pltpu.MemorySpace.VMEM),
            pl.BlockSpec(memory_space=pltpu.MemorySpace.SMEM),
        ],
        out_specs=pl.BlockSpec(memory_space=pltpu.MemorySpace.VMEM),
        compiler_params=pltpu.CompilerParams(vmem_limit_bytes=VMEM_LIMIT),
    )(x, w.astype(jnp.float32), b.reshape(1, 1).astype(jnp.float32))


# ----------------------------------------------------------------------------
# Parameters (deterministic synthetic init; shapes follow the torch __init__).
# Conv biases are omitted: they cancel exactly under training-mode BatchNorm.
# ----------------------------------------------------------------------------
def init_params(key, d_size, flat_features):
    ks = jax.random.split(key, 5)

    def conv_params(k, cin, cout):
        w = jax.random.normal(k, (cout, cin, 5, 5), jnp.float32) * 0.05
        return (
            w,
            jnp.ones((cout,), jnp.float32),    # BN gamma
            jnp.zeros((cout,), jnp.float32),   # BN beta
        )

    return {
        "conv1": conv_params(ks[0], 1, d_size),
        "conv2": conv_params(ks[1], d_size, d_size * 2),
        "conv3": conv_params(ks[2], d_size * 2, d_size * 4),
        "conv4": conv_params(ks[3], d_size * 4, d_size * 8),
        "linear": (
            jax.random.normal(ks[4], (1, flat_features), jnp.float32) * 0.05,
            jnp.zeros((1,), jnp.float32),
        ),
    }


# ----------------------------------------------------------------------------
# Forward pass (mirrors ShapeDiscriminator3D.forward)
# ----------------------------------------------------------------------------
def discriminator_forward(image, params, batch_size, image_size):
    x = image.reshape(batch_size, 1, image_size[0], image_size[1])  # NCHW
    x = jnp.transpose(x, (0, 2, 3, 1))                              # NHWC
    for name in ("conv1", "conv2", "conv3", "conv4"):
        w, gamma, beta = params[name]
        x = conv_bn_lrelu_layer(x, w, gamma, beta)

    n, h4, w4, c4 = x.shape
    h = x.reshape(batch_size, h4 * w4 * c4)    # NHWC flatten (h, w, c)

    # torch flattens NCHW (c, h, w): fold that permutation into the weight.
    wl, bl = params["linear"]
    wl_nhwc = wl.reshape(1, c4, h4, w4).transpose(0, 2, 3, 1).reshape(1, -1)
    return linear_sigmoid(h, wl_nhwc, bl)      # (N, 1)


# ----------------------------------------------------------------------------
if __name__ == "__main__":
    # Small shapes consistent with the module's structure
    # (full module: d_size=128, batch=64, image 64x64, linear-in 16384).
    d_size = 8
    batch_size = 4
    image_size = (16, 16)
    # After 4 stride-2 convs: 16 -> 8 -> 4 -> 2 -> 1  =>  flat = d_size*8 * 1 * 1
    flat_features = d_size * 8 * (image_size[0] // 16) * (image_size[1] // 16)

    key = jax.random.PRNGKey(0)
    k_params, k_img = jax.random.split(key)
    params = init_params(k_params, d_size, flat_features)
    image = jax.random.normal(
        k_img, (batch_size, 1, image_size[0], image_size[1]), jnp.float32
    )

    fwd = jax.jit(
        functools.partial(
            discriminator_forward, batch_size=batch_size, image_size=image_size
        )
    )
    out = fwd(image, params)
    out = jax.block_until_ready(out)
    assert out.shape == (batch_size, 1)
    assert bool(jnp.all((out >= 0.0) & (out <= 1.0)))
    print("KERNEL_OK")
</pallas_src>

<mosaic_0001>
module attributes {stable_mosaic.version = 11 : i64} {
  func.func @_tap_gemm_stats_kernel(%arg0: i32, %arg1: i32, %arg2: memref<1x2x80x8xbf16, #tpu.memory_space<vmem>>, %arg3: memref<1x2x80x8xbf16, #tpu.memory_space<vmem>>, %arg4: memref<1x5x8x128xbf16, #tpu.memory_space<vmem>>, %arg5: memref<128x128xbf16, #tpu.memory_space<vmem>>, %arg6: memref<1x8x128xf32, #tpu.memory_space<vmem>>, %arg7: memref<1x8x128xf32, #tpu.memory_space<vmem>>, %arg8: memref<128x128xf32, #tpu.memory_space<vmem>>) attributes {dimension_semantics = [#tpu.dimension_semantics<parallel>, #tpu.dimension_semantics<arbitrary>], iteration_bounds = array<i64: 2, 5>, scalar_prefetch = 0 : i64, scratch_operands = 1 : i64, tpu.core_type = #tpu.core_type<tc>, window_params = [{transform_indices = @transform_0, window_bounds = array<i64: 1, 2, 80, 8>}, {transform_indices = @transform_1, window_bounds = array<i64: 1, 2, 80, 8>}, {transform_indices = @transform_2, window_bounds = array<i64: 1, 5, 8, 128>}, {transform_indices = @transform_3, window_bounds = array<i64: 128, 128>}, {transform_indices = @transform_4, window_bounds = array<i64: 1, 8, 128>}, {transform_indices = @transform_5, window_bounds = array<i64: 1, 8, 128>}]} {
    %c0_i32 = arith.constant 0 : i32
    %0 = arith.cmpi eq, %arg1, %c0_i32 : i32
    %1 = arith.extui %0 : i1 to i32
    %c0_i32_0 = arith.constant 0 : i32
    %2 = arith.cmpi ne, %1, %c0_i32_0 : i32
    scf.if %2 {
      %cst_91 = arith.constant 0.000000e+00 : f32
      %70 = vector.broadcast %cst_91 : f32 to vector<128x128xf32>
      %c0_92 = arith.constant 0 : index
      %c0_93 = arith.constant 0 : index
      %71 = vector.load %arg8[%c0_92, %c0_93] : memref<128x128xf32, #tpu.memory_space<vmem>>, vector<128x128xf32>
      tpu.vector_store %arg8[%c0_92, %c0_93], %70 {strides = array<i32>} : memref<128x128xf32, #tpu.memory_space<vmem>>, vector<128x128xf32>,
    } else {
    }
    %c0 = arith.constant 0 : index
    %c0_1 = arith.constant 0 : index
    %c0_2 = arith.constant 0 : index
    %c0_3 = arith.constant 0 : index
    %3 = vector.load %arg2[%c0, %c0_1, %c0_2, %c0_3] : memref<1x2x80x8xbf16, #tpu.memory_space<vmem>>, vector<1x1x64x8xbf16>
    %4 = vector.shape_cast %3 : vector<1x1x64x8xbf16> to vector<64x8xbf16>
    %c0_4 = arith.constant 0 : index
    %c0_5 = arith.constant 0 : index
    %c0_6 = arith.constant 0 : index
    %c0_7 = arith.constant 0 : index
    %5 = vector.load %arg4[%c0_4, %c0_5, %c0_6, %c0_7] : memref<1x5x8x128xbf16, #tpu.memory_space<vmem>>, vector<1x1x8x128xbf16>
    %6 = vector.shape_cast %5 : vector<1x1x8x128xbf16> to vector<8x128xbf16>
    %cst = arith.constant dense<0.000000e+00> : vector<64x128xf32>
    %7 = tpu.matmul %4, %6, %cst {dimension_numbers = #tpu.dot_dimension_numbers<[1], [0], [0], [1], [0, 0, 1, 1], [], []>} : vector<64x8xbf16>, vector<8x128xbf16>, vector<64x128xf32> -> vector<64x128xf32>
    %c0_8 = arith.constant 0 : index
    %c0_9 = arith.constant 0 : index
    %c0_10 = arith.constant 0 : index
    %c0_11 = arith.constant 0 : index
    %8 = vector.load %arg3[%c0_8, %c0_9, %c0_10, %c0_11] : memref<1x2x80x8xbf16, #tpu.memory_space<vmem>>, vector<1x1x64x8xbf16>
    %9 = vector.shape_cast %8 : vector<1x1x64x8xbf16> to vector<64x8xbf16>
    %c0_12 = arith.constant 0 : index
    %c1 = arith.constant 1 : index
    %c0_13 = arith.constant 0 : index
    %c0_14 = arith.constant 0 : index
    %10 = vector.load %arg4[%c0_12, %c1, %c0_13, %c0_14] : memref<1x5x8x128xbf16, #tpu.memory_space<vmem>>, vector<1x1x8x128xbf16>
    %11 = vector.shape_cast %10 : vector<1x1x8x128xbf16> to vector<8x128xbf16>
    %cst_15 = arith.constant dense<0.000000e+00> : vector<64x128xf32>
    %12 = tpu.matmul %9, %11, %cst_15 {dimension_numbers = #tpu.dot_dimension_numbers<[1], [0], [0], [1], [0, 0, 1, 1], [], []>} : vector<64x8xbf16>, vector<8x128xbf16>, vector<64x128xf32> -> vector<64x128xf32>
    %13 = arith.addf %7, %12 : vector<64x128xf32>
    %c0_16 = arith.constant 0 : index
    %c0_17 = arith.constant 0 : index
    %c8 = arith.constant 8 : index
    %c0_18 = arith.constant 0 : index
    %14 = vector.load %arg2[%c0_16, %c0_17, %c8, %c0_18] : memref<1x2x80x8xbf16, #tpu.memory_space<vmem>>, vector<1x1x64x8xbf16>
    %15 = vector.shape_cast %14 : vector<1x1x64x8xbf16> to vector<64x8xbf16>
    %c0_19 = arith.constant 0 : index
    %c2 = arith.constant 2 : index
    %c0_20 = arith.constant 0 : index
    %c0_21 = arith.constant 0 : index
    %16 = vector.load %arg4[%c0_19, %c2, %c0_20, %c0_21] : memref<1x5x8x128xbf16, #tpu.memory_space<vmem>>, vector<1x1x8x128xbf16>
    %17 = vector.shape_cast %16 : vector<1x1x8x128xbf16> to vector<8x128xbf16>
    %cst_22 = arith.constant dense<0.000000e+00> : vector<64x128xf32>
    %18 = tpu.matmul %15, %17, %cst_22 {dimension_numbers = #tpu.dot_dimension_numbers<[1], [0], [0], [1], [0, 0, 1, 1], [], []>} : vector<64x8xbf16>, vector<8x128xbf16>, vector<64x128xf32> -> vector<64x128xf32>
    %19 = arith.addf %13, %18 : vector<64x128xf32>
    %c0_23 = arith.constant 0 : index
    %c0_24 = arith.constant 0 : index
    %c8_25 = arith.constant 8 : index
    %c0_26 = arith.constant 0 : index
    %20 = vector.load %arg3[%c0_23, %c0_24, %c8_25, %c0_26] : memref<1x2x80x8xbf16, #tpu.memory_space<vmem>>, vector<1x1x64x8xbf16>
    %21 = vector.shape_cast %20 : vector<1x1x64x8xbf16> to vector<64x8xbf16>
    %c0_27 = arith.constant 0 : index
    %c3 = arith.constant 3 : index
    %c0_28 = arith.constant 0 : index
    %c0_29 = arith.constant 0 : index
    %22 = vector.load %arg4[%c0_27, %c3, %c0_28, %c0_29] : memref<1x5x8x128xbf16, #tpu.memory_space<vmem>>, vector<1x1x8x128xbf16>
    %23 = vector.shape_cast %22 : vector<1x1x8x128xbf16> to vector<8x128xbf16>
    %cst_30 = arith.constant dense<0.000000e+00> : vector<64x128xf32>
    %24 = tpu.matmul %21, %23, %cst_30 {dimension_numbers = #tpu.dot_dimension_numbers<[1], [0], [0], [1], [0, 0, 1, 1], [], []>} : vector<64x8xbf16>, vector<8x128xbf16>, vector<64x128xf32> -> vector<64x128xf32>
    %25 = arith.addf %19, %24 : vector<64x128xf32>
    %c0_31 = arith.constant 0 : index
    %c0_32 = arith.constant 0 : index
    %c16 = arith.constant 16 : index
    %c0_33 = arith.constant 0 : index
    %26 = vector.load %arg2[%c0_31, %c0_32, %c16, %c0_33] : memref<1x2x80x8xbf16, #tpu.memory_space<vmem>>, vector<1x1x64x8xbf16>
    %27 = vector.shape_cast %26 : vector<1x1x64x8xbf16> to vector<64x8xbf16>
    %c0_34 = arith.constant 0 : index
    %c4 = arith.constant 4 : index
    %c0_35 = arith.constant 0 : index
    %c0_36 = arith.constant 0 : index
    %28 = vector.load %arg4[%c0_34, %c4, %c0_35, %c0_36] : memref<1x5x8x128xbf16, #tpu.memory_space<vmem>>, vector<1x1x8x128xbf16>
    %29 = vector.shape_cast %28 : vector<1x1x8x128xbf16> to vector<8x128xbf16>
    %cst_37 = arith.constant dense<0.000000e+00> : vector<64x128xf32>
    %30 = tpu.matmul %27, %29, %cst_37 {dimension_numbers = #tpu.dot_dimension_numbers<[1], [0], [0], [1], [0, 0, 1, 1], [], []>} : vector<64x8xbf16>, vector<8x128xbf16>, vector<64x128xf32> -> vector<64x128xf32>
    %31 = arith.addf %25, %30 : vector<64x128xf32>
    %c0_38 = arith.constant 0 : index
    %c0_39 = arith.constant 0 : index
    %32 = vector.load %arg8[%c0_38, %c0_39] : memref<128x128xf32, #tpu.memory_space<vmem>>, vector<64x128xf32>
    %33 = arith.addf %32, %31 : vector<64x128xf32>
    %c0_40 = arith.constant 0 : index
    %c0_41 = arith.constant 0 : index
    %34 = vector.load %arg8[%c0_40, %c0_41] : memref<128x128xf32, #tpu.memory_space<vmem>>, vector<64x128xf32>
    tpu.vector_store %arg8[%c0_40, %c0_41], %33 {strides = array<i32>} : memref<128x128xf32, #tpu.memory_space<vmem>>, vector<64x128xf32>,
    %c0_42 = arith.constant 0 : index
    %c1_43 = arith.constant 1 : index
    %c0_44 = arith.constant 0 : index
    %c0_45 = arith.constant 0 : index
    %35 = vector.load %arg2[%c0_42, %c1_43, %c0_44, %c0_45] : memref<1x2x80x8xbf16, #tpu.memory_space<vmem>>, vector<1x1x64x8xbf16>
    %36 = vector.shape_cast %35 : vector<1x1x64x8xbf16> to vector<64x8xbf16>
    %c0_46 = arith.constant 0 : index
    %c0_47 = arith.constant 0 : index
    %c0_48 = arith.constant 0 : index
    %c0_49 = arith.constant 0 : index
    %37 = vector.load %arg4[%c0_46, %c0_47, %c0_48, %c0_49] : memref<1x5x8x128xbf16, #tpu.memory_space<vmem>>, vector<1x1x8x128xbf16>
    %38 = vector.shape_cast %37 : vector<1x1x8x128xbf16> to vector<8x128xbf16>
    %cst_50 = arith.constant dense<0.000000e+00> : vector<64x128xf32>
    %39 = tpu.matmul %36, %38, %cst_50 {dimension_numbers = #tpu.dot_dimension_numbers<[1], [0], [0], [1], [0, 0, 1, 1], [], []>} : vector<64x8xbf16>, vector<8x128xbf16>, vector<64x128xf32> -> vector<64x128xf32>
    %c0_51 = arith.constant 0 : index
    %c1_52 = arith.constant 1 : index
    %c0_53 = arith.constant 0 : index
    %c0_54 = arith.constant 0 : index
    %40 = vector.load %arg3[%c0_51, %c1_52, %c0_53, %c0_54] : memref<1x2x80x8xbf16, #tpu.memory_space<vmem>>, vector<1x1x64x8xbf16>
    %41 = vector.shape_cast %40 : vector<1x1x64x8xbf16> to vector<64x8xbf16>
    %c0_55 = arith.constant 0 : index
    %c1_56 = arith.constant 1 : index
    %c0_57 = arith.constant 0 : index
    %c0_58 = arith.constant 0 : index
    %42 = vector.load %arg4[%c0_55, %c1_56, %c0_57, %c0_58] : memref<1x5x8x128xbf16, #tpu.memory_space<vmem>>, vector<1x1x8x128xbf16>
    %43 = vector.shape_cast %42 : vector<1x1x8x128xbf16> to vector<8x128xbf16>
    %cst_59 = arith.constant dense<0.000000e+00> : vector<64x128xf32>
    %44 = tpu.matmul %41, %43, %cst_59 {dimension_numbers = #tpu.dot_dimension_numbers<[1], [0], [0], [1], [0, 0, 1, 1], [], []>} : vector<64x8xbf16>, vector<8x128xbf16>, vector<64x128xf32> -> vector<64x128xf32>
    %45 = arith.addf %39, %44 : vector<64x128xf32>
    %c0_60 = arith.constant 0 : index
    %c1_61 = arith.constant 1 : index
    %c8_62 = arith.constant 8 : index
    %c0_63 = arith.constant 0 : index
    %46 = vector.load %arg2[%c0_60, %c1_61, %c8_62, %c0_63] : memref<1x2x80x8xbf16, #tpu.memory_space<vmem>>, vector<1x1x64x8xbf16>
    %47 = vector.shape_cast %46 : vector<1x1x64x8xbf16> to vector<64x8xbf16>
    %c0_64 = arith.constant 0 : index
    %c2_65 = arith.constant 2 : index
    %c0_66 = arith.constant 0 : index
    %c0_67 = arith.constant 0 : index
    %48 = vector.load %arg4[%c0_64, %c2_65, %c0_66, %c0_67] : memref<1x5x8x128xbf16, #tpu.memory_space<vmem>>, vector<1x1x8x128xbf16>
    %49 = vector.shape_cast %48 : vector<1x1x8x128xbf16> to vector<8x128xbf16>
    %cst_68 = arith.constant dense<0.000000e+00> : vector<64x128xf32>
    %50 = tpu.matmul %47, %49, %cst_68 {dimension_numbers = #tpu.dot_dimension_numbers<[1], [0], [0], [1], [0, 0, 1, 1], [], []>} : vector<64x8xbf16>, vector<8x128xbf16>, vector<64x128xf32> -> vector<64x128xf32>
    %51 = arith.addf %45, %50 : vector<64x128xf32>
    %c0_69 = arith.constant 0 : index
    %c1_70 = arith.constant 1 : index
    %c8_71 = arith.constant 8 : index
    %c0_72 = arith.constant 0 : index
    %52 = vector.load %arg3[%c0_69, %c1_70, %c8_71, %c0_72] : memref<1x2x80x8xbf16, #tpu.memory_space<vmem>>, vector<1x1x64x8xbf16>
    %53 = vector.shape_cast %52 : vector<1x1x64x8xbf16> to vector<64x8xbf16>
    %c0_73 = arith.constant 0 : index
    %c3_74 = arith.constant 3 : index
    %c0_75 = arith.constant 0 : index
    %c0_76 = arith.constant 0 : index
    %54 = vector.load %arg4[%c0_73, %c3_74, %c0_75, %c0_76] : memref<1x5x8x128xbf16, #tpu.memory_space<vmem>>, vector<1x1x8x128xbf16>
    %55 = vector.shape_cast %54 : vector<1x1x8x128xbf16> to vector<8x128xbf16>
    %cst_77 = arith.constant dense<0.000000e+00> : vector<64x128xf32>
    %56 = tpu.matmul %53, %55, %cst_77 {dimension_numbers = #tpu.dot_dimension_numbers<[1], [0], [0], [1], [0, 0, 1, 1], [], []>} : vector<64x8xbf16>, vector<8x128xbf16>, vector<64x128xf32> -> vector<64x128xf32>
    %57 = arith.addf %51, %56 : vector<64x128xf32>
    %c0_78 = arith.constant 0 : index
    %c1_79 = arith.constant 1 : index
    %c16_80 = arith.constant 16 : index
    %c0_81 = arith.constant 0 : index
    %58 = vector.load %arg2[%c0_78, %c1_79, %c16_80, %c0_81] : memref<1x2x80x8xbf16, #tpu.memory_space<vmem>>, vector<1x1x64x8xbf16>
    %59 = vector.shape_cast %58 : vector<1x1x64x8xbf16> to vector<64x8xbf16>
    %c0_82 = arith.constant 0 : index
    %c4_83 = arith.constant 4 : index
    %c0_84 = arith.constant 0 : index
    %c0_85 = arith.constant 0 : index
    %60 = vector.load %arg4[%c0_82, %c4_83, %c0_84, %c0_85] : memref<1x5x8x128xbf16, #tpu.memory_space<vmem>>, vector<1x1x8x128xbf16>
    %61 = vector.shape_cast %60 : vector<1x1x8x128xbf16> to vector<8x128xbf16>
    %cst_86 = arith.constant dense<0.000000e+00> : vector<64x128xf32>
    %62 = tpu.matmul %59, %61, %cst_86 {dimension_numbers = #tpu.dot_dimension_numbers<[1], [0], [0], [1], [0, 0, 1, 1], [], []>} : vector<64x8xbf16>, vector<8x128xbf16>, vector<64x128xf32> -> vector<64x128xf32>
    %63 = arith.addf %57, %62 : vector<64x128xf32>
    %c64 = arith.constant 64 : index
    %c0_87 = arith.constant 0 : index
    %64 = vector.load %arg8[%c64, %c0_87] : memref<128x128xf32, #tpu.memory_space<vmem>>, vector<64x128xf32>
    %65 = arith.addf %64, %63 : vector<64x128xf32>
    %c64_88 = arith.constant 64 : index
    %c0_89 = arith.constant 0 : index
    %66 = vector.load %arg8[%c64_88, %c0_89] : memref<128x128xf32, #tpu.memory_space<vmem>>, vector<64x128xf32>
    tpu.vector_store %arg8[%c64_88, %c0_89], %65 {strides = array<i32>} : memref<128x128xf32, #tpu.memory_space<vmem>>, vector<64x128xf32>,
    %c4_i32 = arith.constant 4 : i32
    %67 = arith.cmpi eq, %arg1, %c4_i32 : i32
    %68 = arith.extui %67 : i1 to i32
    %c0_i32_90 = arith.constant 0 : i32
    %69 = arith.cmpi ne, %68, %c0_i32_90 : i32
    scf.if %69 {
      %c0_91 = arith.constant 0 : index
      %c0_92 = arith.constant 0 : index
      %70 = vector.load %arg8[%c0_91, %c0_92] : memref<128x128xf32, #tpu.memory_space<vmem>>, vector<128x128xf32>
      %71 = arith.truncf %70 : vector<128x128xf32> to vector<128x128xbf16>
      %c0_93 = arith.constant 0 : index
      %c0_94 = arith.constant 0 : index
      %72 = vector.load %arg5[%c0_93, %c0_94] : memref<128x128xbf16, #tpu.memory_space<vmem>>, vector<128x128xbf16>
      tpu.vector_store %arg5[%c0_93, %c0_94], %71 {strides = array<i32>} : memref<128x128xbf16, #tpu.memory_space<vmem>>, vector<128x128xbf16>,
      %cst_95 = arith.constant dense<0.000000e+00> : vector<128xf32>
      %73 = vector.multi_reduction <add>, %70, %cst_95 [0] : vector<128x128xf32> to vector<128xf32>
      %74 = vector.shape_cast %73 : vector<128xf32> to vector<1x128xf32>
      %75 = arith.mulf %70, %70 : vector<128x128xf32>
      %cst_96 = arith.constant dense<0.000000e+00> : vector<128xf32>
      %76 = vector.multi_reduction <add>, %75, %cst_96 [0] : vector<128x128xf32> to vector<128xf32>
      %77 = vector.shape_cast %76 : vector<128xf32> to vector<1x128xf32>
      %78 = vector.shape_cast %74 : vector<1x128xf32> to vector<1x1x128xf32>
      %79 = vector.shape_cast %78 : vector<1x1x128xf32> to vector<1x1x128xf32>
      %80 = vector.broadcast %79 : vector<1x1x128xf32> to vector<1x8x128xf32>
      %c0_97 = arith.constant 0 : index
      %c0_98 = arith.constant 0 : index
      %c0_99 = arith.constant 0 : index
      %81 = vector.load %arg6[%c0_97, %c0_98, %c0_99] : memref<1x8x128xf32, #tpu.memory_space<vmem>>, vector<1x8x128xf32>
      tpu.vector_store %arg6[%c0_97, %c0_98, %c0_99], %80 {strides = array<i32>} : memref<1x8x128xf32, #tpu.memory_space<vmem>>, vector<1x8x128xf32>,
      %82 = vector.shape_cast %77 : vector<1x128xf32> to vector<1x1x128xf32>
      %83 = vector.shape_cast %82 : vector<1x1x128xf32> to vector<1x1x128xf32>
      %84 = vector.broadcast %83 : vector<1x1x128xf32> to vector<1x8x128xf32>
      %c0_100 = arith.constant 0 : index
      %c0_101 = arith.constant 0 : index
      %c0_102 = arith.constant 0 : index
      %85 = vector.load %arg7[%c0_100, %c0_101, %c0_102] : memref<1x8x128xf32, #tpu.memory_space<vmem>>, vector<1x8x128xf32>
      tpu.vector_store %arg7[%c0_100, %c0_101, %c0_102], %84 {strides = array<i32>} : memref<1x8x128xf32, #tpu.memory_space<vmem>>, vector<1x8x128xf32>,
    } else {
    }
    return
  }
  func.func @transform_0(%arg0: i32, %arg1: i32) -> (i32, i32, i32, i32) {
    %c0_i32 = arith.constant 0 : i32
    %c0_i32_0 = arith.constant 0 : i32
    %c0_i32_1 = arith.constant 0 : i32
    return %arg1, %arg0, %c0_i32, %c0_i32_0 : i32, i32, i32, i32
  }
  func.func @transform_1(%arg0: i32, %arg1: i32) -> (i32, i32, i32, i32) {
    %c0_i32 = arith.constant 0 : i32
    %c0_i32_0 = arith.constant 0 : i32
    %c0_i32_1 = arith.constant 0 : i32
    return %arg1, %arg0, %c0_i32, %c0_i32_0 : i32, i32, i32, i32
  }
  func.func @transform_2(%arg0: i32, %arg1: i32) -> (i32, i32, i32, i32) {
    %c0_i32 = arith.constant 0 : i32
    %c0_i32_0 = arith.constant 0 : i32
    %c0_i32_1 = arith.constant 0 : i32
    %c0_i32_2 = arith.constant 0 : i32
    return %arg1, %c0_i32, %c0_i32_0, %c0_i32_1 : i32, i32, i32, i32
  }
  func.func @transform_3(%arg0: i32, %arg1: i32) -> (i32, i32) {
    %c0_i32 = arith.constant 0 : i32
    %c0_i32_0 = arith.constant 0 : i32
    return %arg0, %c0_i32 : i32, i32
  }
  func.func @transform_4(%arg0: i32, %arg1: i32) -> (i32, i32, i32) {
    %c0_i32 = arith.constant 0 : i32
    %c0_i32_0 = arith.constant 0 : i32
    %c0_i32_1 = arith.constant 0 : i32
    return %arg0, %c0_i32, %c0_i32_0 : i32, i32, i32
  }
  func.func @transform_5(%arg0: i32, %arg1: i32) -> (i32, i32, i32) {
    %c0_i32 = arith.constant 0 : i32
    %c0_i32_0 = arith.constant 0 : i32
    %c0_i32_1 = arith.constant 0 : i32
    return %arg0, %c0_i32, %c0_i32_0 : i32, i32, i32
  }
}

module attributes {stable_mosaic.version = 11 : i64} {
  func.func @_bn_lrelu_kernel(%arg0: i32, %arg1: memref<128x128xbf16, #tpu.memory_space<vmem>>, %arg2: memref<1x128xf32, #tpu.memory_space<vmem>>, %arg3: memref<1x128xf32, #tpu.memory_space<vmem>>, %arg4: memref<128x128xbf16, #tpu.memory_space<vmem>>) attributes {dimension_semantics = [#tpu.dimension_semantics<parallel>], iteration_bounds = array<i64: 2>, scalar_prefetch = 0 : i64, scratch_operands = 0 : i64, tpu.core_type = #tpu.core_type<tc>, window_params = [{transform_indices = @transform_0, window_bounds = array<i64: 128, 128>}, {pipeline_mode = #tpu.pipeline_mode<synchronous>, transform_indices = @transform_1, window_bounds = array<i64: 1, 128>}, {pipeline_mode = #tpu.pipeline_mode<synchronous>, transform_indices = @transform_2, window_bounds = array<i64: 1, 128>}, {transform_indices = @transform_3, window_bounds = array<i64: 128, 128>}]} {
    %c0 = arith.constant 0 : index
    %c0_0 = arith.constant 0 : index
    %0 = vector.load %arg1[%c0, %c0_0] : memref<128x128xbf16, #tpu.memory_space<vmem>>, vector<128x128xbf16>
    %1 = arith.extf %0 : vector<128x128xbf16> to vector<128x128xf32>
    %c0_1 = arith.constant 0 : index
    %c0_2 = arith.constant 0 : index
    %2 = vector.load %arg2[%c0_1, %c0_2] : memref<1x128xf32, #tpu.memory_space<vmem>>, vector<1x128xf32>
    %3 = vector.broadcast %2 : vector<1x128xf32> to vector<128x128xf32>
    %4 = arith.mulf %1, %3 : vector<128x128xf32>
    %c0_3 = arith.constant 0 : index
    %c0_4 = arith.constant 0 : index
    %5 = vector.load %arg3[%c0_3, %c0_4] : memref<1x128xf32, #tpu.memory_space<vmem>>, vector<1x128xf32>
    %6 = vector.broadcast %5 : vector<1x128xf32> to vector<128x128xf32>
    %7 = arith.addf %4, %6 : vector<128x128xf32>
    %cst = arith.constant 0.000000e+00 : f32
    %8 = vector.broadcast %cst : f32 to vector<128x128xf32>
    %9 = arith.cmpf oge, %7, %8 : vector<128x128xf32>
    %cst_5 = arith.constant 2.000000e-01 : f32
    %10 = vector.broadcast %cst_5 : f32 to vector<128x128xf32>
    %11 = arith.mulf %10, %7 : vector<128x128xf32>
    %12 = arith.select %9, %7, %11 : vector<128x128xi1>, vector<128x128xf32>
    %13 = arith.truncf %12 : vector<128x128xf32> to vector<128x128xbf16>
    %c0_6 = arith.constant 0 : index
    %c0_7 = arith.constant 0 : index
    %14 = vector.load %arg4[%c0_6, %c0_7] : memref<128x128xbf16, #tpu.memory_space<vmem>>, vector<128x128xbf16>
    tpu.vector_store %arg4[%c0_6, %c0_7], %13 {strides = array<i32>} : memref<128x128xbf16, #tpu.memory_space<vmem>>, vector<128x128xbf16>,
    return
  }
  func.func @transform_0(%arg0: i32) -> (i32, i32) {
    %c0_i32 = arith.constant 0 : i32
    %c0_i32_0 = arith.constant 0 : i32
    return %arg0, %c0_i32 : i32, i32
  }
  func.func @transform_1(%arg0: i32) -> (i32, i32) {
    %c0_i32 = arith.constant 0 : i32
    %c0_i32_0 = arith.constant 0 : i32
    %c0_i32_1 = arith.constant 0 : i32
    return %c0_i32, %c0_i32_0 : i32, i32
  }
  func.func @transform_2(%arg0: i32) -> (i32, i32) {
    %c0_i32 = arith.constant 0 : i32
    %c0_i32_0 = arith.constant 0 : i32
    %c0_i32_1 = arith.constant 0 : i32
    return %c0_i32, %c0_i32_0 : i32, i32
  }
  func.func @transform_3(%arg0: i32) -> (i32, i32) {
    %c0_i32 = arith.constant 0 : i32
    %c0_i32_0 = arith.constant 0 : i32
    return %arg0, %c0_i32 : i32, i32
  }
}

module attributes {stable_mosaic.version = 11 : i64} {
  func.func @_bn_lrelu_kernel(%arg0: i32, %arg1: memref<32x128xbf16, #tpu.memory_space<vmem>>, %arg2: memref<1x128xf32, #tpu.memory_space<vmem>>, %arg3: memref<1x128xf32, #tpu.memory_space<vmem>>, %arg4: memref<32x128xbf16, #tpu.memory_space<vmem>>) attributes {dimension_semantics = [#tpu.dimension_semantics<parallel>], iteration_bounds = array<i64: 2>, scalar_prefetch = 0 : i64, scratch_operands = 0 : i64, tpu.core_type = #tpu.core_type<tc>, window_params = [{transform_indices = @transform_0, window_bounds = array<i64: 32, 128>}, {pipeline_mode = #tpu.pipeline_mode<synchronous>, transform_indices = @transform_1, window_bounds = array<i64: 1, 128>}, {pipeline_mode = #tpu.pipeline_mode<synchronous>, transform_indices = @transform_2, window_bounds = array<i64: 1, 128>}, {transform_indices = @transform_3, window_bounds = array<i64: 32, 128>}]} {
    %c0 = arith.constant 0 : index
    %c0_0 = arith.constant 0 : index
    %0 = vector.load %arg1[%c0, %c0_0] : memref<32x128xbf16, #tpu.memory_space<vmem>>, vector<32x128xbf16>
    %1 = arith.extf %0 : vector<32x128xbf16> to vector<32x128xf32>
    %c0_1 = arith.constant 0 : index
    %c0_2 = arith.constant 0 : index
    %2 = vector.load %arg2[%c0_1, %c0_2] : memref<1x128xf32, #tpu.memory_space<vmem>>, vector<1x128xf32>
    %3 = vector.broadcast %2 : vector<1x128xf32> to vector<32x128xf32>
    %4 = arith.mulf %1, %3 : vector<32x128xf32>
    %c0_3 = arith.constant 0 : index
    %c0_4 = arith.constant 0 : index
    %5 = vector.load %arg3[%c0_3, %c0_4] : memref<1x128xf32, #tpu.memory_space<vmem>>, vector<1x128xf32>
    %6 = vector.broadcast %5 : vector<1x128xf32> to vector<32x128xf32>
    %7 = arith.addf %4, %6 : vector<32x128xf32>
    %cst = arith.constant 0.000000e+00 : f32
    %8 = vector.broadcast %cst : f32 to vector<32x128xf32>
    %9 = arith.cmpf oge, %7, %8 : vector<32x128xf32>
    %cst_5 = arith.constant 2.000000e-01 : f32
    %10 = vector.broadcast %cst_5 : f32 to vector<32x128xf32>
    %11 = arith.mulf %10, %7 : vector<32x128xf32>
    %12 = arith.select %9, %7, %11 : vector<32x128xi1>, vector<32x128xf32>
    %13 = arith.truncf %12 : vector<32x128xf32> to vector<32x128xbf16>
    %c0_6 = arith.constant 0 : index
    %c0_7 = arith.constant 0 : index
    %14 = vector.load %arg4[%c0_6, %c0_7] : memref<32x128xbf16, #tpu.memory_space<vmem>>, vector<32x128xbf16>
    tpu.vector_store %arg4[%c0_6, %c0_7], %13 {strides = array<i32>} : memref<32x128xbf16, #tpu.memory_space<vmem>>, vector<32x128xbf16>,
    return
  }
  func.func @transform_0(%arg0: i32) -> (i32, i32) {
    %c0_i32 = arith.constant 0 : i32
    %c0_i32_0 = arith.constant 0 : i32
    return %arg0, %c0_i32 : i32, i32
  }
  func.func @transform_1(%arg0: i32) -> (i32, i32) {
    %c0_i32 = arith.constant 0 : i32
    %c0_i32_0 = arith.constant 0 : i32
    %c0_i32_1 = arith.constant 0 : i32
    return %c0_i32, %c0_i32_0 : i32, i32
  }
  func.func @transform_2(%arg0: i32) -> (i32, i32) {
    %c0_i32 = arith.constant 0 : i32
    %c0_i32_0 = arith.constant 0 : i32
    %c0_i32_1 = arith.constant 0 : i32
    return %c0_i32, %c0_i32_0 : i32, i32
  }
  func.func @transform_3(%arg0: i32) -> (i32, i32) {
    %c0_i32 = arith.constant 0 : i32
    %c0_i32_0 = arith.constant 0 : i32
    return %arg0, %c0_i32 : i32, i32
  }
}

module attributes {stable_mosaic.version = 11 : i64} {
  func.func @_tap_gemm_stats_kernel(%arg0: i32, %arg1: i32, %arg2: memref<1x2x24x8xbf16, #tpu.memory_space<vmem>>, %arg3: memref<1x2x24x8xbf16, #tpu.memory_space<vmem>>, %arg4: memref<1x5x8x128xbf16, #tpu.memory_space<vmem>>, %arg5: memref<32x128xbf16, #tpu.memory_space<vmem>>, %arg6: memref<1x8x128xf32, #tpu.memory_space<vmem>>, %arg7: memref<1x8x128xf32, #tpu.memory_space<vmem>>, %arg8: memref<32x128xf32, #tpu.memory_space<vmem>>) attributes {dimension_semantics = [#tpu.dimension_semantics<parallel>, #tpu.dimension_semantics<arbitrary>], iteration_bounds = array<i64: 2, 5>, scalar_prefetch = 0 : i64, scratch_operands = 1 : i64, tpu.core_type = #tpu.core_type<tc>, window_params = [{transform_indices = @transform_0, window_bounds = array<i64: 1, 2, 24, 8>}, {transform_indices = @transform_1, window_bounds = array<i64: 1, 2, 24, 8>}, {transform_indices = @transform_2, window_bounds = array<i64: 1, 5, 8, 128>}, {transform_indices = @transform_3, window_bounds = array<i64: 32, 128>}, {transform_indices = @transform_4, window_bounds = array<i64: 1, 8, 128>}, {transform_indices = @transform_5, window_bounds = array<i64: 1, 8, 128>}]} {
    %c0_i32 = arith.constant 0 : i32
    %0 = arith.cmpi eq, %arg1, %c0_i32 : i32
    %1 = arith.extui %0 : i1 to i32
    %c0_i32_0 = arith.constant 0 : i32
    %2 = arith.cmpi ne, %1, %c0_i32_0 : i32
    scf.if %2 {
      %cst_92 = arith.constant 0.000000e+00 : f32
      %70 = vector.broadcast %cst_92 : f32 to vector<32x128xf32>
      %c0_93 = arith.constant 0 : index
      %c0_94 = arith.constant 0 : index
      %71 = vector.load %arg8[%c0_93, %c0_94] : memref<32x128xf32, #tpu.memory_space<vmem>>, vector<32x128xf32>
      tpu.vector_store %arg8[%c0_93, %c0_94], %70 {strides = array<i32>} : memref<32x128xf32, #tpu.memory_space<vmem>>, vector<32x128xf32>,
    } else {
    }
    %c0 = arith.constant 0 : index
    %c0_1 = arith.constant 0 : index
    %c0_2 = arith.constant 0 : index
    %c0_3 = arith.constant 0 : index
    %3 = vector.load %arg2[%c0, %c0_1, %c0_2, %c0_3] : memref<1x2x24x8xbf16, #tpu.memory_space<vmem>>, vector<1x1x16x8xbf16>
    %4 = vector.shape_cast %3 : vector<1x1x16x8xbf16> to vector<16x8xbf16>
    %c0_4 = arith.constant 0 : index
    %c0_5 = arith.constant 0 : index
    %c0_6 = arith.constant 0 : index
    %c0_7 = arith.constant 0 : index
    %5 = vector.load %arg4[%c0_4, %c0_5, %c0_6, %c0_7] : memref<1x5x8x128xbf16, #tpu.memory_space<vmem>>, vector<1x1x8x128xbf16>
    %6 = vector.shape_cast %5 : vector<1x1x8x128xbf16> to vector<8x128xbf16>
    %cst = arith.constant dense<0.000000e+00> : vector<16x128xf32>
    %7 = tpu.matmul %4, %6, %cst {dimension_numbers = #tpu.dot_dimension_numbers<[1], [0], [0], [1], [0, 0, 1, 1], [], []>} : vector<16x8xbf16>, vector<8x128xbf16>, vector<16x128xf32> -> vector<16x128xf32>
    %c0_8 = arith.constant 0 : index
    %c0_9 = arith.constant 0 : index
    %c0_10 = arith.constant 0 : index
    %c0_11 = arith.constant 0 : index
    %8 = vector.load %arg3[%c0_8, %c0_9, %c0_10, %c0_11] : memref<1x2x24x8xbf16, #tpu.memory_space<vmem>>, vector<1x1x16x8xbf16>
    %9 = vector.shape_cast %8 : vector<1x1x16x8xbf16> to vector<16x8xbf16>
    %c0_12 = arith.constant 0 : index
    %c1 = arith.constant 1 : index
    %c0_13 = arith.constant 0 : index
    %c0_14 = arith.constant 0 : index
    %10 = vector.load %arg4[%c0_12, %c1, %c0_13, %c0_14] : memref<1x5x8x128xbf16, #tpu.memory_space<vmem>>, vector<1x1x8x128xbf16>
    %11 = vector.shape_cast %10 : vector<1x1x8x128xbf16> to vector<8x128xbf16>
    %cst_15 = arith.constant dense<0.000000e+00> : vector<16x128xf32>
    %12 = tpu.matmul %9, %11, %cst_15 {dimension_numbers = #tpu.dot_dimension_numbers<[1], [0], [0], [1], [0, 0, 1, 1], [], []>} : vector<16x8xbf16>, vector<8x128xbf16>, vector<16x128xf32> -> vector<16x128xf32>
    %13 = arith.addf %7, %12 : vector<16x128xf32>
    %c0_16 = arith.constant 0 : index
    %c0_17 = arith.constant 0 : index
    %c4 = arith.constant 4 : index
    %c0_18 = arith.constant 0 : index
    %14 = vector.load %arg2[%c0_16, %c0_17, %c4, %c0_18] : memref<1x2x24x8xbf16, #tpu.memory_space<vmem>>, vector<1x1x16x8xbf16>
    %15 = vector.shape_cast %14 : vector<1x1x16x8xbf16> to vector<16x8xbf16>
    %c0_19 = arith.constant 0 : index
    %c2 = arith.constant 2 : index
    %c0_20 = arith.constant 0 : index
    %c0_21 = arith.constant 0 : index
    %16 = vector.load %arg4[%c0_19, %c2, %c0_20, %c0_21] : memref<1x5x8x128xbf16, #tpu.memory_space<vmem>>, vector<1x1x8x128xbf16>
    %17 = vector.shape_cast %16 : vector<1x1x8x128xbf16> to vector<8x128xbf16>
    %cst_22 = arith.constant dense<0.000000e+00> : vector<16x128xf32>
    %18 = tpu.matmul %15, %17, %cst_22 {dimension_numbers = #tpu.dot_dimension_numbers<[1], [0], [0], [1], [0, 0, 1, 1], [], []>} : vector<16x8xbf16>, vector<8x128xbf16>, vector<16x128xf32> -> vector<16x128xf32>
    %19 = arith.addf %13, %18 : vector<16x128xf32>
    %c0_23 = arith.constant 0 : index
    %c0_24 = arith.constant 0 : index
    %c4_25 = arith.constant 4 : index
    %c0_26 = arith.constant 0 : index
    %20 = vector.load %arg3[%c0_23, %c0_24, %c4_25, %c0_26] : memref<1x2x24x8xbf16, #tpu.memory_space<vmem>>, vector<1x1x16x8xbf16>
    %21 = vector.shape_cast %20 : vector<1x1x16x8xbf16> to vector<16x8xbf16>
    %c0_27 = arith.constant 0 : index
    %c3 = arith.constant 3 : index
    %c0_28 = arith.constant 0 : index
    %c0_29 = arith.constant 0 : index
    %22 = vector.load %arg4[%c0_27, %c3, %c0_28, %c0_29] : memref<1x5x8x128xbf16, #tpu.memory_space<vmem>>, vector<1x1x8x128xbf16>
    %23 = vector.shape_cast %22 : vector<1x1x8x128xbf16> to vector<8x128xbf16>
    %cst_30 = arith.constant dense<0.000000e+00> : vector<16x128xf32>
    %24 = tpu.matmul %21, %23, %cst_30 {dimension_numbers = #tpu.dot_dimension_numbers<[1], [0], [0], [1], [0, 0, 1, 1], [], []>} : vector<16x8xbf16>, vector<8x128xbf16>, vector<16x128xf32> -> vector<16x128xf32>
    %25 = arith.addf %19, %24 : vector<16x128xf32>
    %c0_31 = arith.constant 0 : index
    %c0_32 = arith.constant 0 : index
    %c8 = arith.constant 8 : index
    %c0_33 = arith.constant 0 : index
    %26 = vector.load %arg2[%c0_31, %c0_32, %c8, %c0_33] : memref<1x2x24x8xbf16, #tpu.memory_space<vmem>>, vector<1x1x16x8xbf16>
    %27 = vector.shape_cast %26 : vector<1x1x16x8xbf16> to vector<16x8xbf16>
    %c0_34 = arith.constant 0 : index
    %c4_35 = arith.constant 4 : index
    %c0_36 = arith.constant 0 : index
    %c0_37 = arith.constant 0 : index
    %28 = vector.load %arg4[%c0_34, %c4_35, %c0_36, %c0_37] : memref<1x5x8x128xbf16, #tpu.memory_space<vmem>>, vector<1x1x8x128xbf16>
    %29 = vector.shape_cast %28 : vector<1x1x8x128xbf16> to vector<8x128xbf16>
    %cst_38 = arith.constant dense<0.000000e+00> : vector<16x128xf32>
    %30 = tpu.matmul %27, %29, %cst_38 {dimension_numbers = #tpu.dot_dimension_numbers<[1], [0], [0], [1], [0, 0, 1, 1], [], []>} : vector<16x8xbf16>, vector<8x128xbf16>, vector<16x128xf32> -> vector<16x128xf32>
    %31 = arith.addf %25, %30 : vector<16x128xf32>
    %c0_39 = arith.constant 0 : index
    %c0_40 = arith.constant 0 : index
    %32 = vector.load %arg8[%c0_39, %c0_40] : memref<32x128xf32, #tpu.memory_space<vmem>>, vector<16x128xf32>
    %33 = arith.addf %32, %31 : vector<16x128xf32>
    %c0_41 = arith.constant 0 : index
    %c0_42 = arith.constant 0 : index
    %34 = vector.load %arg8[%c0_41, %c0_42] : memref<32x128xf32, #tpu.memory_space<vmem>>, vector<16x128xf32>
    tpu.vector_store %arg8[%c0_41, %c0_42], %33 {strides = array<i32>} : memref<32x128xf32, #tpu.memory_space<vmem>>, vector<16x128xf32>,
    %c0_43 = arith.constant 0 : index
    %c1_44 = arith.constant 1 : index
    %c0_45 = arith.constant 0 : index
    %c0_46 = arith.constant 0 : index
    %35 = vector.load %arg2[%c0_43, %c1_44, %c0_45, %c0_46] : memref<1x2x24x8xbf16, #tpu.memory_space<vmem>>, vector<1x1x16x8xbf16>
    %36 = vector.shape_cast %35 : vector<1x1x16x8xbf16> to vector<16x8xbf16>
    %c0_47 = arith.constant 0 : index
    %c0_48 = arith.constant 0 : index
    %c0_49 = arith.constant 0 : index
    %c0_50 = arith.constant 0 : index
    %37 = vector.load %arg4[%c0_47, %c0_48, %c0_49, %c0_50] : memref<1x5x8x128xbf16, #tpu.memory_space<vmem>>, vector<1x1x8x128xbf16>
    %38 = vector.shape_cast %37 : vector<1x1x8x128xbf16> to vector<8x128xbf16>
    %cst_51 = arith.constant dense<0.000000e+00> : vector<16x128xf32>
    %39 = tpu.matmul %36, %38, %cst_51 {dimension_numbers = #tpu.dot_dimension_numbers<[1], [0], [0], [1], [0, 0, 1, 1], [], []>} : vector<16x8xbf16>, vector<8x128xbf16>, vector<16x128xf32> -> vector<16x128xf32>
    %c0_52 = arith.constant 0 : index
    %c1_53 = arith.constant 1 : index
    %c0_54 = arith.constant 0 : index
    %c0_55 = arith.constant 0 : index
    %40 = vector.load %arg3[%c0_52, %c1_53, %c0_54, %c0_55] : memref<1x2x24x8xbf16, #tpu.memory_space<vmem>>, vector<1x1x16x8xbf16>
    %41 = vector.shape_cast %40 : vector<1x1x16x8xbf16> to vector<16x8xbf16>
    %c0_56 = arith.constant 0 : index
    %c1_57 = arith.constant 1 : index
    %c0_58 = arith.constant 0 : index
    %c0_59 = arith.constant 0 : index
    %42 = vector.load %arg4[%c0_56, %c1_57, %c0_58, %c0_59] : memref<1x5x8x128xbf16, #tpu.memory_space<vmem>>, vector<1x1x8x128xbf16>
    %43 = vector.shape_cast %42 : vector<1x1x8x128xbf16> to vector<8x128xbf16>
    %cst_60 = arith.constant dense<0.000000e+00> : vector<16x128xf32>
    %44 = tpu.matmul %41, %43, %cst_60 {dimension_numbers = #tpu.dot_dimension_numbers<[1], [0], [0], [1], [0, 0, 1, 1], [], []>} : vector<16x8xbf16>, vector<8x128xbf16>, vector<16x128xf32> -> vector<16x128xf32>
    %45 = arith.addf %39, %44 : vector<16x128xf32>
    %c0_61 = arith.constant 0 : index
    %c1_62 = arith.constant 1 : index
    %c4_63 = arith.constant 4 : index
    %c0_64 = arith.constant 0 : index
    %46 = vector.load %arg2[%c0_61, %c1_62, %c4_63, %c0_64] : memref<1x2x24x8xbf16, #tpu.memory_space<vmem>>, vector<1x1x16x8xbf16>
    %47 = vector.shape_cast %46 : vector<1x1x16x8xbf16> to vector<16x8xbf16>
    %c0_65 = arith.constant 0 : index
    %c2_66 = arith.constant 2 : index
    %c0_67 = arith.constant 0 : index
    %c0_68 = arith.constant 0 : index
    %48 = vector.load %arg4[%c0_65, %c2_66, %c0_67, %c0_68] : memref<1x5x8x128xbf16, #tpu.memory_space<vmem>>, vector<1x1x8x128xbf16>
    %49 = vector.shape_cast %48 : vector<1x1x8x128xbf16> to vector<8x128xbf16>
    %cst_69 = arith.constant dense<0.000000e+00> : vector<16x128xf32>
    %50 = tpu.matmul %47, %49, %cst_69 {dimension_numbers = #tpu.dot_dimension_numbers<[1], [0], [0], [1], [0, 0, 1, 1], [], []>} : vector<16x8xbf16>, vector<8x128xbf16>, vector<16x128xf32> -> vector<16x128xf32>
    %51 = arith.addf %45, %50 : vector<16x128xf32>
    %c0_70 = arith.constant 0 : index
    %c1_71 = arith.constant 1 : index
    %c4_72 = arith.constant 4 : index
    %c0_73 = arith.constant 0 : index
    %52 = vector.load %arg3[%c0_70, %c1_71, %c4_72, %c0_73] : memref<1x2x24x8xbf16, #tpu.memory_space<vmem>>, vector<1x1x16x8xbf16>
    %53 = vector.shape_cast %52 : vector<1x1x16x8xbf16> to vector<16x8xbf16>
    %c0_74 = arith.constant 0 : index
    %c3_75 = arith.constant 3 : index
    %c0_76 = arith.constant 0 : index
    %c0_77 = arith.constant 0 : index
    %54 = vector.load %arg4[%c0_74, %c3_75, %c0_76, %c0_77] : memref<1x5x8x128xbf16, #tpu.memory_space<vmem>>, vector<1x1x8x128xbf16>
    %55 = vector.shape_cast %54 : vector<1x1x8x128xbf16> to vector<8x128xbf16>
    %cst_78 = arith.constant dense<0.000000e+00> : vector<16x128xf32>
    %56 = tpu.matmul %53, %55, %cst_78 {dimension_numbers = #tpu.dot_dimension_numbers<[1], [0], [0], [1], [0, 0, 1, 1], [], []>} : vector<16x8xbf16>, vector<8x128xbf16>, vector<16x128xf32> -> vector<16x128xf32>
    %57 = arith.addf %51, %56 : vector<16x128xf32>
    %c0_79 = arith.constant 0 : index
    %c1_80 = arith.constant 1 : index
    %c8_81 = arith.constant 8 : index
    %c0_82 = arith.constant 0 : index
    %58 = vector.load %arg2[%c0_79, %c1_80, %c8_81, %c0_82] : memref<1x2x24x8xbf16, #tpu.memory_space<vmem>>, vector<1x1x16x8xbf16>
    %59 = vector.shape_cast %58 : vector<1x1x16x8xbf16> to vector<16x8xbf16>
    %c0_83 = arith.constant 0 : index
    %c4_84 = arith.constant 4 : index
    %c0_85 = arith.constant 0 : index
    %c0_86 = arith.constant 0 : index
    %60 = vector.load %arg4[%c0_83, %c4_84, %c0_85, %c0_86] : memref<1x5x8x128xbf16, #tpu.memory_space<vmem>>, vector<1x1x8x128xbf16>
    %61 = vector.shape_cast %60 : vector<1x1x8x128xbf16> to vector<8x128xbf16>
    %cst_87 = arith.constant dense<0.000000e+00> : vector<16x128xf32>
    %62 = tpu.matmul %59, %61, %cst_87 {dimension_numbers = #tpu.dot_dimension_numbers<[1], [0], [0], [1], [0, 0, 1, 1], [], []>} : vector<16x8xbf16>, vector<8x128xbf16>, vector<16x128xf32> -> vector<16x128xf32>
    %63 = arith.addf %57, %62 : vector<16x128xf32>
    %c16 = arith.constant 16 : index
    %c0_88 = arith.constant 0 : index
    %64 = vector.load %arg8[%c16, %c0_88] : memref<32x128xf32, #tpu.memory_space<vmem>>, vector<16x128xf32>
    %65 = arith.addf %64, %63 : vector<16x128xf32>
    %c16_89 = arith.constant 16 : index
    %c0_90 = arith.constant 0 : index
    %66 = vector.load %arg8[%c16_89, %c0_90] : memref<32x128xf32, #tpu.memory_space<vmem>>, vector<16x128xf32>
    tpu.vector_store %arg8[%c16_89, %c0_90], %65 {strides = array<i32>} : memref<32x128xf32, #tpu.memory_space<vmem>>, vector<16x128xf32>,
    %c4_i32 = arith.constant 4 : i32
    %67 = arith.cmpi eq, %arg1, %c4_i32 : i32
    %68 = arith.extui %67 : i1 to i32
    %c0_i32_91 = arith.constant 0 : i32
    %69 = arith.cmpi ne, %68, %c0_i32_91 : i32
    scf.if %69 {
      %c0_92 = arith.constant 0 : index
      %c0_93 = arith.constant 0 : index
      %70 = vector.load %arg8[%c0_92, %c0_93] : memref<32x128xf32, #tpu.memory_space<vmem>>, vector<32x128xf32>
      %71 = arith.truncf %70 : vector<32x128xf32> to vector<32x128xbf16>
      %c0_94 = arith.constant 0 : index
      %c0_95 = arith.constant 0 : index
      %72 = vector.load %arg5[%c0_94, %c0_95] : memref<32x128xbf16, #tpu.memory_space<vmem>>, vector<32x128xbf16>
      tpu.vector_store %arg5[%c0_94, %c0_95], %71 {strides = array<i32>} : memref<32x128xbf16, #tpu.memory_space<vmem>>, vector<32x128xbf16>,
      %cst_96 = arith.constant dense<0.000000e+00> : vector<128xf32>
      %73 = vector.multi_reduction <add>, %70, %cst_96 [0] : vector<32x128xf32> to vector<128xf32>
      %74 = vector.shape_cast %73 : vector<128xf32> to vector<1x128xf32>
      %75 = arith.mulf %70, %70 : vector<32x128xf32>
      %cst_97 = arith.constant dense<0.000000e+00> : vector<128xf32>
      %76 = vector.multi_reduction <add>, %75, %cst_97 [0] : vector<32x128xf32> to vector<128xf32>
      %77 = vector.shape_cast %76 : vector<128xf32> to vector<1x128xf32>
      %78 = vector.shape_cast %74 : vector<1x128xf32> to vector<1x1x128xf32>
      %79 = vector.shape_cast %78 : vector<1x1x128xf32> to vector<1x1x128xf32>
      %80 = vector.broadcast %79 : vector<1x1x128xf32> to vector<1x8x128xf32>
      %c0_98 = arith.constant 0 : index
      %c0_99 = arith.constant 0 : index
      %c0_100 = arith.constant 0 : index
      %81 = vector.load %arg6[%c0_98, %c0_99, %c0_100] : memref<1x8x128xf32, #tpu.memory_space<vmem>>, vector<1x8x128xf32>
      tpu.vector_store %arg6[%c0_98, %c0_99, %c0_100], %80 {strides = array<i32>} : memref<1x8x128xf32, #tpu.memory_space<vmem>>, vector<1x8x128xf32>,
      %82 = vector.shape_cast %77 : vector<1x128xf32> to vector<1x1x128xf32>
      %83 = vector.shape_cast %82 : vector<1x1x128xf32> to vector<1x1x128xf32>
      %84 = vector.broadcast %83 : vector<1x1x128xf32> to vector<1x8x128xf32>
      %c0_101 = arith.constant 0 : index
      %c0_102 = arith.constant 0 : index
      %c0_103 = arith.constant 0 : index
      %85 = vector.load %arg7[%c0_101, %c0_102, %c0_103] : memref<1x8x128xf32, #tpu.memory_space<vmem>>, vector<1x8x128xf32>
      tpu.vector_store %arg7[%c0_101, %c0_102, %c0_103], %84 {strides = array<i32>} : memref<1x8x128xf32, #tpu.memory_space<vmem>>, vector<1x8x128xf32>,
    } else {
    }
    return
  }
  func.func @transform_0(%arg0: i32, %arg1: i32) -> (i32, i32, i32, i32) {
    %c0_i32 = arith.constant 0 : i32
    %c0_i32_0 = arith.constant 0 : i32
    %c0_i32_1 = arith.constant 0 : i32
    return %arg1, %arg0, %c0_i32, %c0_i32_0 : i32, i32, i32, i32
  }
  func.func @transform_1(%arg0: i32, %arg1: i32) -> (i32, i32, i32, i32) {
    %c0_i32 = arith.constant 0 : i32
    %c0_i32_0 = arith.constant 0 : i32
    %c0_i32_1 = arith.constant 0 : i32
    return %arg1, %arg0, %c0_i32, %c0_i32_0 : i32, i32, i32, i32
  }
  func.func @transform_2(%arg0: i32, %arg1: i32) -> (i32, i32, i32, i32) {
    %c0_i32 = arith.constant 0 : i32
    %c0_i32_0 = arith.constant 0 : i32
    %c0_i32_1 = arith.constant 0 : i32
    %c0_i32_2 = arith.constant 0 : i32
    return %arg1, %c0_i32, %c0_i32_0, %c0_i32_1 : i32, i32, i32, i32
  }
  func.func @transform_3(%arg0: i32, %arg1: i32) -> (i32, i32) {
    %c0_i32 = arith.constant 0 : i32
    %c0_i32_0 = arith.constant 0 : i32
    return %arg0, %c0_i32 : i32, i32
  }
  func.func @transform_4(%arg0: i32, %arg1: i32) -> (i32, i32, i32) {
    %c0_i32 = arith.constant 0 : i32
    %c0_i32_0 = arith.constant 0 : i32
    %c0_i32_1 = arith.constant 0 : i32
    return %arg0, %c0_i32, %c0_i32_0 : i32, i32, i32
  }
  func.func @transform_5(%arg0: i32, %arg1: i32) -> (i32, i32, i32) {
    %c0_i32 = arith.constant 0 : i32
    %c0_i32_0 = arith.constant 0 : i32
    %c0_i32_1 = arith.constant 0 : i32
    return %arg0, %c0_i32, %c0_i32_0 : i32, i32, i32
  }
}

module attributes {stable_mosaic.version = 11 : i64} {
  func.func @_bn_lrelu_kernel(%arg0: i32, %arg1: memref<16x128xbf16, #tpu.memory_space<vmem>>, %arg2: memref<1x128xf32, #tpu.memory_space<vmem>>, %arg3: memref<1x128xf32, #tpu.memory_space<vmem>>, %arg4: memref<16x128xbf16, #tpu.memory_space<vmem>>) attributes {dimension_semantics = [#tpu.dimension_semantics<parallel>], iteration_bounds = array<i64: 1>, scalar_prefetch = 0 : i64, scratch_operands = 0 : i64, tpu.core_type = #tpu.core_type<tc>, window_params = [{transform_indices = @transform_0, window_bounds = array<i64: 16, 128>}, {pipeline_mode = #tpu.pipeline_mode<synchronous>, transform_indices = @transform_1, window_bounds = array<i64: 1, 128>}, {pipeline_mode = #tpu.pipeline_mode<synchronous>, transform_indices = @transform_2, window_bounds = array<i64: 1, 128>}, {transform_indices = @transform_3, window_bounds = array<i64: 16, 128>}]} {
    %c0 = arith.constant 0 : index
    %c0_0 = arith.constant 0 : index
    %0 = vector.load %arg1[%c0, %c0_0] : memref<16x128xbf16, #tpu.memory_space<vmem>>, vector<16x128xbf16>
    %1 = arith.extf %0 : vector<16x128xbf16> to vector<16x128xf32>
    %c0_1 = arith.constant 0 : index
    %c0_2 = arith.constant 0 : index
    %2 = vector.load %arg2[%c0_1, %c0_2] : memref<1x128xf32, #tpu.memory_space<vmem>>, vector<1x128xf32>
    %3 = vector.broadcast %2 : vector<1x128xf32> to vector<16x128xf32>
    %4 = arith.mulf %1, %3 : vector<16x128xf32>
    %c0_3 = arith.constant 0 : index
    %c0_4 = arith.constant 0 : index
    %5 = vector.load %arg3[%c0_3, %c0_4] : memref<1x128xf32, #tpu.memory_space<vmem>>, vector<1x128xf32>
    %6 = vector.broadcast %5 : vector<1x128xf32> to vector<16x128xf32>
    %7 = arith.addf %4, %6 : vector<16x128xf32>
    %cst = arith.constant 0.000000e+00 : f32
    %8 = vector.broadcast %cst : f32 to vector<16x128xf32>
    %9 = arith.cmpf oge, %7, %8 : vector<16x128xf32>
    %cst_5 = arith.constant 2.000000e-01 : f32
    %10 = vector.broadcast %cst_5 : f32 to vector<16x128xf32>
    %11 = arith.mulf %10, %7 : vector<16x128xf32>
    %12 = arith.select %9, %7, %11 : vector<16x128xi1>, vector<16x128xf32>
    %13 = arith.truncf %12 : vector<16x128xf32> to vector<16x128xbf16>
    %c0_6 = arith.constant 0 : index
    %c0_7 = arith.constant 0 : index
    %14 = vector.load %arg4[%c0_6, %c0_7] : memref<16x128xbf16, #tpu.memory_space<vmem>>, vector<16x128xbf16>
    tpu.vector_store %arg4[%c0_6, %c0_7], %13 {strides = array<i32>} : memref<16x128xbf16, #tpu.memory_space<vmem>>, vector<16x128xbf16>,
    return
  }
  func.func @transform_0(%arg0: i32) -> (i32, i32) {
    %c0_i32 = arith.constant 0 : i32
    %c0_i32_0 = arith.constant 0 : i32
    return %arg0, %c0_i32 : i32, i32
  }
  func.func @transform_1(%arg0: i32) -> (i32, i32) {
    %c0_i32 = arith.constant 0 : i32
    %c0_i32_0 = arith.constant 0 : i32
    %c0_i32_1 = arith.constant 0 : i32
    return %c0_i32, %c0_i32_0 : i32, i32
  }
  func.func @transform_2(%arg0: i32) -> (i32, i32) {
    %c0_i32 = arith.constant 0 : i32
    %c0_i32_0 = arith.constant 0 : i32
    %c0_i32_1 = arith.constant 0 : i32
    return %c0_i32, %c0_i32_0 : i32, i32
  }
  func.func @transform_3(%arg0: i32) -> (i32, i32) {
    %c0_i32 = arith.constant 0 : i32
    %c0_i32_0 = arith.constant 0 : i32
    return %arg0, %c0_i32 : i32, i32
  }
}

module attributes {stable_mosaic.version = 11 : i64} {
  func.func @_tap_gemm_stats_kernel(%arg0: i32, %arg1: i32, %arg2: memref<1x4x8x16xbf16, #tpu.memory_space<vmem>>, %arg3: memref<1x4x8x16xbf16, #tpu.memory_space<vmem>>, %arg4: memref<1x5x16x128xbf16, #tpu.memory_space<vmem>>, %arg5: memref<16x128xbf16, #tpu.memory_space<vmem>>, %arg6: memref<1x8x128xf32, #tpu.memory_space<vmem>>, %arg7: memref<1x8x128xf32, #tpu.memory_space<vmem>>, %arg8: memref<16x128xf32, #tpu.memory_space<vmem>>) attributes {dimension_semantics = [#tpu.dimension_semantics<parallel>, #tpu.dimension_semantics<arbitrary>], iteration_bounds = array<i64: 1, 5>, scalar_prefetch = 0 : i64, scratch_operands = 1 : i64, tpu.core_type = #tpu.core_type<tc>, window_params = [{transform_indices = @transform_0, window_bounds = array<i64: 1, 4, 8, 16>}, {transform_indices = @transform_1, window_bounds = array<i64: 1, 4, 8, 16>}, {transform_indices = @transform_2, window_bounds = array<i64: 1, 5, 16, 128>}, {transform_indices = @transform_3, window_bounds = array<i64: 16, 128>}, {transform_indices = @transform_4, window_bounds = array<i64: 1, 8, 128>}, {transform_indices = @transform_5, window_bounds = array<i64: 1, 8, 128>}]} {
    %c0_i32 = arith.constant 0 : i32
    %0 = arith.cmpi eq, %arg1, %c0_i32 : i32
    %1 = arith.extui %0 : i1 to i32
    %c0_i32_0 = arith.constant 0 : i32
    %2 = arith.cmpi ne, %1, %c0_i32_0 : i32
    scf.if %2 {
      %cst_190 = arith.constant 0.000000e+00 : f32
      %134 = vector.broadcast %cst_190 : f32 to vector<16x128xf32>
      %c0_191 = arith.constant 0 : index
      %c0_192 = arith.constant 0 : index
      %135 = vector.load %arg8[%c0_191, %c0_192] : memref<16x128xf32, #tpu.memory_space<vmem>>, vector<16x128xf32>
      tpu.vector_store %arg8[%c0_191, %c0_192], %134 {strides = array<i32>} : memref<16x128xf32, #tpu.memory_space<vmem>>, vector<16x128xf32>,
    } else {
    }
    %c0 = arith.constant 0 : index
    %c0_1 = arith.constant 0 : index
    %c0_2 = arith.constant 0 : index
    %c0_3 = arith.constant 0 : index
    %3 = vector.load %arg2[%c0, %c0_1, %c0_2, %c0_3] : memref<1x4x8x16xbf16, #tpu.memory_space<vmem>>, vector<1x1x4x16xbf16>
    %4 = vector.shape_cast %3 : vector<1x1x4x16xbf16> to vector<4x16xbf16>
    %c0_4 = arith.constant 0 : index
    %c0_5 = arith.constant 0 : index
    %c0_6 = arith.constant 0 : index
    %c0_7 = arith.constant 0 : index
    %5 = vector.load %arg4[%c0_4, %c0_5, %c0_6, %c0_7] : memref<1x5x16x128xbf16, #tpu.memory_space<vmem>>, vector<1x1x16x128xbf16>
    %6 = vector.shape_cast %5 : vector<1x1x16x128xbf16> to vector<16x128xbf16>
    %cst = arith.constant dense<0.000000e+00> : vector<4x128xf32>
    %7 = tpu.matmul %4, %6, %cst {dimension_numbers = #tpu.dot_dimension_numbers<[1], [0], [0], [1], [0, 0, 1, 1], [], []>} : vector<4x16xbf16>, vector<16x128xbf16>, vector<4x128xf32> -> vector<4x128xf32>
    %c0_8 = arith.constant 0 : index
    %c0_9 = arith.constant 0 : index
    %c0_10 = arith.constant 0 : index
    %c0_11 = arith.constant 0 : index
    %8 = vector.load %arg3[%c0_8, %c0_9, %c0_10, %c0_11] : memref<1x4x8x16xbf16, #tpu.memory_space<vmem>>, vector<1x1x4x16xbf16>
    %9 = vector.shape_cast %8 : vector<1x1x4x16xbf16> to vector<4x16xbf16>
    %c0_12 = arith.constant 0 : index
    %c1 = arith.constant 1 : index
    %c0_13 = arith.constant 0 : index
    %c0_14 = arith.constant 0 : index
    %10 = vector.load %arg4[%c0_12, %c1, %c0_13, %c0_14] : memref<1x5x16x128xbf16, #tpu.memory_space<vmem>>, vector<1x1x16x128xbf16>
    %11 = vector.shape_cast %10 : vector<1x1x16x128xbf16> to vector<16x128xbf16>
    %cst_15 = arith.constant dense<0.000000e+00> : vector<4x128xf32>
    %12 = tpu.matmul %9, %11, %cst_15 {dimension_numbers = #tpu.dot_dimension_numbers<[1], [0], [0], [1], [0, 0, 1, 1], [], []>} : vector<4x16xbf16>, vector<16x128xbf16>, vector<4x128xf32> -> vector<4x128xf32>
    %13 = arith.addf %7, %12 : vector<4x128xf32>
    %c0_16 = arith.constant 0 : index
    %c0_17 = arith.constant 0 : index
    %c2 = arith.constant 2 : index
    %c0_18 = arith.constant 0 : index
    %14 = vector.load %arg2[%c0_16, %c0_17, %c2, %c0_18] : memref<1x4x8x16xbf16, #tpu.memory_space<vmem>>, vector<1x1x4x16xbf16>
    %15 = vector.shape_cast %14 : vector<1x1x4x16xbf16> to vector<4x16xbf16>
    %c0_19 = arith.constant 0 : index
    %c2_20 = arith.constant 2 : index
    %c0_21 = arith.constant 0 : index
    %c0_22 = arith.constant 0 : index
    %16 = vector.load %arg4[%c0_19, %c2_20, %c0_21, %c0_22] : memref<1x5x16x128xbf16, #tpu.memory_space<vmem>>, vector<1x1x16x128xbf16>
    %17 = vector.shape_cast %16 : vector<1x1x16x128xbf16> to vector<16x128xbf16>
    %cst_23 = arith.constant dense<0.000000e+00> : vector<4x128xf32>
    %18 = tpu.matmul %15, %17, %cst_23 {dimension_numbers = #tpu.dot_dimension_numbers<[1], [0], [0], [1], [0, 0, 1, 1], [], []>} : vector<4x16xbf16>, vector<16x128xbf16>, vector<4x128xf32> -> vector<4x128xf32>
    %19 = arith.addf %13, %18 : vector<4x128xf32>
    %c0_24 = arith.constant 0 : index
    %c0_25 = arith.constant 0 : index
    %c2_26 = arith.constant 2 : index
    %c0_27 = arith.constant 0 : index
    %20 = vector.load %arg3[%c0_24, %c0_25, %c2_26, %c0_27] : memref<1x4x8x16xbf16, #tpu.memory_space<vmem>>, vector<1x1x4x16xbf16>
    %21 = vector.shape_cast %20 : vector<1x1x4x16xbf16> to vector<4x16xbf16>
    %c0_28 = arith.constant 0 : index
    %c3 = arith.constant 3 : index
    %c0_29 = arith.constant 0 : index
    %c0_30 = arith.constant 0 : index
    %22 = vector.load %arg4[%c0_28, %c3, %c0_29, %c0_30] : memref<1x5x16x128xbf16, #tpu.memory_space<vmem>>, vector<1x1x16x128xbf16>
    %23 = vector.shape_cast %22 : vector<1x1x16x128xbf16> to vector<16x128xbf16>
    %cst_31 = arith.constant dense<0.000000e+00> : vector<4x128xf32>
    %24 = tpu.matmul %21, %23, %cst_31 {dimension_numbers = #tpu.dot_dimension_numbers<[1], [0], [0], [1], [0, 0, 1, 1], [], []>} : vector<4x16xbf16>, vector<16x128xbf16>, vector<4x128xf32> -> vector<4x128xf32>
    %25 = arith.addf %19, %24 : vector<4x128xf32>
    %c0_32 = arith.constant 0 : index
    %c0_33 = arith.constant 0 : index
    %c4 = arith.constant 4 : index
    %c0_34 = arith.constant 0 : index
    %26 = vector.load %arg2[%c0_32, %c0_33, %c4, %c0_34] : memref<1x4x8x16xbf16, #tpu.memory_space<vmem>>, vector<1x1x4x16xbf16>
    %27 = vector.shape_cast %26 : vector<1x1x4x16xbf16> to vector<4x16xbf16>
    %c0_35 = arith.constant 0 : index
    %c4_36 = arith.constant 4 : index
    %c0_37 = arith.constant 0 : index
    %c0_38 = arith.constant 0 : index
    %28 = vector.load %arg4[%c0_35, %c4_36, %c0_37, %c0_38] : memref<1x5x16x128xbf16, #tpu.memory_space<vmem>>, vector<1x1x16x128xbf16>
    %29 = vector.shape_cast %28 : vector<1x1x16x128xbf16> to vector<16x128xbf16>
    %cst_39 = arith.constant dense<0.000000e+00> : vector<4x128xf32>
    %30 = tpu.matmul %27, %29, %cst_39 {dimension_numbers = #tpu.dot_dimension_numbers<[1], [0], [0], [1], [0, 0, 1, 1], [], []>} : vector<4x16xbf16>, vector<16x128xbf16>, vector<4x128xf32> -> vector<4x128xf32>
    %31 = arith.addf %25, %30 : vector<4x128xf32>
    %c0_40 = arith.constant 0 : index
    %c0_41 = arith.constant 0 : index
    %32 = vector.load %arg8[%c0_40, %c0_41] : memref<16x128xf32, #tpu.memory_space<vmem>>, vector<4x128xf32>
    %33 = arith.addf %32, %31 : vector<4x128xf32>
    %c0_42 = arith.constant 0 : index
    %c0_43 = arith.constant 0 : index
    %34 = vector.load %arg8[%c0_42, %c0_43] : memref<16x128xf32, #tpu.memory_space<vmem>>, vector<4x128xf32>
    tpu.vector_store %arg8[%c0_42, %c0_43], %33 {strides = array<i32>} : memref<16x128xf32, #tpu.memory_space<vmem>>, vector<4x128xf32>,
    %c0_44 = arith.constant 0 : index
    %c1_45 = arith.constant 1 : index
    %c0_46 = arith.constant 0 : index
    %c0_47 = arith.constant 0 : index
    %35 = vector.load %arg2[%c0_44, %c1_45, %c0_46, %c0_47] : memref<1x4x8x16xbf16, #tpu.memory_space<vmem>>, vector<1x1x4x16xbf16>
    %36 = vector.shape_cast %35 : vector<1x1x4x16xbf16> to vector<4x16xbf16>
    %c0_48 = arith.constant 0 : index
    %c0_49 = arith.constant 0 : index
    %c0_50 = arith.constant 0 : index
    %c0_51 = arith.constant 0 : index
    %37 = vector.load %arg4[%c0_48, %c0_49, %c0_50, %c0_51] : memref<1x5x16x128xbf16, #tpu.memory_space<vmem>>, vector<1x1x16x128xbf16>
    %38 = vector.shape_cast %37 : vector<1x1x16x128xbf16> to vector<16x128xbf16>
    %cst_52 = arith.constant dense<0.000000e+00> : vector<4x128xf32>
    %39 = tpu.matmul %36, %38, %cst_52 {dimension_numbers = #tpu.dot_dimension_numbers<[1], [0], [0], [1], [0, 0, 1, 1], [], []>} : vector<4x16xbf16>, vector<16x128xbf16>, vector<4x128xf32> -> vector<4x128xf32>
    %c0_53 = arith.constant 0 : index
    %c1_54 = arith.constant 1 : index
    %c0_55 = arith.constant 0 : index
    %c0_56 = arith.constant 0 : index
    %40 = vector.load %arg3[%c0_53, %c1_54, %c0_55, %c0_56] : memref<1x4x8x16xbf16, #tpu.memory_space<vmem>>, vector<1x1x4x16xbf16>
    %41 = vector.shape_cast %40 : vector<1x1x4x16xbf16> to vector<4x16xbf16>
    %c0_57 = arith.constant 0 : index
    %c1_58 = arith.constant 1 : index
    %c0_59 = arith.constant 0 : index
    %c0_60 = arith.constant 0 : index
    %42 = vector.load %arg4[%c0_57, %c1_58, %c0_59, %c0_60] : memref<1x5x16x128xbf16, #tpu.memory_space<vmem>>, vector<1x1x16x128xbf16>
    %43 = vector.shape_cast %42 : vector<1x1x16x128xbf16> to vector<16x128xbf16>
    %cst_61 = arith.constant dense<0.000000e+00> : vector<4x128xf32>
    %44 = tpu.matmul %41, %43, %cst_61 {dimension_numbers = #tpu.dot_dimension_numbers<[1], [0], [0], [1], [0, 0, 1, 1], [], []>} : vector<4x16xbf16>, vector<16x128xbf16>, vector<4x128xf32> -> vector<4x128xf32>
    %45 = arith.addf %39, %44 : vector<4x128xf32>
    %c0_62 = arith.constant 0 : index
    %c1_63 = arith.constant 1 : index
    %c2_64 = arith.constant 2 : index
    %c0_65 = arith.constant 0 : index
    %46 = vector.load %arg2[%c0_62, %c1_63, %c2_64, %c0_65] : memref<1x4x8x16xbf16, #tpu.memory_space<vmem>>, vector<1x1x4x16xbf16>
    %47 = vector.shape_cast %46 : vector<1x1x4x16xbf16> to vector<4x16xbf16>
    %c0_66 = arith.constant 0 : index
    %c2_67 = arith.constant 2 : index
    %c0_68 = arith.constant 0 : index
    %c0_69 = arith.constant 0 : index
    %48 = vector.load %arg4[%c0_66, %c2_67, %c0_68, %c0_69] : memref<1x5x16x128xbf16, #tpu.memory_space<vmem>>, vector<1x1x16x128xbf16>
    %49 = vector.shape_cast %48 : vector<1x1x16x128xbf16> to vector<16x128xbf16>
    %cst_70 = arith.constant dense<0.000000e+00> : vector<4x128xf32>
    %50 = tpu.matmul %47, %49, %cst_70 {dimension_numbers = #tpu.dot_dimension_numbers<[1], [0], [0], [1], [0, 0, 1, 1], [], []>} : vector<4x16xbf16>, vector<16x128xbf16>, vector<4x128xf32> -> vector<4x128xf32>
    %51 = arith.addf %45, %50 : vector<4x128xf32>
    %c0_71 = arith.constant 0 : index
    %c1_72 = arith.constant 1 : index
    %c2_73 = arith.constant 2 : index
    %c0_74 = arith.constant 0 : index
    %52 = vector.load %arg3[%c0_71, %c1_72, %c2_73, %c0_74] : memref<1x4x8x16xbf16, #tpu.memory_space<vmem>>, vector<1x1x4x16xbf16>
    %53 = vector.shape_cast %52 : vector<1x1x4x16xbf16> to vector<4x16xbf16>
    %c0_75 = arith.constant 0 : index
    %c3_76 = arith.constant 3 : index
    %c0_77 = arith.constant 0 : index
    %c0_78 = arith.constant 0 : index
    %54 = vector.load %arg4[%c0_75, %c3_76, %c0_77, %c0_78] : memref<1x5x16x128xbf16, #tpu.memory_space<vmem>>, vector<1x1x16x128xbf16>
    %55 = vector.shape_cast %54 : vector<1x1x16x128xbf16> to vector<16x128xbf16>
    %cst_79 = arith.constant dense<0.000000e+00> : vector<4x128xf32>
    %56 = tpu.matmul %53, %55, %cst_79 {dimension_numbers = #tpu.dot_dimension_numbers<[1], [0], [0], [1], [0, 0, 1, 1], [], []>} : vector<4x16xbf16>, vector<16x128xbf16>, vector<4x128xf32> -> vector<4x128xf32>
    %57 = arith.addf %51, %56 : vector<4x128xf32>
    %c0_80 = arith.constant 0 : index
    %c1_81 = arith.constant 1 : index
    %c4_82 = arith.constant 4 : index
    %c0_83 = arith.constant 0 : index
    %58 = vector.load %arg2[%c0_80, %c1_81, %c4_82, %c0_83] : memref<1x4x8x16xbf16, #tpu.memory_space<vmem>>, vector<1x1x4x16xbf16>
    %59 = vector.shape_cast %58 : vector<1x1x4x16xbf16> to vector<4x16xbf16>
    %c0_84 = arith.constant 0 : index
    %c4_85 = arith.constant 4 : index
    %c0_86 = arith.constant 0 : index
    %c0_87 = arith.constant 0 : index
    %60 = vector.load %arg4[%c0_84, %c4_85, %c0_86, %c0_87] : memref<1x5x16x128xbf16, #tpu.memory_space<vmem>>, vector<1x1x16x128xbf16>
    %61 = vector.shape_cast %60 : vector<1x1x16x128xbf16> to vector<16x128xbf16>
    %cst_88 = arith.constant dense<0.000000e+00> : vector<4x128xf32>
    %62 = tpu.matmul %59, %61, %cst_88 {dimension_numbers = #tpu.dot_dimension_numbers<[1], [0], [0], [1], [0, 0, 1, 1], [], []>} : vector<4x16xbf16>, vector<16x128xbf16>, vector<4x128xf32> -> vector<4x128xf32>
    %63 = arith.addf %57, %62 : vector<4x128xf32>
    %c4_89 = arith.constant 4 : index
    %c0_90 = arith.constant 0 : index
    %64 = vector.load %arg8[%c4_89, %c0_90] : memref<16x128xf32, #tpu.memory_space<vmem>>, vector<4x128xf32>
    %65 = arith.addf %64, %63 : vector<4x128xf32>
    %c4_91 = arith.constant 4 : index
    %c0_92 = arith.constant 0 : index
    %66 = vector.load %arg8[%c4_91, %c0_92] : memref<16x128xf32, #tpu.memory_space<vmem>>, vector<4x128xf32>
    tpu.vector_store %arg8[%c4_91, %c0_92], %65 {strides = array<i32>} : memref<16x128xf32, #tpu.memory_space<vmem>>, vector<4x128xf32>,
    %c0_93 = arith.constant 0 : index
    %c2_94 = arith.constant 2 : index
    %c0_95 = arith.constant 0 : index
    %c0_96 = arith.constant 0 : index
    %67 = vector.load %arg2[%c0_93, %c2_94, %c0_95, %c0_96] : memref<1x4x8x16xbf16, #tpu.memory_space<vmem>>, vector<1x1x4x16xbf16>
    %68 = vector.shape_cast %67 : vector<1x1x4x16xbf16> to vector<4x16xbf16>
    %c0_97 = arith.constant 0 : index
    %c0_98 = arith.constant 0 : index
    %c0_99 = arith.constant 0 : index
    %c0_100 = arith.constant 0 : index
    %69 = vector.load %arg4[%c0_97, %c0_98, %c0_99, %c0_100] : memref<1x5x16x128xbf16, #tpu.memory_space<vmem>>, vector<1x1x16x128xbf16>
    %70 = vector.shape_cast %69 : vector<1x1x16x128xbf16> to vector<16x128xbf16>
    %cst_101 = arith.constant dense<0.000000e+00> : vector<4x128xf32>
    %71 = tpu.matmul %68, %70, %cst_101 {dimension_numbers = #tpu.dot_dimension_numbers<[1], [0], [0], [1], [0, 0, 1, 1], [], []>} : vector<4x16xbf16>, vector<16x128xbf16>, vector<4x128xf32> -> vector<4x128xf32>
    %c0_102 = arith.constant 0 : index
    %c2_103 = arith.constant 2 : index
    %c0_104 = arith.constant 0 : index
    %c0_105 = arith.constant 0 : index
    %72 = vector.load %arg3[%c0_102, %c2_103, %c0_104, %c0_105] : memref<1x4x8x16xbf16, #tpu.memory_space<vmem>>, vector<1x1x4x16xbf16>
    %73 = vector.shape_cast %72 : vector<1x1x4x16xbf16> to vector<4x16xbf16>
    %c0_106 = arith.constant 0 : index
    %c1_107 = arith.constant 1 : index
    %c0_108 = arith.constant 0 : index
    %c0_109 = arith.constant 0 : index
    %74 = vector.load %arg4[%c0_106, %c1_107, %c0_108, %c0_109] : memref<1x5x16x128xbf16, #tpu.memory_space<vmem>>, vector<1x1x16x128xbf16>
    %75 = vector.shape_cast %74 : vector<1x1x16x128xbf16> to vector<16x128xbf16>
    %cst_110 = arith.constant dense<0.000000e+00> : vector<4x128xf32>
    %76 = tpu.matmul %73, %75, %cst_110 {dimension_numbers = #tpu.dot_dimension_numbers<[1], [0], [0], [1], [0, 0, 1, 1], [], []>} : vector<4x16xbf16>, vector<16x128xbf16>, vector<4x128xf32> -> vector<4x128xf32>
    %77 = arith.addf %71, %76 : vector<4x128xf32>
    %c0_111 = arith.constant 0 : index
    %c2_112 = arith.constant 2 : index
    %c2_113 = arith.constant 2 : index
    %c0_114 = arith.constant 0 : index
    %78 = vector.load %arg2[%c0_111, %c2_112, %c2_113, %c0_114] : memref<1x4x8x16xbf16, #tpu.memory_space<vmem>>, vector<1x1x4x16xbf16>
    %79 = vector.shape_cast %78 : vector<1x1x4x16xbf16> to vector<4x16xbf16>
    %c0_115 = arith.constant 0 : index
    %c2_116 = arith.constant 2 : index
    %c0_117 = arith.constant 0 : index
    %c0_118 = arith.constant 0 : index
    %80 = vector.load %arg4[%c0_115, %c2_116, %c0_117, %c0_118] : memref<1x5x16x128xbf16, #tpu.memory_space<vmem>>, vector<1x1x16x128xbf16>
    %81 = vector.shape_cast %80 : vector<1x1x16x128xbf16> to vector<16x128xbf16>
    %cst_119 = arith.constant dense<0.000000e+00> : vector<4x128xf32>
    %82 = tpu.matmul %79, %81, %cst_119 {dimension_numbers = #tpu.dot_dimension_numbers<[1], [0], [0], [1], [0, 0, 1, 1], [], []>} : vector<4x16xbf16>, vector<16x128xbf16>, vector<4x128xf32> -> vector<4x128xf32>
    %83 = arith.addf %77, %82 : vector<4x128xf32>
    %c0_120 = arith.constant 0 : index
    %c2_121 = arith.constant 2 : index
    %c2_122 = arith.constant 2 : index
    %c0_123 = arith.constant 0 : index
    %84 = vector.load %arg3[%c0_120, %c2_121, %c2_122, %c0_123] : memref<1x4x8x16xbf16, #tpu.memory_space<vmem>>, vector<1x1x4x16xbf16>
    %85 = vector.shape_cast %84 : vector<1x1x4x16xbf16> to vector<4x16xbf16>
    %c0_124 = arith.constant 0 : index
    %c3_125 = arith.constant 3 : index
    %c0_126 = arith.constant 0 : index
    %c0_127 = arith.constant 0 : index
    %86 = vector.load %arg4[%c0_124, %c3_125, %c0_126, %c0_127] : memref<1x5x16x128xbf16, #tpu.memory_space<vmem>>, vector<1x1x16x128xbf16>
    %87 = vector.shape_cast %86 : vector<1x1x16x128xbf16> to vector<16x128xbf16>
    %cst_128 = arith.constant dense<0.000000e+00> : vector<4x128xf32>
    %88 = tpu.matmul %85, %87, %cst_128 {dimension_numbers = #tpu.dot_dimension_numbers<[1], [0], [0], [1], [0, 0, 1, 1], [], []>} : vector<4x16xbf16>, vector<16x128xbf16>, vector<4x128xf32> -> vector<4x128xf32>
    %89 = arith.addf %83, %88 : vector<4x128xf32>
    %c0_129 = arith.constant 0 : index
    %c2_130 = arith.constant 2 : index
    %c4_131 = arith.constant 4 : index
    %c0_132 = arith.constant 0 : index
    %90 = vector.load %arg2[%c0_129, %c2_130, %c4_131, %c0_132] : memref<1x4x8x16xbf16, #tpu.memory_space<vmem>>, vector<1x1x4x16xbf16>
    %91 = vector.shape_cast %90 : vector<1x1x4x16xbf16> to vector<4x16xbf16>
    %c0_133 = arith.constant 0 : index
    %c4_134 = arith.constant 4 : index
    %c0_135 = arith.constant 0 : index
    %c0_136 = arith.constant 0 : index
    %92 = vector.load %arg4[%c0_133, %c4_134, %c0_135, %c0_136] : memref<1x5x16x128xbf16, #tpu.memory_space<vmem>>, vector<1x1x16x128xbf16>
    %93 = vector.shape_cast %92 : vector<1x1x16x128xbf16> to vector<16x128xbf16>
    %cst_137 = arith.constant dense<0.000000e+00> : vector<4x128xf32>
    %94 = tpu.matmul %91, %93, %cst_137 {dimension_numbers = #tpu.dot_dimension_numbers<[1], [0], [0], [1], [0, 0, 1, 1], [], []>} : vector<4x16xbf16>, vector<16x128xbf16>, vector<4x128xf32> -> vector<4x128xf32>
    %95 = arith.addf %89, %94 : vector<4x128xf32>
    %c8 = arith.constant 8 : index
    %c0_138 = arith.constant 0 : index
    %96 = vector.load %arg8[%c8, %c0_138] : memref<16x128xf32, #tpu.memory_space<vmem>>, vector<4x128xf32>
    %97 = arith.addf %96, %95 : vector<4x128xf32>
    %c8_139 = arith.constant 8 : index
    %c0_140 = arith.constant 0 : index
    %98 = vector.load %arg8[%c8_139, %c0_140] : memref<16x128xf32, #tpu.memory_space<vmem>>, vector<4x128xf32>
    tpu.vector_store %arg8[%c8_139, %c0_140], %97 {strides = array<i32>} : memref<16x128xf32, #tpu.memory_space<vmem>>, vector<4x128xf32>,
    %c0_141 = arith.constant 0 : index
    %c3_142 = arith.constant 3 : index
    %c0_143 = arith.constant 0 : index
    %c0_144 = arith.constant 0 : index
    %99 = vector.load %arg2[%c0_141, %c3_142, %c0_143, %c0_144] : memref<1x4x8x16xbf16, #tpu.memory_space<vmem>>, vector<1x1x4x16xbf16>
    %100 = vector.shape_cast %99 : vector<1x1x4x16xbf16> to vector<4x16xbf16>
    %c0_145 = arith.constant 0 : index
    %c0_146 = arith.constant 0 : index
    %c0_147 = arith.constant 0 : index
    %c0_148 = arith.constant 0 : index
    %101 = vector.load %arg4[%c0_145, %c0_146, %c0_147, %c0_148] : memref<1x5x16x128xbf16, #tpu.memory_space<vmem>>, vector<1x1x16x128xbf16>
    %102 = vector.shape_cast %101 : vector<1x1x16x128xbf16> to vector<16x128xbf16>
    %cst_149 = arith.constant dense<0.000000e+00> : vector<4x128xf32>
    %103 = tpu.matmul %100, %102, %cst_149 {dimension_numbers = #tpu.dot_dimension_numbers<[1], [0], [0], [1], [0, 0, 1, 1], [], []>} : vector<4x16xbf16>, vector<16x128xbf16>, vector<4x128xf32> -> vector<4x128xf32>
    %c0_150 = arith.constant 0 : index
    %c3_151 = arith.constant 3 : index
    %c0_152 = arith.constant 0 : index
    %c0_153 = arith.constant 0 : index
    %104 = vector.load %arg3[%c0_150, %c3_151, %c0_152, %c0_153] : memref<1x4x8x16xbf16, #tpu.memory_space<vmem>>, vector<1x1x4x16xbf16>
    %105 = vector.shape_cast %104 : vector<1x1x4x16xbf16> to vector<4x16xbf16>
    %c0_154 = arith.constant 0 : index
    %c1_155 = arith.constant 1 : index
    %c0_156 = arith.constant 0 : index
    %c0_157 = arith.constant 0 : index
    %106 = vector.load %arg4[%c0_154, %c1_155, %c0_156, %c0_157] : memref<1x5x16x128xbf16, #tpu.memory_space<vmem>>, vector<1x1x16x128xbf16>
    %107 = vector.shape_cast %106 : vector<1x1x16x128xbf16> to vector<16x128xbf16>
    %cst_158 = arith.constant dense<0.000000e+00> : vector<4x128xf32>
    %108 = tpu.matmul %105, %107, %cst_158 {dimension_numbers = #tpu.dot_dimension_numbers<[1], [0], [0], [1], [0, 0, 1, 1], [], []>} : vector<4x16xbf16>, vector<16x128xbf16>, vector<4x128xf32> -> vector<4x128xf32>
    %109 = arith.addf %103, %108 : vector<4x128xf32>
    %c0_159 = arith.constant 0 : index
    %c3_160 = arith.constant 3 : index
    %c2_161 = arith.constant 2 : index
    %c0_162 = arith.constant 0 : index
    %110 = vector.load %arg2[%c0_159, %c3_160, %c2_161, %c0_162] : memref<1x4x8x16xbf16, #tpu.memory_space<vmem>>, vector<1x1x4x16xbf16>
    %111 = vector.shape_cast %110 : vector<1x1x4x16xbf16> to vector<4x16xbf16>
    %c0_163 = arith.constant 0 : index
    %c2_164 = arith.constant 2 : index
    %c0_165 = arith.constant 0 : index
    %c0_166 = arith.constant 0 : index
    %112 = vector.load %arg4[%c0_163, %c2_164, %c0_165, %c0_166] : memref<1x5x16x128xbf16, #tpu.memory_space<vmem>>, vector<1x1x16x128xbf16>
    %113 = vector.shape_cast %112 : vector<1x1x16x128xbf16> to vector<16x128xbf16>
    %cst_167 = arith.constant dense<0.000000e+00> : vector<4x128xf32>
    %114 = tpu.matmul %111, %113, %cst_167 {dimension_numbers = #tpu.dot_dimension_numbers<[1], [0], [0], [1], [0, 0, 1, 1], [], []>} : vector<4x16xbf16>, vector<16x128xbf16>, vector<4x128xf32> -> vector<4x128xf32>
    %115 = arith.addf %109, %114 : vector<4x128xf32>
    %c0_168 = arith.constant 0 : index
    %c3_169 = arith.constant 3 : index
    %c2_170 = arith.constant 2 : index
    %c0_171 = arith.constant 0 : index
    %116 = vector.load %arg3[%c0_168, %c3_169, %c2_170, %c0_171] : memref<1x4x8x16xbf16, #tpu.memory_space<vmem>>, vector<1x1x4x16xbf16>
    %117 = vector.shape_cast %116 : vector<1x1x4x16xbf16> to vector<4x16xbf16>
    %c0_172 = arith.constant 0 : index
    %c3_173 = arith.constant 3 : index
    %c0_174 = arith.constant 0 : index
    %c0_175 = arith.constant 0 : index
    %118 = vector.load %arg4[%c0_172, %c3_173, %c0_174, %c0_175] : memref<1x5x16x128xbf16, #tpu.memory_space<vmem>>, vector<1x1x16x128xbf16>
    %119 = vector.shape_cast %118 : vector<1x1x16x128xbf16> to vector<16x128xbf16>
    %cst_176 = arith.constant dense<0.000000e+00> : vector<4x128xf32>
    %120 = tpu.matmul %117, %119, %cst_176 {dimension_numbers = #tpu.dot_dimension_numbers<[1], [0], [0], [1], [0, 0, 1, 1], [], []>} : vector<4x16xbf16>, vector<16x128xbf16>, vector<4x128xf32> -> vector<4x128xf32>
    %121 = arith.addf %115, %120 : vector<4x128xf32>
    %c0_177 = arith.constant 0 : index
    %c3_178 = arith.constant 3 : index
    %c4_179 = arith.constant 4 : index
    %c0_180 = arith.constant 0 : index
    %122 = vector.load %arg2[%c0_177, %c3_178, %c4_179, %c0_180] : memref<1x4x8x16xbf16, #tpu.memory_space<vmem>>, vector<1x1x4x16xbf16>
    %123 = vector.shape_cast %122 : vector<1x1x4x16xbf16> to vector<4x16xbf16>
    %c0_181 = arith.constant 0 : index
    %c4_182 = arith.constant 4 : index
    %c0_183 = arith.constant 0 : index
    %c0_184 = arith.constant 0 : index
    %124 = vector.load %arg4[%c0_181, %c4_182, %c0_183, %c0_184] : memref<1x5x16x128xbf16, #tpu.memory_space<vmem>>, vector<1x1x16x128xbf16>
    %125 = vector.shape_cast %124 : vector<1x1x16x128xbf16> to vector<16x128xbf16>
    %cst_185 = arith.constant dense<0.000000e+00> : vector<4x128xf32>
    %126 = tpu.matmul %123, %125, %cst_185 {dimension_numbers = #tpu.dot_dimension_numbers<[1], [0], [0], [1], [0, 0, 1, 1], [], []>} : vector<4x16xbf16>, vector<16x128xbf16>, vector<4x128xf32> -> vector<4x128xf32>
    %127 = arith.addf %121, %126 : vector<4x128xf32>
    %c12 = arith.constant 12 : index
    %c0_186 = arith.constant 0 : index
    %128 = vector.load %arg8[%c12, %c0_186] : memref<16x128xf32, #tpu.memory_space<vmem>>, vector<4x128xf32>
    %129 = arith.addf %128, %127 : vector<4x128xf32>
    %c12_187 = arith.constant 12 : index
    %c0_188 = arith.constant 0 : index
    %130 = vector.load %arg8[%c12_187, %c0_188] : memref<16x128xf32, #tpu.memory_space<vmem>>, vector<4x128xf32>
    tpu.vector_store %arg8[%c12_187, %c0_188], %129 {strides = array<i32>} : memref<16x128xf32, #tpu.memory_space<vmem>>, vector<4x128xf32>,
    %c4_i32 = arith.constant 4 : i32
    %131 = arith.cmpi eq, %arg1, %c4_i32 : i32
    %132 = arith.extui %131 : i1 to i32
    %c0_i32_189 = arith.constant 0 : i32
    %133 = arith.cmpi ne, %132, %c0_i32_189 : i32
    scf.if %133 {
      %c0_190 = arith.constant 0 : index
      %c0_191 = arith.constant 0 : index
      %134 = vector.load %arg8[%c0_190, %c0_191] : memref<16x128xf32, #tpu.memory_space<vmem>>, vector<16x128xf32>
      %135 = arith.truncf %134 : vector<16x128xf32> to vector<16x128xbf16>
      %c0_192 = arith.constant 0 : index
      %c0_193 = arith.constant 0 : index
      %136 = vector.load %arg5[%c0_192, %c0_193] : memref<16x128xbf16, #tpu.memory_space<vmem>>, vector<16x128xbf16>
      tpu.vector_store %arg5[%c0_192, %c0_193], %135 {strides = array<i32>} : memref<16x128xbf16, #tpu.memory_space<vmem>>, vector<16x128xbf16>,
      %cst_194 = arith.constant dense<0.000000e+00> : vector<128xf32>
      %137 = vector.multi_reduction <add>, %134, %cst_194 [0] : vector<16x128xf32> to vector<128xf32>
      %138 = vector.shape_cast %137 : vector<128xf32> to vector<1x128xf32>
      %139 = arith.mulf %134, %134 : vector<16x128xf32>
      %cst_195 = arith.constant dense<0.000000e+00> : vector<128xf32>
      %140 = vector.multi_reduction <add>, %139, %cst_195 [0] : vector<16x128xf32> to vector<128xf32>
      %141 = vector.shape_cast %140 : vector<128xf32> to vector<1x128xf32>
      %142 = vector.shape_cast %138 : vector<1x128xf32> to vector<1x1x128xf32>
      %143 = vector.shape_cast %142 : vector<1x1x128xf32> to vector<1x1x128xf32>
      %144 = vector.broadcast %143 : vector<1x1x128xf32> to vector<1x8x128xf32>
      %c0_196 = arith.constant 0 : index
      %c0_197 = arith.constant 0 : index
      %c0_198 = arith.constant 0 : index
      %145 = vector.load %arg6[%c0_196, %c0_197, %c0_198] : memref<1x8x128xf32, #tpu.memory_space<vmem>>, vector<1x8x128xf32>
      tpu.vector_store %arg6[%c0_196, %c0_197, %c0_198], %144 {strides = array<i32>} : memref<1x8x128xf32, #tpu.memory_space<vmem>>, vector<1x8x128xf32>,
      %146 = vector.shape_cast %141 : vector<1x128xf32> to vector<1x1x128xf32>
      %147 = vector.shape_cast %146 : vector<1x1x128xf32> to vector<1x1x128xf32>
      %148 = vector.broadcast %147 : vector<1x1x128xf32> to vector<1x8x128xf32>
      %c0_199 = arith.constant 0 : index
      %c0_200 = arith.constant 0 : index
      %c0_201 = arith.constant 0 : index
      %149 = vector.load %arg7[%c0_199, %c0_200, %c0_201] : memref<1x8x128xf32, #tpu.memory_space<vmem>>, vector<1x8x128xf32>
      tpu.vector_store %arg7[%c0_199, %c0_200, %c0_201], %148 {strides = array<i32>} : memref<1x8x128xf32, #tpu.memory_space<vmem>>, vector<1x8x128xf32>,
    } else {
    }
    return
  }
  func.func @transform_0(%arg0: i32, %arg1: i32) -> (i32, i32, i32, i32) {
    %c0_i32 = arith.constant 0 : i32
    %c0_i32_0 = arith.constant 0 : i32
    %c0_i32_1 = arith.constant 0 : i32
    return %arg1, %arg0, %c0_i32, %c0_i32_0 : i32, i32, i32, i32
  }
  func.func @transform_1(%arg0: i32, %arg1: i32) -> (i32, i32, i32, i32) {
    %c0_i32 = arith.constant 0 : i32
    %c0_i32_0 = arith.constant 0 : i32
    %c0_i32_1 = arith.constant 0 : i32
    return %arg1, %arg0, %c0_i32, %c0_i32_0 : i32, i32, i32, i32
  }
  func.func @transform_2(%arg0: i32, %arg1: i32) -> (i32, i32, i32, i32) {
    %c0_i32 = arith.constant 0 : i32
    %c0_i32_0 = arith.constant 0 : i32
    %c0_i32_1 = arith.constant 0 : i32
    %c0_i32_2 = arith.constant 0 : i32
    return %arg1, %c0_i32, %c0_i32_0, %c0_i32_1 : i32, i32, i32, i32
  }
  func.func @transform_3(%arg0: i32, %arg1: i32) -> (i32, i32) {
    %c0_i32 = arith.constant 0 : i32
    %c0_i32_0 = arith.constant 0 : i32
    return %arg0, %c0_i32 : i32, i32
  }
  func.func @transform_4(%arg0: i32, %arg1: i32) -> (i32, i32, i32) {
    %c0_i32 = arith.constant 0 : i32
    %c0_i32_0 = arith.constant 0 : i32
    %c0_i32_1 = arith.constant 0 : i32
    return %arg0, %c0_i32, %c0_i32_0 : i32, i32, i32
  }
  func.func @transform_5(%arg0: i32, %arg1: i32) -> (i32, i32, i32) {
    %c0_i32 = arith.constant 0 : i32
    %c0_i32_0 = arith.constant 0 : i32
    %c0_i32_1 = arith.constant 0 : i32
    return %arg0, %c0_i32, %c0_i32_0 : i32, i32, i32
  }
}

module attributes {stable_mosaic.version = 11 : i64} {
  func.func @_tap_gemm_stats_kernel(%arg0: i32, %arg1: i32, %arg2: memref<1x4x3x32xbf16, #tpu.memory_space<vmem>>, %arg3: memref<1x4x3x32xbf16, #tpu.memory_space<vmem>>, %arg4: memref<1x5x32x128xbf16, #tpu.memory_space<vmem>>, %arg5: memref<4x128xbf16, #tpu.memory_space<vmem>>, %arg6: memref<1x8x128xf32, #tpu.memory_space<vmem>>, %arg7: memref<1x8x128xf32, #tpu.memory_space<vmem>>, %arg8: memref<4x128xf32, #tpu.memory_space<vmem>>) attributes {dimension_semantics = [#tpu.dimension_semantics<parallel>, #tpu.dimension_semantics<arbitrary>], iteration_bounds = array<i64: 1, 5>, scalar_prefetch = 0 : i64, scratch_operands = 1 : i64, tpu.core_type = #tpu.core_type<tc>, window_params = [{transform_indices = @transform_0, window_bounds = array<i64: 1, 4, 3, 32>}, {transform_indices = @transform_1, window_bounds = array<i64: 1, 4, 3, 32>}, {transform_indices = @transform_2, window_bounds = array<i64: 1, 5, 32, 128>}, {transform_indices = @transform_3, window_bounds = array<i64: 4, 128>}, {transform_indices = @transform_4, window_bounds = array<i64: 1, 8, 128>}, {transform_indices = @transform_5, window_bounds = array<i64: 1, 8, 128>}]} {
    %c0_i32 = arith.constant 0 : i32
    %0 = arith.cmpi eq, %arg1, %c0_i32 : i32
    %1 = arith.extui %0 : i1 to i32
    %c0_i32_0 = arith.constant 0 : i32
    %2 = arith.cmpi ne, %1, %c0_i32_0 : i32
    scf.if %2 {
      %cst_192 = arith.constant 0.000000e+00 : f32
      %134 = vector.broadcast %cst_192 : f32 to vector<4x128xf32>
      %c0_193 = arith.constant 0 : index
      %c0_194 = arith.constant 0 : index
      %135 = vector.load %arg8[%c0_193, %c0_194] : memref<4x128xf32, #tpu.memory_space<vmem>>, vector<4x128xf32>
      tpu.vector_store %arg8[%c0_193, %c0_194], %134 {strides = array<i32>} : memref<4x128xf32, #tpu.memory_space<vmem>>, vector<4x128xf32>,
    } else {
    }
    %c0 = arith.constant 0 : index
    %c0_1 = arith.constant 0 : index
    %c0_2 = arith.constant 0 : index
    %c0_3 = arith.constant 0 : index
    %3 = vector.load %arg2[%c0, %c0_1, %c0_2, %c0_3] : memref<1x4x3x32xbf16, #tpu.memory_space<vmem>>, vector<1x1x1x32xbf16>
    %4 = vector.shape_cast %3 : vector<1x1x1x32xbf16> to vector<1x32xbf16>
    %c0_4 = arith.constant 0 : index
    %c0_5 = arith.constant 0 : index
    %c0_6 = arith.constant 0 : index
    %c0_7 = arith.constant 0 : index
    %5 = vector.load %arg4[%c0_4, %c0_5, %c0_6, %c0_7] : memref<1x5x32x128xbf16, #tpu.memory_space<vmem>>, vector<1x1x32x128xbf16>
    %6 = vector.shape_cast %5 : vector<1x1x32x128xbf16> to vector<32x128xbf16>
    %cst = arith.constant dense<0.000000e+00> : vector<1x128xf32>
    %7 = tpu.matmul %4, %6, %cst {dimension_numbers = #tpu.dot_dimension_numbers<[1], [0], [0], [1], [0, 0, 1, 1], [], []>} : vector<1x32xbf16>, vector<32x128xbf16>, vector<1x128xf32> -> vector<1x128xf32>
    %c0_8 = arith.constant 0 : index
    %c0_9 = arith.constant 0 : index
    %c0_10 = arith.constant 0 : index
    %c0_11 = arith.constant 0 : index
    %8 = vector.load %arg3[%c0_8, %c0_9, %c0_10, %c0_11] : memref<1x4x3x32xbf16, #tpu.memory_space<vmem>>, vector<1x1x1x32xbf16>
    %9 = vector.shape_cast %8 : vector<1x1x1x32xbf16> to vector<1x32xbf16>
    %c0_12 = arith.constant 0 : index
    %c1 = arith.constant 1 : index
    %c0_13 = arith.constant 0 : index
    %c0_14 = arith.constant 0 : index
    %10 = vector.load %arg4[%c0_12, %c1, %c0_13, %c0_14] : memref<1x5x32x128xbf16, #tpu.memory_space<vmem>>, vector<1x1x32x128xbf16>
    %11 = vector.shape_cast %10 : vector<1x1x32x128xbf16> to vector<32x128xbf16>
    %cst_15 = arith.constant dense<0.000000e+00> : vector<1x128xf32>
    %12 = tpu.matmul %9, %11, %cst_15 {dimension_numbers = #tpu.dot_dimension_numbers<[1], [0], [0], [1], [0, 0, 1, 1], [], []>} : vector<1x32xbf16>, vector<32x128xbf16>, vector<1x128xf32> -> vector<1x128xf32>
    %13 = arith.addf %7, %12 : vector<1x128xf32>
    %c0_16 = arith.constant 0 : index
    %c0_17 = arith.constant 0 : index
    %c1_18 = arith.constant 1 : index
    %c0_19 = arith.constant 0 : index
    %14 = vector.load %arg2[%c0_16, %c0_17, %c1_18, %c0_19] : memref<1x4x3x32xbf16, #tpu.memory_space<vmem>>, vector<1x1x1x32xbf16>
    %15 = vector.shape_cast %14 : vector<1x1x1x32xbf16> to vector<1x32xbf16>
    %c0_20 = arith.constant 0 : index
    %c2 = arith.constant 2 : index
    %c0_21 = arith.constant 0 : index
    %c0_22 = arith.constant 0 : index
    %16 = vector.load %arg4[%c0_20, %c2, %c0_21, %c0_22] : memref<1x5x32x128xbf16, #tpu.memory_space<vmem>>, vector<1x1x32x128xbf16>
    %17 = vector.shape_cast %16 : vector<1x1x32x128xbf16> to vector<32x128xbf16>
    %cst_23 = arith.constant dense<0.000000e+00> : vector<1x128xf32>
    %18 = tpu.matmul %15, %17, %cst_23 {dimension_numbers = #tpu.dot_dimension_numbers<[1], [0], [0], [1], [0, 0, 1, 1], [], []>} : vector<1x32xbf16>, vector<32x128xbf16>, vector<1x128xf32> -> vector<1x128xf32>
    %19 = arith.addf %13, %18 : vector<1x128xf32>
    %c0_24 = arith.constant 0 : index
    %c0_25 = arith.constant 0 : index
    %c1_26 = arith.constant 1 : index
    %c0_27 = arith.constant 0 : index
    %20 = vector.load %arg3[%c0_24, %c0_25, %c1_26, %c0_27] : memref<1x4x3x32xbf16, #tpu.memory_space<vmem>>, vector<1x1x1x32xbf16>
    %21 = vector.shape_cast %20 : vector<1x1x1x32xbf16> to vector<1x32xbf16>
    %c0_28 = arith.constant 0 : index
    %c3 = arith.constant 3 : index
    %c0_29 = arith.constant 0 : index
    %c0_30 = arith.constant 0 : index
    %22 = vector.load %arg4[%c0_28, %c3, %c0_29, %c0_30] : memref<1x5x32x128xbf16, #tpu.memory_space<vmem>>, vector<1x1x32x128xbf16>
    %23 = vector.shape_cast %22 : vector<1x1x32x128xbf16> to vector<32x128xbf16>
    %cst_31 = arith.constant dense<0.000000e+00> : vector<1x128xf32>
    %24 = tpu.matmul %21, %23, %cst_31 {dimension_numbers = #tpu.dot_dimension_numbers<[1], [0], [0], [1], [0, 0, 1, 1], [], []>} : vector<1x32xbf16>, vector<32x128xbf16>, vector<1x128xf32> -> vector<1x128xf32>
    %25 = arith.addf %19, %24 : vector<1x128xf32>
    %c0_32 = arith.constant 0 : index
    %c0_33 = arith.constant 0 : index
    %c2_34 = arith.constant 2 : index
    %c0_35 = arith.constant 0 : index
    %26 = vector.load %arg2[%c0_32, %c0_33, %c2_34, %c0_35] : memref<1x4x3x32xbf16, #tpu.memory_space<vmem>>, vector<1x1x1x32xbf16>
    %27 = vector.shape_cast %26 : vector<1x1x1x32xbf16> to vector<1x32xbf16>
    %c0_36 = arith.constant 0 : index
    %c4 = arith.constant 4 : index
    %c0_37 = arith.constant 0 : index
    %c0_38 = arith.constant 0 : index
    %28 = vector.load %arg4[%c0_36, %c4, %c0_37, %c0_38] : memref<1x5x32x128xbf16, #tpu.memory_space<vmem>>, vector<1x1x32x128xbf16>
    %29 = vector.shape_cast %28 : vector<1x1x32x128xbf16> to vector<32x128xbf16>
    %cst_39 = arith.constant dense<0.000000e+00> : vector<1x128xf32>
    %30 = tpu.matmul %27, %29, %cst_39 {dimension_numbers = #tpu.dot_dimension_numbers<[1], [0], [0], [1], [0, 0, 1, 1], [], []>} : vector<1x32xbf16>, vector<32x128xbf16>, vector<1x128xf32> -> vector<1x128xf32>
    %31 = arith.addf %25, %30 : vector<1x128xf32>
    %c0_40 = arith.constant 0 : index
    %c0_41 = arith.constant 0 : index
    %32 = vector.load %arg8[%c0_40, %c0_41] : memref<4x128xf32, #tpu.memory_space<vmem>>, vector<1x128xf32>
    %33 = arith.addf %32, %31 : vector<1x128xf32>
    %c0_42 = arith.constant 0 : index
    %c0_43 = arith.constant 0 : index
    %34 = vector.load %arg8[%c0_42, %c0_43] : memref<4x128xf32, #tpu.memory_space<vmem>>, vector<1x128xf32>
    tpu.vector_store %arg8[%c0_42, %c0_43], %33 {strides = array<i32>} : memref<4x128xf32, #tpu.memory_space<vmem>>, vector<1x128xf32>,
    %c0_44 = arith.constant 0 : index
    %c1_45 = arith.constant 1 : index
    %c0_46 = arith.constant 0 : index
    %c0_47 = arith.constant 0 : index
    %35 = vector.load %arg2[%c0_44, %c1_45, %c0_46, %c0_47] : memref<1x4x3x32xbf16, #tpu.memory_space<vmem>>, vector<1x1x1x32xbf16>
    %36 = vector.shape_cast %35 : vector<1x1x1x32xbf16> to vector<1x32xbf16>
    %c0_48 = arith.constant 0 : index
    %c0_49 = arith.constant 0 : index
    %c0_50 = arith.constant 0 : index
    %c0_51 = arith.constant 0 : index
    %37 = vector.load %arg4[%c0_48, %c0_49, %c0_50, %c0_51] : memref<1x5x32x128xbf16, #tpu.memory_space<vmem>>, vector<1x1x32x128xbf16>
    %38 = vector.shape_cast %37 : vector<1x1x32x128xbf16> to vector<32x128xbf16>
    %cst_52 = arith.constant dense<0.000000e+00> : vector<1x128xf32>
    %39 = tpu.matmul %36, %38, %cst_52 {dimension_numbers = #tpu.dot_dimension_numbers<[1], [0], [0], [1], [0, 0, 1, 1], [], []>} : vector<1x32xbf16>, vector<32x128xbf16>, vector<1x128xf32> -> vector<1x128xf32>
    %c0_53 = arith.constant 0 : index
    %c1_54 = arith.constant 1 : index
    %c0_55 = arith.constant 0 : index
    %c0_56 = arith.constant 0 : index
    %40 = vector.load %arg3[%c0_53, %c1_54, %c0_55, %c0_56] : memref<1x4x3x32xbf16, #tpu.memory_space<vmem>>, vector<1x1x1x32xbf16>
    %41 = vector.shape_cast %40 : vector<1x1x1x32xbf16> to vector<1x32xbf16>
    %c0_57 = arith.constant 0 : index
    %c1_58 = arith.constant 1 : index
    %c0_59 = arith.constant 0 : index
    %c0_60 = arith.constant 0 : index
    %42 = vector.load %arg4[%c0_57, %c1_58, %c0_59, %c0_60] : memref<1x5x32x128xbf16, #tpu.memory_space<vmem>>, vector<1x1x32x128xbf16>
    %43 = vector.shape_cast %42 : vector<1x1x32x128xbf16> to vector<32x128xbf16>
    %cst_61 = arith.constant dense<0.000000e+00> : vector<1x128xf32>
    %44 = tpu.matmul %41, %43, %cst_61 {dimension_numbers = #tpu.dot_dimension_numbers<[1], [0], [0], [1], [0, 0, 1, 1], [], []>} : vector<1x32xbf16>, vector<32x128xbf16>, vector<1x128xf32> -> vector<1x128xf32>
    %45 = arith.addf %39, %44 : vector<1x128xf32>
    %c0_62 = arith.constant 0 : index
    %c1_63 = arith.constant 1 : index
    %c1_64 = arith.constant 1 : index
    %c0_65 = arith.constant 0 : index
    %46 = vector.load %arg2[%c0_62, %c1_63, %c1_64, %c0_65] : memref<1x4x3x32xbf16, #tpu.memory_space<vmem>>, vector<1x1x1x32xbf16>
    %47 = vector.shape_cast %46 : vector<1x1x1x32xbf16> to vector<1x32xbf16>
    %c0_66 = arith.constant 0 : index
    %c2_67 = arith.constant 2 : index
    %c0_68 = arith.constant 0 : index
    %c0_69 = arith.constant 0 : index
    %48 = vector.load %arg4[%c0_66, %c2_67, %c0_68, %c0_69] : memref<1x5x32x128xbf16, #tpu.memory_space<vmem>>, vector<1x1x32x128xbf16>
    %49 = vector.shape_cast %48 : vector<1x1x32x128xbf16> to vector<32x128xbf16>
    %cst_70 = arith.constant dense<0.000000e+00> : vector<1x128xf32>
    %50 = tpu.matmul %47, %49, %cst_70 {dimension_numbers = #tpu.dot_dimension_numbers<[1], [0], [0], [1], [0, 0, 1, 1], [], []>} : vector<1x32xbf16>, vector<32x128xbf16>, vector<1x128xf32> -> vector<1x128xf32>
    %51 = arith.addf %45, %50 : vector<1x128xf32>
    %c0_71 = arith.constant 0 : index
    %c1_72 = arith.constant 1 : index
    %c1_73 = arith.constant 1 : index
    %c0_74 = arith.constant 0 : index
    %52 = vector.load %arg3[%c0_71, %c1_72, %c1_73, %c0_74] : memref<1x4x3x32xbf16, #tpu.memory_space<vmem>>, vector<1x1x1x32xbf16>
    %53 = vector.shape_cast %52 : vector<1x1x1x32xbf16> to vector<1x32xbf16>
    %c0_75 = arith.constant 0 : index
    %c3_76 = arith.constant 3 : index
    %c0_77 = arith.constant 0 : index
    %c0_78 = arith.constant 0 : index
    %54 = vector.load %arg4[%c0_75, %c3_76, %c0_77, %c0_78] : memref<1x5x32x128xbf16, #tpu.memory_space<vmem>>, vector<1x1x32x128xbf16>
    %55 = vector.shape_cast %54 : vector<1x1x32x128xbf16> to vector<32x128xbf16>
    %cst_79 = arith.constant dense<0.000000e+00> : vector<1x128xf32>
    %56 = tpu.matmul %53, %55, %cst_79 {dimension_numbers = #tpu.dot_dimension_numbers<[1], [0], [0], [1], [0, 0, 1, 1], [], []>} : vector<1x32xbf16>, vector<32x128xbf16>, vector<1x128xf32> -> vector<1x128xf32>
    %57 = arith.addf %51, %56 : vector<1x128xf32>
    %c0_80 = arith.constant 0 : index
    %c1_81 = arith.constant 1 : index
    %c2_82 = arith.constant 2 : index
    %c0_83 = arith.constant 0 : index
    %58 = vector.load %arg2[%c0_80, %c1_81, %c2_82, %c0_83] : memref<1x4x3x32xbf16, #tpu.memory_space<vmem>>, vector<1x1x1x32xbf16>
    %59 = vector.shape_cast %58 : vector<1x1x1x32xbf16> to vector<1x32xbf16>
    %c0_84 = arith.constant 0 : index
    %c4_85 = arith.constant 4 : index
    %c0_86 = arith.constant 0 : index
    %c0_87 = arith.constant 0 : index
    %60 = vector.load %arg4[%c0_84, %c4_85, %c0_86, %c0_87] : memref<1x5x32x128xbf16, #tpu.memory_space<vmem>>, vector<1x1x32x128xbf16>
    %61 = vector.shape_cast %60 : vector<1x1x32x128xbf16> to vector<32x128xbf16>
    %cst_88 = arith.constant dense<0.000000e+00> : vector<1x128xf32>
    %62 = tpu.matmul %59, %61, %cst_88 {dimension_numbers = #tpu.dot_dimension_numbers<[1], [0], [0], [1], [0, 0, 1, 1], [], []>} : vector<1x32xbf16>, vector<32x128xbf16>, vector<1x128xf32> -> vector<1x128xf32>
    %63 = arith.addf %57, %62 : vector<1x128xf32>
    %c1_89 = arith.constant 1 : index
    %c0_90 = arith.constant 0 : index
    %64 = vector.load %arg8[%c1_89, %c0_90] : memref<4x128xf32, #tpu.memory_space<vmem>>, vector<1x128xf32>
    %65 = arith.addf %64, %63 : vector<1x128xf32>
    %c1_91 = arith.constant 1 : index
    %c0_92 = arith.constant 0 : index
    %66 = vector.load %arg8[%c1_91, %c0_92] : memref<4x128xf32, #tpu.memory_space<vmem>>, vector<1x128xf32>
    tpu.vector_store %arg8[%c1_91, %c0_92], %65 {strides = array<i32>} : memref<4x128xf32, #tpu.memory_space<vmem>>, vector<1x128xf32>,
    %c0_93 = arith.constant 0 : index
    %c2_94 = arith.constant 2 : index
    %c0_95 = arith.constant 0 : index
    %c0_96 = arith.constant 0 : index
    %67 = vector.load %arg2[%c0_93, %c2_94, %c0_95, %c0_96] : memref<1x4x3x32xbf16, #tpu.memory_space<vmem>>, vector<1x1x1x32xbf16>
    %68 = vector.shape_cast %67 : vector<1x1x1x32xbf16> to vector<1x32xbf16>
    %c0_97 = arith.constant 0 : index
    %c0_98 = arith.constant 0 : index
    %c0_99 = arith.constant 0 : index
    %c0_100 = arith.constant 0 : index
    %69 = vector.load %arg4[%c0_97, %c0_98, %c0_99, %c0_100] : memref<1x5x32x128xbf16, #tpu.memory_space<vmem>>, vector<1x1x32x128xbf16>
    %70 = vector.shape_cast %69 : vector<1x1x32x128xbf16> to vector<32x128xbf16>
    %cst_101 = arith.constant dense<0.000000e+00> : vector<1x128xf32>
    %71 = tpu.matmul %68, %70, %cst_101 {dimension_numbers = #tpu.dot_dimension_numbers<[1], [0], [0], [1], [0, 0, 1, 1], [], []>} : vector<1x32xbf16>, vector<32x128xbf16>, vector<1x128xf32> -> vector<1x128xf32>
    %c0_102 = arith.constant 0 : index
    %c2_103 = arith.constant 2 : index
    %c0_104 = arith.constant 0 : index
    %c0_105 = arith.constant 0 : index
    %72 = vector.load %arg3[%c0_102, %c2_103, %c0_104, %c0_105] : memref<1x4x3x32xbf16, #tpu.memory_space<vmem>>, vector<1x1x1x32xbf16>
    %73 = vector.shape_cast %72 : vector<1x1x1x32xbf16> to vector<1x32xbf16>
    %c0_106 = arith.constant 0 : index
    %c1_107 = arith.constant 1 : index
    %c0_108 = arith.constant 0 : index
    %c0_109 = arith.constant 0 : index
    %74 = vector.load %arg4[%c0_106, %c1_107, %c0_108, %c0_109] : memref<1x5x32x128xbf16, #tpu.memory_space<vmem>>, vector<1x1x32x128xbf16>
    %75 = vector.shape_cast %74 : vector<1x1x32x128xbf16> to vector<32x128xbf16>
    %cst_110 = arith.constant dense<0.000000e+00> : vector<1x128xf32>
    %76 = tpu.matmul %73, %75, %cst_110 {dimension_numbers = #tpu.dot_dimension_numbers<[1], [0], [0], [1], [0, 0, 1, 1], [], []>} : vector<1x32xbf16>, vector<32x128xbf16>, vector<1x128xf32> -> vector<1x128xf32>
    %77 = arith.addf %71, %76 : vector<1x128xf32>
    %c0_111 = arith.constant 0 : index
    %c2_112 = arith.constant 2 : index
    %c1_113 = arith.constant 1 : index
    %c0_114 = arith.constant 0 : index
    %78 = vector.load %arg2[%c0_111, %c2_112, %c1_113, %c0_114] : memref<1x4x3x32xbf16, #tpu.memory_space<vmem>>, vector<1x1x1x32xbf16>
    %79 = vector.shape_cast %78 : vector<1x1x1x32xbf16> to vector<1x32xbf16>
    %c0_115 = arith.constant 0 : index
    %c2_116 = arith.constant 2 : index
    %c0_117 = arith.constant 0 : index
    %c0_118 = arith.constant 0 : index
    %80 = vector.load %arg4[%c0_115, %c2_116, %c0_117, %c0_118] : memref<1x5x32x128xbf16, #tpu.memory_space<vmem>>, vector<1x1x32x128xbf16>
    %81 = vector.shape_cast %80 : vector<1x1x32x128xbf16> to vector<32x128xbf16>
    %cst_119 = arith.constant dense<0.000000e+00> : vector<1x128xf32>
    %82 = tpu.matmul %79, %81, %cst_119 {dimension_numbers = #tpu.dot_dimension_numbers<[1], [0], [0], [1], [0, 0, 1, 1], [], []>} : vector<1x32xbf16>, vector<32x128xbf16>, vector<1x128xf32> -> vector<1x128xf32>
    %83 = arith.addf %77, %82 : vector<1x128xf32>
    %c0_120 = arith.constant 0 : index
    %c2_121 = arith.constant 2 : index
    %c1_122 = arith.constant 1 : index
    %c0_123 = arith.constant 0 : index
    %84 = vector.load %arg3[%c0_120, %c2_121, %c1_122, %c0_123] : memref<1x4x3x32xbf16, #tpu.memory_space<vmem>>, vector<1x1x1x32xbf16>
    %85 = vector.shape_cast %84 : vector<1x1x1x32xbf16> to vector<1x32xbf16>
    %c0_124 = arith.constant 0 : index
    %c3_125 = arith.constant 3 : index
    %c0_126 = arith.constant 0 : index
    %c0_127 = arith.constant 0 : index
    %86 = vector.load %arg4[%c0_124, %c3_125, %c0_126, %c0_127] : memref<1x5x32x128xbf16, #tpu.memory_space<vmem>>, vector<1x1x32x128xbf16>
    %87 = vector.shape_cast %86 : vector<1x1x32x128xbf16> to vector<32x128xbf16>
    %cst_128 = arith.constant dense<0.000000e+00> : vector<1x128xf32>
    %88 = tpu.matmul %85, %87, %cst_128 {dimension_numbers = #tpu.dot_dimension_numbers<[1], [0], [0], [1], [0, 0, 1, 1], [], []>} : vector<1x32xbf16>, vector<32x128xbf16>, vector<1x128xf32> -> vector<1x128xf32>
    %89 = arith.addf %83, %88 : vector<1x128xf32>
    %c0_129 = arith.constant 0 : index
    %c2_130 = arith.constant 2 : index
    %c2_131 = arith.constant 2 : index
    %c0_132 = arith.constant 0 : index
    %90 = vector.load %arg2[%c0_129, %c2_130, %c2_131, %c0_132] : memref<1x4x3x32xbf16, #tpu.memory_space<vmem>>, vector<1x1x1x32xbf16>
    %91 = vector.shape_cast %90 : vector<1x1x1x32xbf16> to vector<1x32xbf16>
    %c0_133 = arith.constant 0 : index
    %c4_134 = arith.constant 4 : index
    %c0_135 = arith.constant 0 : index
    %c0_136 = arith.constant 0 : index
    %92 = vector.load %arg4[%c0_133, %c4_134, %c0_135, %c0_136] : memref<1x5x32x128xbf16, #tpu.memory_space<vmem>>, vector<1x1x32x128xbf16>
    %93 = vector.shape_cast %92 : vector<1x1x32x128xbf16> to vector<32x128xbf16>
    %cst_137 = arith.constant dense<0.000000e+00> : vector<1x128xf32>
    %94 = tpu.matmul %91, %93, %cst_137 {dimension_numbers = #tpu.dot_dimension_numbers<[1], [0], [0], [1], [0, 0, 1, 1], [], []>} : vector<1x32xbf16>, vector<32x128xbf16>, vector<1x128xf32> -> vector<1x128xf32>
    %95 = arith.addf %89, %94 : vector<1x128xf32>
    %c2_138 = arith.constant 2 : index
    %c0_139 = arith.constant 0 : index
    %96 = vector.load %arg8[%c2_138, %c0_139] : memref<4x128xf32, #tpu.memory_space<vmem>>, vector<1x128xf32>
    %97 = arith.addf %96, %95 : vector<1x128xf32>
    %c2_140 = arith.constant 2 : index
    %c0_141 = arith.constant 0 : index
    %98 = vector.load %arg8[%c2_140, %c0_141] : memref<4x128xf32, #tpu.memory_space<vmem>>, vector<1x128xf32>
    tpu.vector_store %arg8[%c2_140, %c0_141], %97 {strides = array<i32>} : memref<4x128xf32, #tpu.memory_space<vmem>>, vector<1x128xf32>,
    %c0_142 = arith.constant 0 : index
    %c3_143 = arith.constant 3 : index
    %c0_144 = arith.constant 0 : index
    %c0_145 = arith.constant 0 : index
    %99 = vector.load %arg2[%c0_142, %c3_143, %c0_144, %c0_145] : memref<1x4x3x32xbf16, #tpu.memory_space<vmem>>, vector<1x1x1x32xbf16>
    %100 = vector.shape_cast %99 : vector<1x1x1x32xbf16> to vector<1x32xbf16>
    %c0_146 = arith.constant 0 : index
    %c0_147 = arith.constant 0 : index
    %c0_148 = arith.constant 0 : index
    %c0_149 = arith.constant 0 : index
    %101 = vector.load %arg4[%c0_146, %c0_147, %c0_148, %c0_149] : memref<1x5x32x128xbf16, #tpu.memory_space<vmem>>, vector<1x1x32x128xbf16>
    %102 = vector.shape_cast %101 : vector<1x1x32x128xbf16> to vector<32x128xbf16>
    %cst_150 = arith.constant dense<0.000000e+00> : vector<1x128xf32>
    %103 = tpu.matmul %100, %102, %cst_150 {dimension_numbers = #tpu.dot_dimension_numbers<[1], [0], [0], [1], [0, 0, 1, 1], [], []>} : vector<1x32xbf16>, vector<32x128xbf16>, vector<1x128xf32> -> vector<1x128xf32>
    %c0_151 = arith.constant 0 : index
    %c3_152 = arith.constant 3 : index
    %c0_153 = arith.constant 0 : index
    %c0_154 = arith.constant 0 : index
    %104 = vector.load %arg3[%c0_151, %c3_152, %c0_153, %c0_154] : memref<1x4x3x32xbf16, #tpu.memory_space<vmem>>, vector<1x1x1x32xbf16>
    %105 = vector.shape_cast %104 : vector<1x1x1x32xbf16> to vector<1x32xbf16>
    %c0_155 = arith.constant 0 : index
    %c1_156 = arith.constant 1 : index
    %c0_157 = arith.constant 0 : index
    %c0_158 = arith.constant 0 : index
    %106 = vector.load %arg4[%c0_155, %c1_156, %c0_157, %c0_158] : memref<1x5x32x128xbf16, #tpu.memory_space<vmem>>, vector<1x1x32x128xbf16>
    %107 = vector.shape_cast %106 : vector<1x1x32x128xbf16> to vector<32x128xbf16>
    %cst_159 = arith.constant dense<0.000000e+00> : vector<1x128xf32>
    %108 = tpu.matmul %105, %107, %cst_159 {dimension_numbers = #tpu.dot_dimension_numbers<[1], [0], [0], [1], [0, 0, 1, 1], [], []>} : vector<1x32xbf16>, vector<32x128xbf16>, vector<1x128xf32> -> vector<1x128xf32>
    %109 = arith.addf %103, %108 : vector<1x128xf32>
    %c0_160 = arith.constant 0 : index
    %c3_161 = arith.constant 3 : index
    %c1_162 = arith.constant 1 : index
    %c0_163 = arith.constant 0 : index
    %110 = vector.load %arg2[%c0_160, %c3_161, %c1_162, %c0_163] : memref<1x4x3x32xbf16, #tpu.memory_space<vmem>>, vector<1x1x1x32xbf16>
    %111 = vector.shape_cast %110 : vector<1x1x1x32xbf16> to vector<1x32xbf16>
    %c0_164 = arith.constant 0 : index
    %c2_165 = arith.constant 2 : index
    %c0_166 = arith.constant 0 : index
    %c0_167 = arith.constant 0 : index
    %112 = vector.load %arg4[%c0_164, %c2_165, %c0_166, %c0_167] : memref<1x5x32x128xbf16, #tpu.memory_space<vmem>>, vector<1x1x32x128xbf16>
    %113 = vector.shape_cast %112 : vector<1x1x32x128xbf16> to vector<32x128xbf16>
    %cst_168 = arith.constant dense<0.000000e+00> : vector<1x128xf32>
    %114 = tpu.matmul %111, %113, %cst_168 {dimension_numbers = #tpu.dot_dimension_numbers<[1], [0], [0], [1], [0, 0, 1, 1], [], []>} : vector<1x32xbf16>, vector<32x128xbf16>, vector<1x128xf32> -> vector<1x128xf32>
    %115 = arith.addf %109, %114 : vector<1x128xf32>
    %c0_169 = arith.constant 0 : index
    %c3_170 = arith.constant 3 : index
    %c1_171 = arith.constant 1 : index
    %c0_172 = arith.constant 0 : index
    %116 = vector.load %arg3[%c0_169, %c3_170, %c1_171, %c0_172] : memref<1x4x3x32xbf16, #tpu.memory_space<vmem>>, vector<1x1x1x32xbf16>
    %117 = vector.shape_cast %116 : vector<1x1x1x32xbf16> to vector<1x32xbf16>
    %c0_173 = arith.constant 0 : index
    %c3_174 = arith.constant 3 : index
    %c0_175 = arith.constant 0 : index
    %c0_176 = arith.constant 0 : index
    %118 = vector.load %arg4[%c0_173, %c3_174, %c0_175, %c0_176] : memref<1x5x32x128xbf16, #tpu.memory_space<vmem>>, vector<1x1x32x128xbf16>
    %119 = vector.shape_cast %118 : vector<1x1x32x128xbf16> to vector<32x128xbf16>
    %cst_177 = arith.constant dense<0.000000e+00> : vector<1x128xf32>
    %120 = tpu.matmul %117, %119, %cst_177 {dimension_numbers = #tpu.dot_dimension_numbers<[1], [0], [0], [1], [0, 0, 1, 1], [], []>} : vector<1x32xbf16>, vector<32x128xbf16>, vector<1x128xf32> -> vector<1x128xf32>
    %121 = arith.addf %115, %120 : vector<1x128xf32>
    %c0_178 = arith.constant 0 : index
    %c3_179 = arith.constant 3 : index
    %c2_180 = arith.constant 2 : index
    %c0_181 = arith.constant 0 : index
    %122 = vector.load %arg2[%c0_178, %c3_179, %c2_180, %c0_181] : memref<1x4x3x32xbf16, #tpu.memory_space<vmem>>, vector<1x1x1x32xbf16>
    %123 = vector.shape_cast %122 : vector<1x1x1x32xbf16> to vector<1x32xbf16>
    %c0_182 = arith.constant 0 : index
    %c4_183 = arith.constant 4 : index
    %c0_184 = arith.constant 0 : index
    %c0_185 = arith.constant 0 : index
    %124 = vector.load %arg4[%c0_182, %c4_183, %c0_184, %c0_185] : memref<1x5x32x128xbf16, #tpu.memory_space<vmem>>, vector<1x1x32x128xbf16>
    %125 = vector.shape_cast %124 : vector<1x1x32x128xbf16> to vector<32x128xbf16>
    %cst_186 = arith.constant dense<0.000000e+00> : vector<1x128xf32>
    %126 = tpu.matmul %123, %125, %cst_186 {dimension_numbers = #tpu.dot_dimension_numbers<[1], [0], [0], [1], [0, 0, 1, 1], [], []>} : vector<1x32xbf16>, vector<32x128xbf16>, vector<1x128xf32> -> vector<1x128xf32>
    %127 = arith.addf %121, %126 : vector<1x128xf32>
    %c3_187 = arith.constant 3 : index
    %c0_188 = arith.constant 0 : index
    %128 = vector.load %arg8[%c3_187, %c0_188] : memref<4x128xf32, #tpu.memory_space<vmem>>, vector<1x128xf32>
    %129 = arith.addf %128, %127 : vector<1x128xf32>
    %c3_189 = arith.constant 3 : index
    %c0_190 = arith.constant 0 : index
    %130 = vector.load %arg8[%c3_189, %c0_190] : memref<4x128xf32, #tpu.memory_space<vmem>>, vector<1x128xf32>
    tpu.vector_store %arg8[%c3_189, %c0_190], %129 {strides = array<i32>} : memref<4x128xf32, #tpu.memory_space<vmem>>, vector<1x128xf32>,
    %c4_i32 = arith.constant 4 : i32
    %131 = arith.cmpi eq, %arg1, %c4_i32 : i32
    %132 = arith.extui %131 : i1 to i32
    %c0_i32_191 = arith.constant 0 : i32
    %133 = arith.cmpi ne, %132, %c0_i32_191 : i32
    scf.if %133 {
      %c0_192 = arith.constant 0 : index
      %c0_193 = arith.constant 0 : index
      %134 = vector.load %arg8[%c0_192, %c0_193] : memref<4x128xf32, #tpu.memory_space<vmem>>, vector<4x128xf32>
      %135 = arith.truncf %134 : vector<4x128xf32> to vector<4x128xbf16>
      %c0_194 = arith.constant 0 : index
      %c0_195 = arith.constant 0 : index
      %136 = vector.load %arg5[%c0_194, %c0_195] : memref<4x128xbf16, #tpu.memory_space<vmem>>, vector<4x128xbf16>
      tpu.vector_store %arg5[%c0_194, %c0_195], %135 {strides = array<i32>} : memref<4x128xbf16, #tpu.memory_space<vmem>>, vector<4x128xbf16>,
      %cst_196 = arith.constant dense<0.000000e+00> : vector<128xf32>
      %137 = vector.multi_reduction <add>, %134, %cst_196 [0] : vector<4x128xf32> to vector<128xf32>
      %138 = vector.shape_cast %137 : vector<128xf32> to vector<1x128xf32>
      %139 = arith.mulf %134, %134 : vector<4x128xf32>
      %cst_197 = arith.constant dense<0.000000e+00> : vector<128xf32>
      %140 = vector.multi_reduction <add>, %139, %cst_197 [0] : vector<4x128xf32> to vector<128xf32>
      %141 = vector.shape_cast %140 : vector<128xf32> to vector<1x128xf32>
      %142 = vector.shape_cast %138 : vector<1x128xf32> to vector<1x1x128xf32>
      %143 = vector.shape_cast %142 : vector<1x1x128xf32> to vector<1x1x128xf32>
      %144 = vector.broadcast %143 : vector<1x1x128xf32> to vector<1x8x128xf32>
      %c0_198 = arith.constant 0 : index
      %c0_199 = arith.constant 0 : index
      %c0_200 = arith.constant 0 : index
      %145 = vector.load %arg6[%c0_198, %c0_199, %c0_200] : memref<1x8x128xf32, #tpu.memory_space<vmem>>, vector<1x8x128xf32>
      tpu.vector_store %arg6[%c0_198, %c0_199, %c0_200], %144 {strides = array<i32>} : memref<1x8x128xf32, #tpu.memory_space<vmem>>, vector<1x8x128xf32>,
      %146 = vector.shape_cast %141 : vector<1x128xf32> to vector<1x1x128xf32>
      %147 = vector.shape_cast %146 : vector<1x1x128xf32> to vector<1x1x128xf32>
      %148 = vector.broadcast %147 : vector<1x1x128xf32> to vector<1x8x128xf32>
      %c0_201 = arith.constant 0 : index
      %c0_202 = arith.constant 0 : index
      %c0_203 = arith.constant 0 : index
      %149 = vector.load %arg7[%c0_201, %c0_202, %c0_203] : memref<1x8x128xf32, #tpu.memory_space<vmem>>, vector<1x8x128xf32>
      tpu.vector_store %arg7[%c0_201, %c0_202, %c0_203], %148 {strides = array<i32>} : memref<1x8x128xf32, #tpu.memory_space<vmem>>, vector<1x8x128xf32>,
    } else {
    }
    return
  }
  func.func @transform_0(%arg0: i32, %arg1: i32) -> (i32, i32, i32, i32) {
    %c0_i32 = arith.constant 0 : i32
    %c0_i32_0 = arith.constant 0 : i32
    %c0_i32_1 = arith.constant 0 : i32
    return %arg1, %arg0, %c0_i32, %c0_i32_0 : i32, i32, i32, i32
  }
  func.func @transform_1(%arg0: i32, %arg1: i32) -> (i32, i32, i32, i32) {
    %c0_i32 = arith.constant 0 : i32
    %c0_i32_0 = arith.constant 0 : i32
    %c0_i32_1 = arith.constant 0 : i32
    return %arg1, %arg0, %c0_i32, %c0_i32_0 : i32, i32, i32, i32
  }
  func.func @transform_2(%arg0: i32, %arg1: i32) -> (i32, i32, i32, i32) {
    %c0_i32 = arith.constant 0 : i32
    %c0_i32_0 = arith.constant 0 : i32
    %c0_i32_1 = arith.constant 0 : i32
    %c0_i32_2 = arith.constant 0 : i32
    return %arg1, %c0_i32, %c0_i32_0, %c0_i32_1 : i32, i32, i32, i32
  }
  func.func @transform_3(%arg0: i32, %arg1: i32) -> (i32, i32) {
    %c0_i32 = arith.constant 0 : i32
    %c0_i32_0 = arith.constant 0 : i32
    return %arg0, %c0_i32 : i32, i32
  }
  func.func @transform_4(%arg0: i32, %arg1: i32) -> (i32, i32, i32) {
    %c0_i32 = arith.constant 0 : i32
    %c0_i32_0 = arith.constant 0 : i32
    %c0_i32_1 = arith.constant 0 : i32
    return %arg0, %c0_i32, %c0_i32_0 : i32, i32, i32
  }
  func.func @transform_5(%arg0: i32, %arg1: i32) -> (i32, i32, i32) {
    %c0_i32 = arith.constant 0 : i32
    %c0_i32_0 = arith.constant 0 : i32
    %c0_i32_1 = arith.constant 0 : i32
    return %arg0, %c0_i32, %c0_i32_0 : i32, i32, i32
  }
}

module attributes {stable_mosaic.version = 11 : i64} {
  func.func @_linear_sigmoid_kernel(%arg0: memref<4x64xbf16, #tpu.memory_space<vmem>>, %arg1: memref<1x64xf32, #tpu.memory_space<vmem>>, %arg2: memref<1x1xf32, #tpu.memory_space<smem>>, %arg3: memref<4x1xf32, #tpu.memory_space<vmem>>) attributes {dimension_semantics = [], scalar_prefetch = 0 : i64, scratch_operands = 0 : i64, tpu.core_type = #tpu.core_type<tc>} {
    %c0 = arith.constant 0 : index
    %c0_0 = arith.constant 0 : index
    %0 = vector.load %arg0[%c0, %c0_0] : memref<4x64xbf16, #tpu.memory_space<vmem>>, vector<4x64xbf16>
    %1 = arith.extf %0 : vector<4x64xbf16> to vector<4x64xf32>
    %c0_1 = arith.constant 0 : index
    %c0_2 = arith.constant 0 : index
    %2 = vector.load %arg1[%c0_1, %c0_2] : memref<1x64xf32, #tpu.memory_space<vmem>>, vector<1x64xf32>
    %3 = vector.broadcast %2 : vector<1x64xf32> to vector<4x64xf32>
    %4 = arith.mulf %1, %3 : vector<4x64xf32>
    %cst = arith.constant dense<0.000000e+00> : vector<4xf32>
    %5 = vector.multi_reduction <add>, %4, %cst [1] : vector<4x64xf32> to vector<4xf32>
    %6 = vector.shape_cast %5 : vector<4xf32> to vector<4x1xf32>
    %c0_3 = arith.constant 0 : index
    %c0_4 = arith.constant 0 : index
    %7 = memref.load %arg2[%c0_3, %c0_4] : memref<1x1xf32, #tpu.memory_space<smem>>
    %8 = vector.broadcast %7 : f32 to vector<4x1xf32>
    %9 = arith.addf %6, %8 : vector<4x1xf32>
    %cst_5 = arith.constant 0.000000e+00 : f32
    %10 = vector.broadcast %cst_5 : f32 to vector<4x1xf32>
    %11 = arith.subf %10, %9 : vector<4x1xf32>
    %12 = math.exp %11 : vector<4x1xf32>
    %cst_6 = arith.constant 1.000000e+00 : f32
    %13 = vector.broadcast %cst_6 : f32 to vector<4x1xf32>
    %14 = arith.addf %13, %12 : vector<4x1xf32>
    %cst_7 = arith.constant 1.000000e+00 : f32
    %15 = vector.broadcast %cst_7 : f32 to vector<4x1xf32>
    %16 = arith.divf %15, %14 : vector<4x1xf32>
    %c0_8 = arith.constant 0 : index
    %c0_9 = arith.constant 0 : index
    %17 = vector.load %arg3[%c0_8, %c0_9] : memref<4x1xf32, #tpu.memory_space<vmem>>, vector<4x1xf32>
    tpu.vector_store %arg3[%c0_8, %c0_9], %16 {strides = array<i32>} : memref<4x1xf32, #tpu.memory_space<vmem>>, vector<4x1xf32>,
    return
  }
}

module attributes {stable_mosaic.version = 11 : i64} {
  func.func @_bn_lrelu_kernel(%arg0: i32, %arg1: memref<4x128xbf16, #tpu.memory_space<vmem>>, %arg2: memref<1x128xf32, #tpu.memory_space<vmem>>, %arg3: memref<1x128xf32, #tpu.memory_space<vmem>>, %arg4: memref<4x128xbf16, #tpu.memory_space<vmem>>) attributes {dimension_semantics = [#tpu.dimension_semantics<parallel>], iteration_bounds = array<i64: 1>, scalar_prefetch = 0 : i64, scratch_operands = 0 : i64, tpu.core_type = #tpu.core_type<tc>, window_params = [{transform_indices = @transform_0, window_bounds = array<i64: 4, 128>}, {pipeline_mode = #tpu.pipeline_mode<synchronous>, transform_indices = @transform_1, window_bounds = array<i64: 1, 128>}, {pipeline_mode = #tpu.pipeline_mode<synchronous>, transform_indices = @transform_2, window_bounds = array<i64: 1, 128>}, {transform_indices = @transform_3, window_bounds = array<i64: 4, 128>}]} {
    %c0 = arith.constant 0 : index
    %c0_0 = arith.constant 0 : index
    %0 = vector.load %arg1[%c0, %c0_0] : memref<4x128xbf16, #tpu.memory_space<vmem>>, vector<4x128xbf16>
    %1 = arith.extf %0 : vector<4x128xbf16> to vector<4x128xf32>
    %c0_1 = arith.constant 0 : index
    %c0_2 = arith.constant 0 : index
    %2 = vector.load %arg2[%c0_1, %c0_2] : memref<1x128xf32, #tpu.memory_space<vmem>>, vector<1x128xf32>
    %3 = vector.broadcast %2 : vector<1x128xf32> to vector<4x128xf32>
    %4 = arith.mulf %1, %3 : vector<4x128xf32>
    %c0_3 = arith.constant 0 : index
    %c0_4 = arith.constant 0 : index
    %5 = vector.load %arg3[%c0_3, %c0_4] : memref<1x128xf32, #tpu.memory_space<vmem>>, vector<1x128xf32>
    %6 = vector.broadcast %5 : vector<1x128xf32> to vector<4x128xf32>
    %7 = arith.addf %4, %6 : vector<4x128xf32>
    %cst = arith.constant 0.000000e+00 : f32
    %8 = vector.broadcast %cst : f32 to vector<4x128xf32>
    %9 = arith.cmpf oge, %7, %8 : vector<4x128xf32>
    %cst_5 = arith.constant 2.000000e-01 : f32
    %10 = vector.broadcast %cst_5 : f32 to vector<4x128xf32>
    %11 = arith.mulf %10, %7 : vector<4x128xf32>
    %12 = arith.select %9, %7, %11 : vector<4x128xi1>, vector<4x128xf32>
    %13 = arith.truncf %12 : vector<4x128xf32> to vector<4x128xbf16>
    %c0_6 = arith.constant 0 : index
    %c0_7 = arith.constant 0 : index
    %14 = vector.load %arg4[%c0_6, %c0_7] : memref<4x128xbf16, #tpu.memory_space<vmem>>, vector<4x128xbf16>
    tpu.vector_store %arg4[%c0_6, %c0_7], %13 {strides = array<i32>} : memref<4x128xbf16, #tpu.memory_space<vmem>>, vector<4x128xbf16>,
    return
  }
  func.func @transform_0(%arg0: i32) -> (i32, i32) {
    %c0_i32 = arith.constant 0 : i32
    %c0_i32_0 = arith.constant 0 : i32
    return %arg0, %c0_i32 : i32, i32
  }
  func.func @transform_1(%arg0: i32) -> (i32, i32) {
    %c0_i32 = arith.constant 0 : i32
    %c0_i32_0 = arith.constant 0 : i32
    %c0_i32_1 = arith.constant 0 : i32
    return %c0_i32, %c0_i32_0 : i32, i32
  }
  func.func @transform_2(%arg0: i32) -> (i32, i32) {
    %c0_i32 = arith.constant 0 : i32
    %c0_i32_0 = arith.constant 0 : i32
    %c0_i32_1 = arith.constant 0 : i32
    return %c0_i32, %c0_i32_0 : i32, i32
  }
  func.func @transform_3(%arg0: i32) -> (i32, i32) {
    %c0_i32 = arith.constant 0 : i32
    %c0_i32_0 = arith.constant 0 : i32
    return %arg0, %c0_i32 : i32, i32
  }
}

</mosaic_0001>

<bundles_post_ra>
// kernel: discriminator_forward.10
= control target key start
LH: loop header
LB: loop body
LE: loop exit
PB: predicated region body
PF: predicated region fallthrough
CT: control target
= control target key end

     0   :  { %s517_s12 = smov 0   ;;  %s604_s0 = inlined_call_operand.vmem [shape: bf16[256,128], index: 0, kind: input, shape index: {}]   ;;  %s605_s1 = inlined_call_operand.vmem [shape: f32[1,128], index: 1, kind: input, shape index: {}]   ;;  %s606_s2 = inlined_call_operand.vmem [shape: f32[1,128], index: 2, kind: input, shape index: {}]   ;;  %s607_s3 = inlined_call_operand.vmem [shape: bf16[256,128], index: 3, kind: output, shape index: {}]  }
   0x1 LB: > { %s382_s13 = sadd.s32 4294967295, %s495_s12   ;;  %p386_p0 = scmp.ge.s32.totalorder %s495_s12, 1  ;;  %s495_s12 = sphi %s517_s12, %s13_s12  }
   0x2   : > { %p138_p1 = scmp.lt.s32.totalorder %s495_s12, 3 }
   0x4   : > { %p139_p2 = pnand %p386_p0, %p138_p1 }
   0x5   : > { %s387_s14 = sshll.u32 (!%p139_p2), %s382_s13, 4 }
   0x6   : > { %142 = sbr.rel (%p139_p2) target bundleno = 47 (0x2f), region = 32  ;;  %p163_p3 = scmp.lt.s32.totalorder (!%p139_p2), %s387_s14, 31 }
   0xb   : > { %s609_s14 = smov (!%p163_p3, %s387_s14), 31  ;;  %v538_v0 = vld [vmem:[%s605_s1] ss:$0 sm:$0xff] }
   0xc   : > { %s388_s15 = sshll.u32 %s609_s14, 2  ;;  %v546_v6 = vld [vmem:[%s606_s2] ss:$0 sm:$0xff] }
   0xd   : > { %s533_s18 = scalar_lea.vmem %s604_s0, %s388_s15  ;;  %s570_s25 = scalar_lea.vmem %s607_s3, %s388_s15 }
   0xe   : > { %v394_v1 = vld [vmem:[%s533_s18] sm:$0xff]   ;;  %v465_v2 = vld [vmem:[%s533_s18 + $0x8] sm:$0xff]   ;;  %v466_v3 = vld [vmem:[%s533_s18 + $0x10] sm:$0xff]  }
   0xf   : > { %v395_v4 = vunpack.c.l.bf16 %v394_v1  ;;  %v396_v5 = vunpack.c.h.bf16 %v394_v1  ;;  %v399_v7 = vunpack.c.l.bf16 %v465_v2  ;;  %v400_v8 = vunpack.c.h.bf16 %v465_v2  ;;  %v467_v9 = vld [vmem:[%s533_s18 + $0x18] sm:$0xff]   ;;  %v468_v36 = vld [vmem:[%s533_s18 + $0x20] sm:$0xff]   ;;  %v469_v41 = vld [vmem:[%s533_s18 + $0x28] sm:$0xff]  }
  0x10   : > { %v403_v10 = vunpack.c.l.bf16 %v466_v3  ;;  %v404_v11 = vunpack.c.h.bf16 %v466_v3  ;;  %v407_v12 = vunpack.c.l.bf16 %v467_v9  ;;  %v408_v13 = vunpack.c.h.bf16 %v467_v9  ;;  %v470_v52 = vld [vmem:[%s533_s18 + $0x30] sm:$0xff]   ;;  %v471_v53 = vld [vmem:[%s533_s18 + $0x38] sm:$0xff]  }
  0x11   : > { %v210_v14 = vmul.f32 %v538_v0, %v395_v4  ;;  %v211_v15 = vmul.f32 %v538_v0, %v396_v5  ;;  %v212_v16 = vmul.f32 %v538_v0, %v399_v7  ;;  %v213_v17 = vmul.f32 %v538_v0, %v400_v8 }
  0x12   : > { %v214_v18 = vmul.f32 %v538_v0, %v403_v10  ;;  %v215_v19 = vmul.f32 %v538_v0, %v404_v11  ;;  %v216_v20 = vmul.f32 %v538_v0, %v407_v12  ;;  %v217_v21 = vmul.f32 %v538_v0, %v408_v13 }
  0x13   : > { %v230_v22 = vadd.f32 %v546_v6, %v210_v14  ;;  %v231_v23 = vadd.f32 %v546_v6, %v211_v15  ;;  %v232_v24 = vadd.f32 %v546_v6, %v212_v16  ;;  %v233_v25 = vadd.f32 %v546_v6, %v213_v17 }
  0x14   : > { %v234_v26 = vadd.f32 %v546_v6, %v214_v18  ;;  %v235_v27 = vadd.f32 %v546_v6, %v215_v19  ;;  %v236_v28 = vadd.f32 %v546_v6, %v216_v20  ;;  %v237_v29 = vadd.f32 %v546_v6, %v217_v21 }
  0x15   : > { %vm246_vm0 = vcmp.ge.f32.partialorder %v230_v22, 0.0  ;;  %vm247_vm1 = vcmp.ge.f32.partialorder %v231_v23, 0.0  ;;  %v262_v30 = vmul.f32 0.2, %v230_v22  ;;  %v263_v31 = vmul.f32 0.2, %v231_v23 }
  0x16   : > { %vm248_vm2 = vcmp.ge.f32.partialorder %v232_v24, 0.0  ;;  %vm249_vm3 = vcmp.ge.f32.partialorder %v233_v25, 0.0  ;;  %v264_v32 = vmul.f32 0.2, %v232_v24  ;;  %v265_v33 = vmul.f32 0.2, %v233_v25 }
  0x17   : > { %v278_v34 = vsel %vm246_vm0, %v230_v22, %v262_v30  ;;  %v279_v35 = vsel %vm247_vm1, %v231_v23, %v263_v31  ;;  %vm250_vm4 = vcmp.ge.f32.partialorder %v234_v26, 0.0  ;;  %vm251_vm5 = vcmp.ge.f32.partialorder %v235_v27, 0.0 }
  0x18   : > { %v428_v37 = vpack.c.bf16 %v279_v35, %v278_v34  ;;  %v280_v38 = vsel %vm248_vm2, %v232_v24, %v264_v32  ;;  %v281_v39 = vsel %vm249_vm3, %v233_v25, %v265_v33  ;;  %v266_v40 = vmul.f32 0.2, %v234_v26 }
  0x19   : > { %v433_v42 = vpack.c.bf16 %v281_v39, %v280_v38  ;;  %v267_v43 = vmul.f32 0.2, %v235_v27  ;;  %vm252_vm6 = vcmp.ge.f32.partialorder %v236_v28, 0.0  ;;  %vm253_vm7 = vcmp.ge.f32.partialorder %v237_v29, 0.0 }
  0x1a   : > { %429 = vst [vmem:[%s570_s25] sm:$0xff] %v428_v37   ;;  %v282_v44 = vsel %vm250_vm4, %v234_v26, %v266_v40  ;;  %v268_v45 = vmul.f32 0.2, %v236_v28  ;;  %v269_v46 = vmul.f32 0.2, %v237_v29  ;;  %v411_v47 = vunpack.c.l.bf16 %v468_v36 }
  0x1b   : > { %472 = vst [vmem:[%s570_s25 + $0x8] sm:$0xff] %v433_v42   ;;  %v283_v48 = vsel %vm251_vm5, %v235_v27, %v267_v43  ;;  %v412_v49 = vunpack.c.h.bf16 %v468_v36  ;;  %v415_v50 = vunpack.c.l.bf16 %v469_v41  ;;  %v416_v51 = vunpack.c.h.bf16 %v469_v41 }
  0x1c   : > { %v438_v54 = vpack.c.bf16 %v283_v48, %v282_v44  ;;  %v284_v55 = vsel %vm252_vm6, %v236_v28, %v268_v45  ;;  %v285_v56 = vsel %vm253_vm7, %v237_v29, %v269_v46  ;;  %v218_v57 = vmul.f32 %v538_v0, %v411_v47 }
  0x1d   : > { %v443_v58 = vpack.c.bf16 %v285_v56, %v284_v55  ;;  %v219_v59 = vmul.f32 %v538_v0, %v412_v49  ;;  %v220_v60 = vmul.f32 %v538_v0, %v415_v50  ;;  %v221_v61 = vmul.f32 %v538_v0, %v416_v51 }
  0x1e   : > { %473 = vst [vmem:[%s570_s25 + $0x10] sm:$0xff] %v438_v54   ;;  %v238_v62 = vadd.f32 %v546_v6, %v218_v57  ;;  %v419_v63 = vunpack.c.l.bf16 %v470_v52  ;;  %v420_v1 = vunpack.c.h.bf16 %v470_v52  ;;  %v423_v2 = vunpack.c.l.bf16 %v471_v53 }
  0x1f   : > { %474 = vst [vmem:[%s570_s25 + $0x18] sm:$0xff] %v443_v58   ;;  %v239_v3 = vadd.f32 %v546_v6, %v219_v59  ;;  %v240_v4 = vadd.f32 %v546_v6, %v220_v60  ;;  %v241_v5 = vadd.f32 %v546_v6, %v221_v61  ;;  %v424_v7 = vunpack.c.h.bf16 %v471_v53 }
  0x20   : > { %vm254_vm8 = vcmp.ge.f32.partialorder %v238_v62, 0.0  ;;  %v270_v8 = vmul.f32 0.2, %v238_v62  ;;  %v222_v9 = vmul.f32 %v538_v0, %v419_v63  ;;  %v223_v10 = vmul.f32 %v538_v0, %v420_v1 }
  0x21   : > { %vm255_vm9 = vcmp.ge.f32.partialorder %v239_v3, 0.0  ;;  %v271_v11 = vmul.f32 0.2, %v239_v3  ;;  %vm256_vm10 = vcmp.ge.f32.partialorder %v240_v4, 0.0  ;;  %vm257_vm11 = vcmp.ge.f32.partialorder %v241_v5, 0.0 }
  0x22   : > { %v286_v12 = vsel %vm254_vm8, %v238_v62, %v270_v8  ;;  %v272_v13 = vmul.f32 0.2, %v240_v4  ;;  %v273_v14 = vmul.f32 0.2, %v241_v5  ;;  %v242_v15 = vadd.f32 %v546_v6, %v222_v9 }
  0x23   : > { %v287_v16 = vsel %vm255_vm9, %v239_v3, %v271_v11  ;;  %v243_v17 = vadd.f32 %v546_v6, %v223_v10  ;;  %v224_v18 = vmul.f32 %v538_v0, %v423_v2  ;;  %v225_v19 = vmul.f32 %v538_v0, %v424_v7 }
  0x24   : > { %v448_v20 = vpack.c.bf16 %v287_v16, %v286_v12  ;;  %v288_v21 = vsel %vm256_vm10, %v240_v4, %v272_v13  ;;  %v289_v22 = vsel %vm257_vm11, %v241_v5, %v273_v14  ;;  %vm258_vm12 = vcmp.ge.f32.partialorder %v242_v15, 0.0 }
  0x25   : > { %v453_v23 = vpack.c.bf16 %v289_v22, %v288_v21  ;;  %vm259_vm13 = vcmp.ge.f32.partialorder %v243_v17, 0.0  ;;  %v274_v24 = vmul.f32 0.2, %v242_v15  ;;  %v275_v25 = vmul.f32 0.2, %v243_v17 }
  0x26   : > { %475 = vst [vmem:[%s570_s25 + $0x20] sm:$0xff] %v448_v20   ;;  %v244_v26 = vadd.f32 %v546_v6, %v224_v18  ;;  %v245_v27 = vadd.f32 %v546_v6, %v225_v19 }
  0x27   : > { %476 = vst [vmem:[%s570_s25 + $0x28] sm:$0xff] %v453_v23   ;;  %v290_v28 = vsel %vm258_vm12, %v242_v15, %v274_v24  ;;  %v291_v29 = vsel %vm259_vm13, %v243_v17, %v275_v25 }
  0x28   : > { %v458_v30 = vpack.c.bf16 %v291_v29, %v290_v28  ;;  %vm260_vm14 = vcmp.ge.f32.partialorder %v244_v26, 0.0  ;;  %vm261_vm15 = vcmp.ge.f32.partialorder %v245_v27, 0.0  ;;  %v276_v0 = vmul.f32 0.2, %v244_v26 }
  0x29   : > { %v277_v31 = vmul.f32 0.2, %v245_v27 }
  0x2a   : > { %477 = vst [vmem:[%s570_s25 + $0x30] sm:$0xff] %v458_v30   ;;  %v292_v32 = vsel %vm260_vm14, %v244_v26, %v276_v0 }
  0x2b   : > { %v293_v33 = vsel %vm261_vm15, %v245_v27, %v277_v31 }
  0x2c   : > { %v463_v34 = vpack.c.bf16 %v293_v33, %v292_v32 }
  0x2e   : > { %478 = vst [vmem:[%s570_s25 + $0x38] sm:$0xff] %v463_v34  }
  0x2f PF: > { %s13_s12 = sadd.s32 1, %s495_s12  }
  0x30   : > { %p10_p4 = scmp.ge.s32.totalorder %s13_s12, 4  }
  0x32   :  { %12 = sbr.rel (!%p10_p4) target bundleno = 1 (0x1), region = 62 }

// kernel: discriminator_forward.9
= control target key start
LH: loop header
LB: loop body
LE: loop exit
PB: predicated region body
PF: predicated region fallthrough
CT: control target
= control target key end

     0   :  { %s1946_s18 = smov 0   ;;  %s1948_s19 = smov 0   ;;  %s2191_s0 = inlined_call_operand.vmem [shape: bf16[5,4,80,8], index: 0, kind: input, shape index: {}]   ;;  %s2192_s1 = inlined_call_operand.vmem [shape: bf16[5,4,80,8], index: 1, kind: input, shape index: {}]   ;;  %s2193_s2 = inlined_call_operand.vmem [shape: bf16[5,5,8,128], index: 2, kind: input, shape index: {}]   ;;  %s2194_s3 = inlined_call_operand.vmem [shape: bf16[256,128], index: 3, kind: output, shape index: {0}]   ;;  %s2195_s4 = inlined_call_operand.vmem [shape: f32[2,8,128], index: 4, kind: output, shape index: {1}]   ;;  %s2196_s5 = inlined_call_operand.vmem [shape: f32[2,8,128], index: 5, kind: output, shape index: {2}]  }
   0x1   :  { %s1950_s20 = smov 0   ;;  %s1952_s21 = smov 0  }
   0x2   :  { %s1954_s22 = smov 0  }
   0x3 LB: > { %s25_s23 = sadd.s32 1, %s1905_s20  ;;  %s28_s24 = sadd.s32 1, %s1909_s21  ;;  %s1913_s22 = sphi %s1954_s22, %s16_s22   ;;  %s1909_s21 = sphi %s1952_s21, %s2200_s21   ;;  %s1905_s20 = sphi %s1950_s20, %s2199_s20   ;;  %s1901_s19 = sphi %s1948_s19, %s2198_s19   ;;  %s1897_s18 = sphi %s1946_s18, %s2197_s18  }
   0x4   : > { %p26_p0 = scmp.ge.s32.totalorder %s25_s23, 5  ;;  %p1480_p1 = scmp.ge.s32.totalorder %s1913_s22, 1 }
   0x5   : > { %p240_p2 = scmp.lt.s32.totalorder %s1913_s22, 11 }
   0x6   : > { %s2202_s23 = smov (%p26_p0, %s25_s23), 0  ;;  %s2204_s24 = smov (!%p26_p0, %s28_s24), %s1909_s21 }
   0x7   : > { %p241_p3 = pnand %p1480_p1, %p240_p2  ;;  %p30_p4 = scmp.ge.s32.totalorder %s2204_s24, 2 }
   0x8   : > { %s1481_s25 = sshll.u32 (!%p241_p3), %s1901_s19, 1  ;;  %p297_p5 = scmp.lt.s32.totalorder (!%p241_p3), %s1897_s18, 4 }
   0x9   : > { %s2206_s24 = smov (%p30_p4, %s2204_s24), 0  ;;  %244 = sbr.rel (%p241_p3) target bundleno = 390 (0x186), region = 32 }
   0xa   : > { %p299_p6 = scmp.lt.s32.totalorder (!%p241_p3), %s1481_s25, 3  ;;  %s1486_s26 = sshll.u32 (!%p241_p3), %s1901_s19, 4 }
   0xb   : > { %p324_p7 = scmp.lt.s32.totalorder (!%p241_p3), %s1486_s26, 31  ;;  %p329_p8 = scmp.lt.s32.totalorder (!%p241_p3), %s1901_s19, 1 }
   0xc   : > { %p1490_p9 = scmp.ne.s32.totalorder (!%p241_p3), %s1897_s18, 0 }
   0xe   : > { %s298_s27 = scalar_select %p297_p5, %s1897_s18, 4 }
   0xf   : > { %s2208_s25 = smov (!%p299_p6, %s1481_s25), 3  ;;  %s2210_s26 = smov (!%p324_p7, %s1486_s26), 31 }
  0x10   : > { %s1832_s28 = smul.u32 40, %s298_s27  ;;  %s2212_s19 = smov (!%p329_p8, %s1901_s19), 1 }
  0x11   : > { %s1831_s29 = smul.u32 10, %s2208_s25  ;;  %s1487_s17 = sshll.u32 %s2210_s26, 2 }
  0x12   : > { %s1833_s30 = smul.u32 20, %s298_s27 }
  0x13   : > { %s303_s6 = sadd.s32 %s1832_s28, %s1831_s29  ;;  %s2004_s28 = scalar_lea.vmem %s2194_s3, %s1487_s17 }
  0x14   : > { %s1482_s7 = sshll.u32 %s303_s6, 2  ;;  %s1988_s10 = scalar_lea.vmem %s2193_s2, %s1833_s30 }
  0x15   : > { %s1993_s13 = scalar_lea.vmem %s2191_s0, %s1482_s7  ;;  %s1998_s16 = scalar_lea.vmem %s2192_s1, %s1482_s7 }
  0x16   : > { %s1488_s29 = sshll.u32 %s2212_s19, 3  ;;  %341 = sbr.rel (%p1490_p9) target bundleno = 44 (0x2c), region = 36 }
  0x17   : > { %s2009_s8 = scalar_lea.vmem %s2195_s4, %s1488_s29  ;;  %s2014_s12 = scalar_lea.vmem %s2196_s5, %s1488_s29 }
  0x1b   : > { %v1915_v0 = vmov 0.0  }
  0x1c   : > { %342 = vst [vmem:[#allocation2 + $0x30] sm:$0xff] %v1915_v0 }
  0x1d   : > { %343 = vst [vmem:[#allocation2] sm:$0xff] %v1915_v0 }
  0x1e   : > { %344 = vst [vmem:[#allocation2 + $0x58] sm:$0xff] %v1915_v0 }
  0x1f   : > { %345 = vst [vmem:[#allocation2 + $0x18] sm:$0xff] %v1915_v0 }
  0x20   : > { %346 = vst [vmem:[#allocation2 + $0x50] sm:$0xff] %v1915_v0 }
  0x21   : > { %347 = vst [vmem:[#allocation2 + $0x68] sm:$0xff] %v1915_v0 }
  0x22   : > { %348 = vst [vmem:[#allocation2 + $0x8] sm:$0xff] %v1915_v0 }
  0x23   : > { %349 = vst [vmem:[#allocation2 + $0x48] sm:$0xff] %v1915_v0 }
  0x24   : > { %350 = vst [vmem:[#allocation2 + $0x40] sm:$0xff] %v1915_v0 }
  0x25   : > { %351 = vst [vmem:[#allocation2 + $0x20] sm:$0xff] %v1915_v0 }
  0x26   : > { %352 = vst [vmem:[#allocation2 + $0x10] sm:$0xff] %v1915_v0 }
  0x27   : > { %353 = vst [vmem:[#allocation2 + $0x38] sm:$0xff] %v1915_v0 }
  0x28   : > { %354 = vst [vmem:[#allocation2 + $0x60] sm:$0xff] %v1915_v0 }
  0x29   : > { %355 = vst [vmem:[#allocation2 + $0x70] sm:$0xff] %v1915_v0 }
  0x2a   : > { %356 = vst [vmem:[#allocation2 + $0x78] sm:$0xff] %v1915_v0 }
  0x2b   : > { %357 = vst [vmem:[#allocation2 + $0x28] sm:$0xff] %v1915_v0 }
  0x2c PF: > { %v1491_v1 = vld [vmem:[%s1988_s10 + $0x4] sm:$0xf]  ;;  %vm410_vm0 = vcmask 1043456   ;;  %v366_v2 = vld [vmem:[%s1988_s10] sm:$0xf]  ;;  %v1748_v5 = vld [vmem:[%s1998_s16 + $0x10] sm:$0xff] }
  0x2d   : > { %v412_v3 = vsel %vm410_vm0, %v1491_v1, 0  ;;  %v476_v4 = vsel %vm410_vm0, %v366_v2, 0  ;;  %v1744_v6 = vld [vmem:[%s1993_s13 + $0x10] sm:$0xff]  ;;  %v1532_v7 = vld [vmem:[%s1988_s10 + $0x8] sm:$0xf]  ;;  %vm397_vm1 = vcmask 64512  }
  0x2e   : > { %1829 = vmatpush.bf16.msra.mxu2 %v412_v3  ;;  %1830 = vmatpush.bf16.msra.mxu3 %v476_v4  ;;  %v550_v8 = vsel %vm410_vm0, %v1532_v7, 0  ;;  %v1746_v9 = vld [vmem:[%s1998_s16] sm:$0xff]  ;;  %v1553_v11 = vld [vmem:[%s1988_s10 + $0xc] sm:$0xf]  ;;  %v1574_v13 = vld [vmem:[%s1988_s10 + $0x10] sm:$0xf] }
  0x2f   : > { %v1742_v10 = vld [vmem:[%s1993_s13] sm:$0xff]  ;;  %421 = vmatpush.bf16.msra.mxu0 %v412_v3  ;;  %485 = vmatpush.bf16.msra.mxu1 %v476_v4  ;;  %v632_v12 = vsel %vm410_vm0, %v1553_v11, 0  ;;  %v714_v15 = vsel %vm410_vm0, %v1574_v13, 0  ;;  %v1660_v19 = vld [vmem:[%s1988_s10 + $0x8] sm:$0xf]  ;;  %v1749_v25 = vld [vmem:[%s1998_s16 + $0x18] sm:$0xff] }
  0x30   : > { %v1611_v14 = vld [vmem:[%s1988_s10 + $0x4] sm:$0xf]  ;;  %v786_v17 = vld [vmem:[%s1988_s10] sm:$0xf]  ;;  %v967_v20 = vsel %vm410_vm0, %v1660_v19, 0  ;;  %v1745_v26 = vld [vmem:[%s1993_s13 + $0x18] sm:$0xff] }
  0x31   : > { %v830_v16 = vsel %vm410_vm0, %v1611_v14, 0  ;;  %1510 = vmatmul.msk.bf16.vlgmr.msra.gmra.mxu2 %vm397_vm1, %v1748_v5  ;;  %1530 = vmatmul.msk.bf16.vlgmr.msra.gmra.mxu3 %vm397_vm1, %v1744_v6  ;;  %v894_v18 = vsel %vm410_vm0, %v786_v17, 0  ;;  %v1689_v21 = vld [vmem:[%s1988_s10 + $0xc] sm:$0xf]  ;;  %v1718_v22 = vld [vmem:[%s1988_s10 + $0x10] sm:$0xf] }
  0x32   : > { %559 = vmatpush.bf16.msrb.mxu2 %v550_v8  ;;  %641 = vmatpush.bf16.msrb.mxu3 %v632_v12  ;;  %v1048_v23 = vsel %vm410_vm0, %v1689_v21, 0  ;;  %v1129_v24 = vsel %vm410_vm0, %v1718_v22, 0  ;;  %v1747_v27 = vld [vmem:[%s1998_s16 + $0x8] sm:$0xff]  ;;  %v1759_v35 = vld [vmem:[%s1993_s13 + $0x10] sm:$0xff]  ;;  %v1760_v39 = vld [vmem:[%s1993_s13 + $0x18] sm:$0xff]  ;;  %p1739_p10 = scmp.ne.s32.totalorder %s1897_s18, 4 }
  0x33   : > { %1508 = vmatmul.msk.bf16.vlgmr.msra.gmra.mxu0 %vm397_vm1, %v1746_v9  ;;  %1528 = vmatmul.msk.bf16.vlgmr.msra.gmra.mxu1 %vm397_vm1, %v1742_v10  ;;  %v1743_v28 = vld [vmem:[%s1993_s13 + $0x8] sm:$0xff]  ;;  %v1767_v36 = vld [vmem:[%s1998_s16 + $0x30] sm:$0xff]  ;;  %v1768_v40 = vld [vmem:[%s1998_s16 + $0x38] sm:$0xff] }
  0x34   : > { %723 = vmatpush.bf16.msrb.mxu0 %v714_v15  ;;  %839 = vmatpush.bf16.msrb.mxu1 %v830_v16  ;;  %v1750_v29 = vld [vmem:[%s1993_s13 + $0x4] sm:$0xff]  ;;  %v1751_v33 = vld [vmem:[%s1993_s13 + $0xc] sm:$0xff]  ;;  %v1752_v37 = vld [vmem:[%s1993_s13 + $0x14] sm:$0xff] }
  0x35   : > { %v1754_v30 = vld [vmem:[%s1998_s16 + $0x4] sm:$0xff]  ;;  %v1755_v34 = vld [vmem:[%s1998_s16 + $0xc] sm:$0xff]  ;;  %v1756_v38 = vld [vmem:[%s1998_s16 + $0x14] sm:$0xff] }
  0x36   : > { %903 = vmatpush.bf16.msra.mxu2 %v894_v18  ;;  %976 = vmatpush.bf16.msra.mxu3 %v967_v20  ;;  %v1758_v31 = vld [vmem:[%s1993_s13 + $0x8] sm:$0xff]  ;;  %v1753_v41 = vld [vmem:[%s1993_s13 + $0x1c] sm:$0xff]  ;;  %v1778_v48 = vld [vmem:[%s1993_s13 + $0x30] sm:$0xff] }
  0x37   : > { %v1766_v32 = vld [vmem:[%s1998_s16 + $0x28] sm:$0xff]  ;;  %v1757_v42 = vld [vmem:[%s1998_s16 + $0x1c] sm:$0xff]  ;;  %v1763_v49 = vld [vmem:[%s1993_s13 + $0x30] sm:$0xff] }
  0x38   : > { %1057 = vmatpush.bf16.msra.mxu0 %v1048_v23  ;;  %1138 = vmatpush.bf16.msra.mxu1 %v1129_v24  ;;  %v1761_v43 = vld [vmem:[%s1993_s13 + $0x20] sm:$0xff]  ;;  %v1762_v45 = vld [vmem:[%s1993_s13 + $0x28] sm:$0xff]  ;;  %v1771_v50 = vld [vmem:[%s1993_s13 + $0x34] sm:$0xff] }
  0x39   : > { %v1769_v44 = vld [vmem:[%s1998_s16 + $0x40] sm:$0xff]  ;;  %v1770_v46 = vld [vmem:[%s1993_s13 + $0x2c] sm:$0xff]  ;;  %v1775_v51 = vld [vmem:[%s1998_s16 + $0x34] sm:$0xff] }
  0x3a   : > { %v1774_v47 = vld [vmem:[%s1998_s16 + $0x2c] sm:$0xff]  ;;  %v1779_v52 = vld [vmem:[%s1993_s13 + $0x38] sm:$0xff]  ;;  %v1780_v56 = vld [vmem:[%s1993_s13 + $0x40] sm:$0xff] }
  0x3b   : > { %v1764_v53 = vld [vmem:[%s1993_s13 + $0x38] sm:$0xff]  ;;  %v1765_v1 = vld [vmem:[%s1993_s13 + $0x40] sm:$0xff]  ;;  %v1781_v4 = vld [vmem:[%s1993_s13 + $0x48] sm:$0xff] }
  0x3c   : > { %v1772_v54 = vld [vmem:[%s1993_s13 + $0x3c] sm:$0xff]  ;;  %v1773_v2 = vld [vmem:[%s1993_s13 + $0x44] sm:$0xff]  ;;  %v753_v22 = vld [vmem:[#allocation2 + $0x30] sm:$0xff] }
  0x3d   : > { %v1776_v55 = vld [vmem:[%s1998_s16 + $0x3c] sm:$0xff]  ;;  %v1777_v3 = vld [vmem:[%s1998_s16 + $0x44] sm:$0xff] }
  0x41   : > { %1511 = vmatmul.msk.bf16.gmra.mxu2 %vm397_vm1, %v1749_v25  ;;  %1531 = vmatmul.msk.bf16.gmra.mxu3 %vm397_vm1, %v1745_v26 }
  0x43   : > { %1509 = vmatmul.msk.bf16.gmra.mxu0 %vm397_vm1, %v1747_v27  ;;  %1529 = vmatmul.msk.bf16.gmra.mxu1 %vm397_vm1, %v1743_v28 }
  0x51   : > { %1549 = vmatmul.msk.bf16.vlgmr.msrb.gmra.mxu2 %vm397_vm1, %v1750_v29  ;;  %1570 = vmatmul.msk.bf16.vlgmr.msrb.gmra.mxu3 %vm397_vm1, %v1754_v30 }
  0x53   : > { %1591 = vmatmul.msk.bf16.vlgmr.msrb.gmra.mxu0 %vm397_vm1, %v1758_v31  ;;  %1628 = vmatmul.msk.bf16.vlgmr.msrb.gmra.mxu1 %vm397_vm1, %v1766_v32  ;;  %v754_v32 = vld [vmem:[#allocation2] sm:$0xff] }
  0x61   : > { %1550 = vmatmul.msk.bf16.gmra.mxu2 %vm397_vm1, %v1751_v33  ;;  %1571 = vmatmul.msk.bf16.gmra.mxu3 %vm397_vm1, %v1755_v34 }
  0x63   : > { %1592 = vmatmul.msk.bf16.gmra.mxu0 %vm397_vm1, %v1759_v35  ;;  %1629 = vmatmul.msk.bf16.gmra.mxu1 %vm397_vm1, %v1767_v36 }
  0x71   : > { %1551 = vmatmul.msk.bf16.gmra.mxu2 %vm397_vm1, %v1752_v37  ;;  %1572 = vmatmul.msk.bf16.gmra.mxu3 %vm397_vm1, %v1756_v38 }
  0x73   : > { %1593 = vmatmul.msk.bf16.gmra.mxu0 %vm397_vm1, %v1760_v39  ;;  %1630 = vmatmul.msk.bf16.gmra.mxu1 %vm397_vm1, %v1768_v40 }
  0x81   : > { %1552 = vmatmul.msk.bf16.gmra.mxu2 %vm397_vm1, %v1753_v41  ;;  %1573 = vmatmul.msk.bf16.gmra.mxu3 %vm397_vm1, %v1757_v42  ;;  %v755_v42 = vld [vmem:[#allocation2 + $0x58] sm:$0xff] }
  0x83   : > { %1594 = vmatmul.msk.bf16.gmra.mxu0 %vm397_vm1, %v1761_v43  ;;  %1631 = vmatmul.msk.bf16.gmra.mxu1 %vm397_vm1, %v1769_v44 }
  0x91   : > { %1648 = vmatmul.msk.bf16.vlgmr.msra.gmra.mxu2 %vm397_vm1, %v1762_v45  ;;  %1677 = vmatmul.msk.bf16.vlgmr.msra.gmra.mxu3 %vm397_vm1, %v1770_v46 }
  0x93   : > { %1706 = vmatmul.msk.bf16.vlgmr.msra.gmra.mxu0 %vm397_vm1, %v1774_v47  ;;  %1735 = vmatmul.msk.bf16.vlgmr.msra.gmra.mxu1 %vm397_vm1, %v1778_v48 }
  0xa1   : > { %1649 = vmatmul.msk.bf16.gmra.mxu2 %vm397_vm1, %v1763_v49  ;;  %1678 = vmatmul.msk.bf16.gmra.mxu3 %vm397_vm1, %v1771_v50 }
  0xa3   : > { %1707 = vmatmul.msk.bf16.gmra.mxu0 %vm397_vm1, %v1775_v51  ;;  %1736 = vmatmul.msk.bf16.gmra.mxu1 %vm397_vm1, %v1779_v52  ;;  %v756_v52 = vld [vmem:[#allocation2 + $0x18] sm:$0xff] }
  0xb0   : > { %v423_v57 = vpop.f32.mrf.mxu0  ;;  %v487_v58 = vpop.f32.mrf.mxu1 }
  0xb1   : > { %1650 = vmatmul.msk.bf16.gmra.mxu2 %vm397_vm1, %v1764_v53  ;;  %1679 = vmatmul.msk.bf16.gmra.mxu3 %vm397_vm1, %v1772_v54  ;;  %v488_v15 = vadd.f32 %v487_v58, %v423_v57 }
  0xb3   : > { %1708 = vmatmul.msk.bf16.gmra.mxu0 %vm397_vm1, %v1776_v55  ;;  %1737 = vmatmul.msk.bf16.gmra.mxu1 %vm397_vm1, %v1780_v56 }
  0xb4   : > { %v2109_v59 = vpop.f32.mrf.mxu2  ;;  %v2111_v60 = vpop.f32.mrf.mxu3 }
  0xb5   : > { %v498_v54 = vadd.f32 %v2111_v60, %v2109_v59 }
  0xb8   : > { %v425_v61 = vpop.f32.mrf.mxu0  ;;  %v489_v62 = vpop.f32.mrf.mxu1 }
  0xb9   : > { %v490_v24 = vadd.f32 %v489_v62, %v425_v61 }
  0xbc   : > { %v2113_v63 = vpop.f32.mrf.mxu2  ;;  %v2115_v0 = vpop.f32.mrf.mxu3 }
  0xc0   : > { %v428_v5 = vpop.f32.mrf.mxu0  ;;  %v492_v6 = vpop.f32.mrf.mxu1 }
  0xc1   : > { %1651 = vmatmul.msk.bf16.gmra.mxu2 %vm397_vm1, %v1765_v1  ;;  %1680 = vmatmul.msk.bf16.gmra.mxu3 %vm397_vm1, %v1773_v2  ;;  %v493_v34 = vadd.f32 %v492_v6, %v428_v5  ;;  %v757_v2 = vld [vmem:[#allocation2 + $0x50] sm:$0xff] }
  0xc3   : > { %1709 = vmatmul.msk.bf16.gmra.mxu0 %vm397_vm1, %v1777_v3  ;;  %1738 = vmatmul.msk.bf16.gmra.mxu1 %vm397_vm1, %v1781_v4  ;;  %v500_v4 = vadd.f32 %v2115_v0, %v2113_v63 }
  0xc4   : > { %v2125_v7 = vpop.f32.mrf.mxu2  ;;  %v2127_v8 = vpop.f32.mrf.mxu3 }
  0xc8   : > { %v430_v9 = vpop.f32.mrf.mxu0  ;;  %v494_v10 = vpop.f32.mrf.mxu1 }
  0xc9   : > { %v495_v44 = vadd.f32 %v494_v10, %v430_v9 }
  0xcc   : > { %v2129_v11 = vpop.f32.mrf.mxu2  ;;  %v2131_v12 = vpop.f32.mrf.mxu3 }
  0xd0   : > { %v725_v13 = vpop.f32.mrf.mxu0  ;;  %v2133_v14 = vpop.f32.mrf.mxu1 }
  0xd4   : > { %v561_v16 = vpop.f32.mrf.mxu2  ;;  %v643_v17 = vpop.f32.mrf.mxu3 }
  0xd5   : > { %v581_v18 = vadd.f32 %v561_v16, %v488_v15  ;;  %v758_v15 = vld [vmem:[#allocation2 + $0x68] sm:$0xff] }
  0xd7   : > { %v663_v19 = vadd.f32 %v643_v17, %v581_v18  ;;  %v503_v17 = vadd.f32 %v2127_v8, %v2125_v7 }
  0xd8   : > { %v727_v20 = vpop.f32.mrf.mxu0  ;;  %v2135_v21 = vpop.f32.mrf.mxu1 }
  0xd9   : > { %v745_v23 = vadd.f32 %v725_v13, %v663_v19 }
  0xdb   : > { %v761_v25 = vadd.f32 %v753_v22, %v745_v23 }
  0xdc   : > { %v563_v26 = vpop.f32.mrf.mxu2  ;;  %v645_v27 = vpop.f32.mrf.mxu3 }
  0xdd   : > { %769 = vst [vmem:[#allocation2 + $0x30] sm:$0xff] %v761_v25  ;;  %v582_v28 = vadd.f32 %v563_v26, %v490_v24  ;;  %v759_v24 = vld [vmem:[#allocation2 + $0x8] sm:$0xff]  ;;  %v505_v26 = vadd.f32 %v2131_v12, %v2129_v11  ;;  %v1168_v12 = vld [vmem:[#allocation2 + $0x40] sm:$0xff] }
  0xdf   : > { %v664_v29 = vadd.f32 %v645_v27, %v582_v28 }
  0xe0   : > { %v730_v30 = vpop.f32.mrf.mxu0  ;;  %v2137_v31 = vpop.f32.mrf.mxu1 }
  0xe1   : > { %v746_v33 = vadd.f32 %v727_v20, %v664_v29 }
  0xe3   : > { %v762_v35 = vadd.f32 %v754_v32, %v746_v33  ;;  %v760_v33 = vld [vmem:[#allocation2 + $0x48] sm:$0xff] }
  0xe4   : > { %v566_v36 = vpop.f32.mrf.mxu2  ;;  %v648_v37 = vpop.f32.mrf.mxu3 }
  0xe5   : > { %770 = vst [vmem:[#allocation2] sm:$0xff] %v762_v35  ;;  %v583_v38 = vadd.f32 %v566_v36, %v493_v34 }
  0xe7   : > { %v665_v39 = vadd.f32 %v648_v37, %v583_v38 }
  0xe8   : > { %v732_v40 = vpop.f32.mrf.mxu0  ;;  %v2139_v41 = vpop.f32.mrf.mxu1 }
  0xe9   : > { %v747_v43 = vadd.f32 %v730_v30, %v665_v39 }
  0xeb   : > { %v763_v45 = vadd.f32 %v755_v42, %v747_v43 }
  0xec   : > { %v568_v46 = vpop.f32.mrf.mxu2  ;;  %v650_v47 = vpop.f32.mrf.mxu3 }
  0xed   : > { %771 = vst [vmem:[#allocation2 + $0x58] sm:$0xff] %v763_v45  ;;  %v584_v48 = vadd.f32 %v568_v46, %v495_v44 }
  0xef   : > { %v666_v49 = vadd.f32 %v650_v47, %v584_v48 }
  0xf0   : > { %v735_v50 = vpop.f32.mrf.mxu0  ;;  %v2141_v51 = vpop.f32.mrf.mxu1 }
  0xf1   : > { %v748_v53 = vadd.f32 %v732_v40, %v666_v49 }
  0xf3   : > { %v764_v55 = vadd.f32 %v756_v52, %v748_v53  ;;  %v1169_v53 = vld [vmem:[#allocation2 + $0x20] sm:$0xff] }
  0xf4   : > { %v571_v56 = vpop.f32.mrf.mxu2  ;;  %v653_v57 = vpop.f32.mrf.mxu3 }
  0xf5   : > { %772 = vst [vmem:[#allocation2 + $0x18] sm:$0xff] %v764_v55  ;;  %v585_v58 = vadd.f32 %v571_v56, %v498_v54 }
  0xf7   : > { %v667_v61 = vadd.f32 %v653_v57, %v585_v58 }
  0xf8   : > { %v737_v62 = vpop.f32.mrf.mxu0  ;;  %v2145_v1 = vpop.f32.mrf.mxu1 }
  0xf9   : > { %v749_v3 = vadd.f32 %v735_v50, %v667_v61 }
  0xfb   : > { %v765_v5 = vadd.f32 %v757_v2, %v749_v3  ;;  %v1170_v3 = vld [vmem:[#allocation2 + $0x10] sm:$0xff] }
  0xfc   : > { %v573_v6 = vpop.f32.mrf.mxu2  ;;  %v655_v9 = vpop.f32.mrf.mxu3 }
  0xfd   : > { %773 = vst [vmem:[#allocation2 + $0x50] sm:$0xff] %v765_v5  ;;  %v586_v10 = vadd.f32 %v573_v6, %v500_v4 }
  0xff   : > { %v668_v59 = vadd.f32 %v655_v9, %v586_v10 }
 0x100   : > { %v740_v60 = vpop.f32.mrf.mxu0  ;;  %v2149_v13 = vpop.f32.mrf.mxu1 }
 0x101   : > { %v750_v16 = vadd.f32 %v737_v62, %v668_v59 }
 0x103   : > { %v766_v18 = vadd.f32 %v758_v15, %v750_v16  ;;  %v1171_v15 = vld [vmem:[#allocation2 + $0x38] sm:$0xff] }
 0x104   : > { %v576_v19 = vpop.f32.mrf.mxu2  ;;  %v658_v20 = vpop.f32.mrf.mxu3 }
 0x105   : > { %774 = vst [vmem:[#allocation2 + $0x68] sm:$0xff] %v766_v18  ;;  %v587_v22 = vadd.f32 %v576_v19, %v503_v17 }
 0x107   : > { %v669_v63 = vadd.f32 %v658_v20, %v587_v22 }
 0x108   : > { %v742_v0 = vpop.f32.mrf.mxu0  ;;  %v2153_v23 = vpop.f32.mrf.mxu1 }
 0x109   : > { %v751_v25 = vadd.f32 %v740_v60, %v669_v63 }
 0x10b   : > { %v767_v27 = vadd.f32 %v759_v24, %v751_v25 }
 0x10c   : > { %v578_v28 = vpop.f32.mrf.mxu2  ;;  %v660_v29 = vpop.f32.mrf.mxu3 }
 0x10d   : > { %775 = vst [vmem:[#allocation2 + $0x8] sm:$0xff] %v767_v27  ;;  %v588_v30 = vadd.f32 %v578_v28, %v505_v26 }
 0x10f   : > { %v670_v7 = vadd.f32 %v660_v29, %v588_v30 }
 0x110   : > { %v1059_v8 = vpop.f32.mrf.mxu0  ;;  %v1140_v32 = vpop.f32.mrf.mxu1 }
 0x111   : > { %v752_v34 = vadd.f32 %v742_v0, %v670_v7  ;;  %v1172_v0 = vld [vmem:[#allocation2 + $0x60] sm:$0xff] }
 0x113   : > { %v768_v35 = vadd.f32 %v760_v33, %v752_v34 }
 0x114   : > { %v905_v36 = vpop.f32.mrf.mxu2  ;;  %v978_v37 = vpop.f32.mrf.mxu3 }
 0x115   : > { %776 = vst [vmem:[#allocation2 + $0x48] sm:$0xff] %v768_v35  ;;  %v906_v38 = vadd.f32 %v905_v36, %v2133_v14 }
 0x117   : > { %v998_v39 = vadd.f32 %v978_v37, %v906_v38 }
 0x118   : > { %v1061_v40 = vpop.f32.mrf.mxu0  ;;  %v1142_v42 = vpop.f32.mrf.mxu1 }
 0x119   : > { %v1079_v11 = vadd.f32 %v1059_v8, %v998_v39  ;;  %v1173_v8 = vld [vmem:[#allocation2 + $0x70] sm:$0xff] }
 0x11b   : > { %v1160_v43 = vadd.f32 %v1140_v32, %v1079_v11 }
 0x11c   : > { %v907_v44 = vpop.f32.mrf.mxu2  ;;  %v980_v45 = vpop.f32.mrf.mxu3 }
 0x11d   : > { %v1176_v46 = vadd.f32 %v1168_v12, %v1160_v43  ;;  %v908_v47 = vadd.f32 %v907_v44, %v2135_v21 }
 0x11f   : > { %1184 = vst [vmem:[#allocation2 + $0x40] sm:$0xff] %v1176_v46  ;;  %v999_v48 = vadd.f32 %v980_v45, %v908_v47 }
 0x120   : > { %v1064_v49 = vpop.f32.mrf.mxu0  ;;  %v1145_v50 = vpop.f32.mrf.mxu1 }
 0x121   : > { %v1080_v52 = vadd.f32 %v1061_v40, %v999_v48  ;;  %v1174_v40 = vld [vmem:[#allocation2 + $0x78] sm:$0xff]  ;;  %v1175_v48 = vld [vmem:[#allocation2 + $0x28] sm:$0xff] }
 0x123   : > { %v1161_v54 = vadd.f32 %v1142_v42, %v1080_v52 }
 0x124   : > { %v910_v55 = vpop.f32.mrf.mxu2  ;;  %v983_v14 = vpop.f32.mrf.mxu3 }
 0x125   : > { %v1177_v56 = vadd.f32 %v1169_v53, %v1161_v54  ;;  %v911_v57 = vadd.f32 %v910_v55, %v2137_v31 }
 0x127   : > { %1185 = vst [vmem:[#allocation2 + $0x20] sm:$0xff] %v1177_v56  ;;  %v1000_v58 = vadd.f32 %v983_v14, %v911_v57 }
 0x128   : > { %v1066_v61 = vpop.f32.mrf.mxu0  ;;  %v1147_v2 = vpop.f32.mrf.mxu1 }
 0x129   : > { %v1081_v62 = vadd.f32 %v1064_v49, %v1000_v58 }
 0x12b   : > { %v1162_v4 = vadd.f32 %v1145_v50, %v1081_v62 }
 0x12c   : > { %v912_v21 = vpop.f32.mrf.mxu2  ;;  %v985_v5 = vpop.f32.mrf.mxu3 }
 0x12d   : > { %v1178_v6 = vadd.f32 %v1170_v3, %v1162_v4  ;;  %v913_v9 = vadd.f32 %v912_v21, %v2139_v41 }
 0x12f   : > { %1186 = vst [vmem:[#allocation2 + $0x10] sm:$0xff] %v1178_v6  ;;  %v1001_v10 = vadd.f32 %v985_v5, %v913_v9 }
 0x130   : > { %v1069_v60 = vpop.f32.mrf.mxu0  ;;  %v1150_v17 = vpop.f32.mrf.mxu1 }
 0x131   : > { %v1082_v59 = vadd.f32 %v1066_v61, %v1001_v10 }
 0x133   : > { %v1163_v16 = vadd.f32 %v1147_v2, %v1082_v59 }
 0x134   : > { %v915_v31 = vpop.f32.mrf.mxu2  ;;  %v988_v18 = vpop.f32.mrf.mxu3 }
 0x135   : > { %v1179_v19 = vadd.f32 %v1171_v15, %v1163_v16  ;;  %v916_v20 = vadd.f32 %v915_v31, %v2141_v51 }
 0x137   : > { %1187 = vst [vmem:[#allocation2 + $0x38] sm:$0xff] %v1179_v19  ;;  %v1002_v22 = vadd.f32 %v988_v18, %v916_v20 }
 0x138   : > { %v1071_v25 = vpop.f32.mrf.mxu0  ;;  %v1152_v29 = vpop.f32.mrf.mxu1 }
 0x139   : > { %v1083_v63 = vadd.f32 %v1069_v60, %v1002_v22 }
 0x13b   : > { %v1164_v24 = vadd.f32 %v1150_v17, %v1083_v63 }
 0x13c   : > { %v917_v26 = vpop.f32.mrf.mxu2  ;;  %v990_v41 = vpop.f32.mrf.mxu3 }
 0x13d   : > { %v1180_v27 = vadd.f32 %v1172_v0, %v1164_v24  ;;  %v918_v28 = vadd.f32 %v917_v26, %v2145_v1 }
 0x13f   : > { %1188 = vst [vmem:[#allocation2 + $0x60] sm:$0xff] %v1180_v27  ;;  %v1003_v30 = vadd.f32 %v990_v41, %v918_v28 }
 0x140   : > { %v1074_v36 = vpop.f32.mrf.mxu0  ;;  %v1155_v38 = vpop.f32.mrf.mxu1 }
 0x141   : > { %v1084_v7 = vadd.f32 %v1071_v25, %v1003_v30 }
 0x143   : > { %v1165_v32 = vadd.f32 %v1152_v29, %v1084_v7 }
 0x144   : > { %v920_v33 = vpop.f32.mrf.mxu2  ;;  %v993_v34 = vpop.f32.mrf.mxu3 }
 0x145   : > { %v1181_v51 = vadd.f32 %v1173_v8, %v1165_v32  ;;  %v921_v35 = vadd.f32 %v920_v33, %v2149_v13 }
 0x147   : > { %1189 = vst [vmem:[#allocation2 + $0x70] sm:$0xff] %v1181_v51  ;;  %v1004_v37 = vadd.f32 %v993_v34, %v921_v35 }
 0x148   : > { %v1076_v45 = vpop.f32.mrf.mxu0  ;;  %v1157_v47 = vpop.f32.mrf.mxu1 }
 0x149   : > { %v1085_v39 = vadd.f32 %v1074_v36, %v1004_v37 }
 0x14b   : > { %v1166_v42 = vadd.f32 %v1155_v38, %v1085_v39 }
 0x14c   : > { %v922_v11 = vpop.f32.mrf.mxu2  ;;  %v995_v43 = vpop.f32.mrf.mxu3 }
 0x14d   : > { %v1182_v1 = vadd.f32 %v1174_v40, %v1166_v42  ;;  %v923_v12 = vadd.f32 %v922_v11, %v2153_v23 }
 0x14f   : > { %1190 = vst [vmem:[#allocation2 + $0x78] sm:$0xff] %v1182_v1  ;;  %v1005_v44 = vadd.f32 %v995_v43, %v923_v12 }
 0x151   : > { %v1086_v46 = vadd.f32 %v1076_v45, %v1005_v44 }
 0x153   : > { %v1167_v49 = vadd.f32 %v1157_v47, %v1086_v46  ;;  %1195 = sbr.rel (%p1739_p10) target bundleno = 390 (0x186), region = 40 }
 0x155   : > { %v1183_v13 = vadd.f32 %v1175_v48, %v1167_v49 }
 0x157   : > { %1191 = vst [vmem:[#allocation2 + $0x28] sm:$0xff] %v1183_v13 }
 0x158   : > { %v1196_v50 = vld [vmem:[#allocation2 + $0x30] sm:$0xff]  ;;  %v1197_v52 = vld [vmem:[#allocation2] sm:$0xff]  ;;  %v1198_v53 = vld [vmem:[#allocation2 + $0x58] sm:$0xff] }
 0x159   : > { %v1785_v54 = vpack.c.bf16 %v1197_v52, %v1196_v50  ;;  %v1244_v55 = vadd.f32 %v1197_v52, %v1196_v50  ;;  %v1265_v23 = vmul.f32 %v1196_v50, %v1196_v50  ;;  %v1266_v14 = vmul.f32 %v1197_v52, %v1197_v52  ;;  %v1199_v56 = vld [vmem:[#allocation2 + $0x18] sm:$0xff]  ;;  %v1200_v57 = vld [vmem:[#allocation2 + $0x50] sm:$0xff]  ;;  %v1201_v58 = vld [vmem:[#allocation2 + $0x68] sm:$0xff] }
 0x15a   : > { %v1790_v61 = vpack.c.bf16 %v1199_v56, %v1198_v53  ;;  %v1267_v62 = vmul.f32 %v1198_v53, %v1198_v53  ;;  %v1795_v2 = vpack.c.bf16 %v1201_v58, %v1200_v57  ;;  %v1202_v3 = vld [vmem:[#allocation2 + $0x8] sm:$0xff]  ;;  %v1268_v5 = vmul.f32 %v1199_v56, %v1199_v56  ;;  %v1204_v9 = vld [vmem:[#allocation2 + $0x40] sm:$0xff]  ;;  %v1206_v15 = vld [vmem:[#allocation2 + $0x10] sm:$0xff] }
 0x15b   : > { %1786 = vst [vmem:[%s2004_s28] sm:$0xff] %v1785_v54   ;;  %v1281_v4 = vadd.f32 %v1266_v14, %v1265_v23  ;;  %v1245_v21 = vadd.f32 %v1244_v55, %v1198_v53  ;;  %v1203_v6 = vld [vmem:[#allocation2 + $0x48] sm:$0xff]  ;;  %v1205_v10 = vld [vmem:[#allocation2 + $0x20] sm:$0xff]  ;;  %v1269_v31 = vmul.f32 %v1200_v57, %v1200_v57  ;;  %v1207_v18 = vld [vmem:[#allocation2 + $0x38] sm:$0xff]  ;;  %v1270_v25 = vmul.f32 %v1201_v58, %v1201_v58 }
 0x15c   : > { %1822 = vst [vmem:[%s2004_s28 + $0x8] sm:$0xff] %v1790_v61   ;;  %v1800_v59 = vpack.c.bf16 %v1203_v6, %v1202_v3  ;;  %v1805_v60 = vpack.c.bf16 %v1205_v10, %v1204_v9  ;;  %v1208_v19 = vld [vmem:[#allocation2 + $0x60] sm:$0xff]  ;;  %v1209_v20 = vld [vmem:[#allocation2 + $0x70] sm:$0xff]  ;;  %v1810_v22 = vpack.c.bf16 %v1207_v18, %v1206_v15  ;;  %v1210_v26 = vld [vmem:[#allocation2 + $0x78] sm:$0xff]  ;;  %v1271_v30 = vmul.f32 %v1202_v3, %v1202_v3 }
 0x15d   : > { %v1246_v16 = vadd.f32 %v1245_v21, %v1199_v56  ;;  %v1282_v17 = vadd.f32 %v1281_v4, %v1267_v62  ;;  %1823 = vst [vmem:[%s2004_s28 + $0x10] sm:$0xff] %v1795_v2   ;;  %v1815_v63 = vpack.c.bf16 %v1209_v20, %v1208_v19  ;;  %v1272_v32 = vmul.f32 %v1203_v6, %v1203_v6 }
 0x15e   : > { %1824 = vst [vmem:[%s2004_s28 + $0x18] sm:$0xff] %v1800_v59   ;;  %v1211_v41 = vld [vmem:[#allocation2 + $0x28] sm:$0xff]  ;;  %v1273_v51 = vmul.f32 %v1204_v9, %v1204_v9  ;;  %v1274_v37 = vmul.f32 %v1205_v10, %v1205_v10  ;;  %v1275_v40 = vmul.f32 %v1206_v15, %v1206_v15  ;;  %v1276_v1 = vmul.f32 %v1207_v18, %v1207_v18 }
 0x15f   : > { %v1283_v0 = vadd.f32 %v1282_v17, %v1268_v5  ;;  %v1247_v24 = vadd.f32 %v1246_v16, %v1200_v57  ;;  %1825 = vst [vmem:[%s2004_s28 + $0x20] sm:$0xff] %v1805_v60   ;;  %v1820_v27 = vpack.c.bf16 %v1211_v41, %v1210_v26  ;;  %v1277_v44 = vmul.f32 %v1208_v19, %v1208_v19 }
 0x160   : > { %1826 = vst [vmem:[%s2004_s28 + $0x28] sm:$0xff] %v1810_v22   ;;  %v1278_v47 = vmul.f32 %v1209_v20, %v1209_v20  ;;  %v1279_v13 = vmul.f32 %v1210_v26, %v1210_v26  ;;  %v1280_v53 = vmul.f32 %v1211_v41, %v1211_v41 }
 0x161   : > { %v1248_v28 = vadd.f32 %v1247_v24, %v1201_v58  ;;  %v1284_v29 = vadd.f32 %v1283_v0, %v1269_v31  ;;  %1827 = vst [vmem:[%s2004_s28 + $0x30] sm:$0xff] %v1815_v63  }
 0x162   : > { %1828 = vst [vmem:[%s2004_s28 + $0x38] sm:$0xff] %v1820_v27  }
 0x163   : > { %v1285_v7 = vadd.f32 %v1284_v29, %v1270_v25  ;;  %v1249_v8 = vadd.f32 %v1248_v28, %v1202_v3 }
 0x165   : > { %v1250_v33 = vadd.f32 %v1249_v8, %v1203_v6  ;;  %v1286_v34 = vadd.f32 %v1285_v7, %v1271_v30 }
 0x167   : > { %v1287_v35 = vadd.f32 %v1286_v34, %v1272_v32  ;;  %v1251_v36 = vadd.f32 %v1250_v33, %v1204_v9 }
 0x169   : > { %v1252_v38 = vadd.f32 %v1251_v36, %v1205_v10  ;;  %v1288_v39 = vadd.f32 %v1287_v35, %v1273_v51 }
 0x16b   : > { %v1289_v42 = vadd.f32 %v1288_v39, %v1274_v37  ;;  %v1253_v11 = vadd.f32 %v1252_v38, %v1206_v15 }
 0x16d   : > { %v1254_v12 = vadd.f32 %v1253_v11, %v1207_v18  ;;  %v1290_v43 = vadd.f32 %v1289_v42, %v1275_v40 }
 0x16f   : > { %v1291_v45 = vadd.f32 %v1290_v43, %v1276_v1  ;;  %v1255_v46 = vadd.f32 %v1254_v12, %v1208_v19 }
 0x171   : > { %v1256_v48 = vadd.f32 %v1255_v46, %v1209_v20  ;;  %v1292_v49 = vadd.f32 %v1291_v45, %v1277_v44 }
 0x173   : > { %v1293_v50 = vadd.f32 %v1292_v49, %v1278_v47  ;;  %v1257_v52 = vadd.f32 %v1256_v48, %v1210_v26 }
 0x175   : > { %v1258_v54 = vadd.f32 %v1257_v52, %v1211_v41  ;;  %v1294_v55 = vadd.f32 %v1293_v50, %v1279_v13 }
 0x177   : > { %v1259_v23 = vrot.slane %v1258_v54, 4  ;;  %v1295_v14 = vadd.f32 %v1294_v55, %v1280_v53 }
 0x179   : > { %v1260_v56 = vadd.f32 %v1259_v23, %v1258_v54  ;;  %v1296_v57 = vrot.slane %v1295_v14, 4 }
 0x17b   : > { %v1261_v58 = vrot.slane %v1260_v56, 2  ;;  %v1297_v61 = vadd.f32 %v1296_v57, %v1295_v14 }
 0x17d   : > { %v1262_v62 = vadd.f32 %v1261_v58, %v1260_v56  ;;  %v1298_v2 = vrot.slane %v1297_v61, 2 }
 0x17f   : > { %v1263_v3 = vrot.slane %v1262_v62, 1  ;;  %v1299_v4 = vadd.f32 %v1298_v2, %v1297_v61 }
 0x181   : > { %v1264_v21 = vadd.f32 %v1263_v3, %v1262_v62  ;;  %v1300_v5 = vrot.slane %v1299_v4, 1 }
 0x183   : > { %1302 = vst [vmem:[%s2009_s8] sm:$0xff] %v1264_v21  ;;  %v1301_v6 = vadd.f32 %v1300_v5, %v1299_v4 }
 0x185   : > { %1303 = vst [vmem:[%s2014_s12] sm:$0xff] %v1301_v6 }
 0x186 PF: > { %s16_s22 = sadd.s32 1, %s1913_s22   ;;  %s2197_s18 = smov %s1905_s20 }
 0x187   : > { %p13_p11 = scmp.ge.s32.totalorder %s16_s22, 12   ;;  %s2198_s19 = smov %s1909_s21 }
 0x188   : > { %s2199_s20 = smov %s2202_s23  ;;  %s2200_s21 = smov %s2206_s24 }
 0x189   :  { %15 = sbr.rel (!%p13_p11) target bundleno = 3 (0x3), region = 106 }

// kernel: discriminator_forward.12
= control target key start
LH: loop header
LB: loop body
LE: loop exit
PB: predicated region body
PF: predicated region fallthrough
CT: control target
= control target key end

     0   :  { %s343_s12 = smov 0   ;;  %s366_s0 = inlined_call_operand.vmem [shape: bf16[64,128], index: 0, kind: input, shape index: {}]   ;;  %s367_s1 = inlined_call_operand.vmem [shape: f32[1,128], index: 1, kind: input, shape index: {}]   ;;  %s368_s2 = inlined_call_operand.vmem [shape: f32[1,128], index: 2, kind: input, shape index: {}]   ;;  %s369_s3 = inlined_call_operand.vmem [shape: bf16[64,128], index: 3, kind: output, shape index: {}]  }
   0x1 LB: > { %s274_s13 = sadd.s32 4294967295, %s321_s12   ;;  %p278_p0 = scmp.ge.s32.totalorder %s321_s12, 1  ;;  %s321_s12 = sphi %s343_s12, %s13_s12  }
   0x2   : > { %p138_p1 = scmp.lt.s32.totalorder %s321_s12, 3 }
   0x4   : > { %p139_p2 = pnand %p278_p0, %p138_p1 }
   0x5   : > { %s279_s14 = sshll.u32 (!%p139_p2), %s274_s13, 2 }
   0x6   : > { %142 = sbr.rel (%p139_p2) target bundleno = 28 (0x1c), region = 32  ;;  %p163_p3 = scmp.lt.s32.totalorder (!%p139_p2), %s279_s14, 7 }
   0xb   : > { %s371_s14 = smov (!%p163_p3, %s279_s14), 7  ;;  %v313_v0 = vld [vmem:[%s367_s1] ss:$0 sm:$0xff] }
   0xc   : > { %s280_s15 = sshll.u32 %s371_s14, 2  ;;  %v314_v7 = vld [vmem:[%s368_s2] ss:$0 sm:$0xff] }
   0xd   : > { %s166_s18 = scalar_lea.vmem %s366_s0, %s280_s15  ;;  %s172_s25 = scalar_lea.vmem %s369_s3, %s280_s15 }
   0xe   : > { %v286_v1 = vld [vmem:[%s166_s18] sm:$0xff]   ;;  %v303_v2 = vld [vmem:[%s166_s18 + $0x8] sm:$0xff]  }
   0xf   : > { %v287_v3 = vunpack.c.l.bf16 %v286_v1  ;;  %v288_v4 = vunpack.c.h.bf16 %v286_v1  ;;  %v291_v5 = vunpack.c.l.bf16 %v303_v2  ;;  %v292_v6 = vunpack.c.h.bf16 %v303_v2 }
  0x11   : > { %v186_v8 = vmul.f32 %v313_v0, %v287_v3  ;;  %v187_v9 = vmul.f32 %v313_v0, %v288_v4  ;;  %v188_v10 = vmul.f32 %v313_v0, %v291_v5  ;;  %v189_v11 = vmul.f32 %v313_v0, %v292_v6 }
  0x13   : > { %v194_v12 = vadd.f32 %v314_v7, %v186_v8  ;;  %v195_v13 = vadd.f32 %v314_v7, %v187_v9  ;;  %v196_v14 = vadd.f32 %v314_v7, %v188_v10  ;;  %v197_v15 = vadd.f32 %v314_v7, %v189_v11 }
  0x15   : > { %vm198_vm0 = vcmp.ge.f32.partialorder %v194_v12, 0.0  ;;  %vm199_vm1 = vcmp.ge.f32.partialorder %v195_v13, 0.0  ;;  %v202_v16 = vmul.f32 0.2, %v194_v12  ;;  %v203_v17 = vmul.f32 0.2, %v195_v13 }
  0x16   : > { %vm200_vm2 = vcmp.ge.f32.partialorder %v196_v14, 0.0  ;;  %vm201_vm3 = vcmp.ge.f32.partialorder %v197_v15, 0.0  ;;  %v204_v18 = vmul.f32 0.2, %v196_v14  ;;  %v205_v19 = vmul.f32 0.2, %v197_v15 }
  0x17   : > { %v206_v20 = vsel %vm198_vm0, %v194_v12, %v202_v16  ;;  %v207_v21 = vsel %vm199_vm1, %v195_v13, %v203_v17 }
  0x18   : > { %v296_v22 = vpack.c.bf16 %v207_v21, %v206_v20  ;;  %v208_v23 = vsel %vm200_vm2, %v196_v14, %v204_v18  ;;  %v209_v24 = vsel %vm201_vm3, %v197_v15, %v205_v19 }
  0x19   : > { %v301_v25 = vpack.c.bf16 %v209_v24, %v208_v23 }
  0x1a   : > { %297 = vst [vmem:[%s172_s25] sm:$0xff] %v296_v22  }
  0x1b   : > { %304 = vst [vmem:[%s172_s25 + $0x8] sm:$0xff] %v301_v25  }
  0x1c PF: > { %s13_s12 = sadd.s32 1, %s321_s12  }
  0x1d   : > { %p10_p4 = scmp.ge.s32.totalorder %s13_s12, 4  }
  0x1f   :  { %12 = sbr.rel (!%p10_p4) target bundleno = 1 (0x1), region = 62 }

// kernel: discriminator_forward.11
= control target key start
LH: loop header
LB: loop body
LE: loop exit
PB: predicated region body
PF: predicated region fallthrough
CT: control target
= control target key end

     0   :  { %s1106_s18 = smov 0   ;;  %s1108_s19 = smov 0   ;;  %s1249_s0 = inlined_call_operand.vmem [shape: bf16[5,4,24,8], index: 0, kind: input, shape index: {}]   ;;  %s1250_s1 = inlined_call_operand.vmem [shape: bf16[5,4,24,8], index: 1, kind: input, shape index: {}]   ;;  %s1251_s2 = inlined_call_operand.vmem [shape: bf16[5,5,8,128], index: 2, kind: input, shape index: {}]   ;;  %s1252_s3 = inlined_call_operand.vmem [shape: bf16[64,128], index: 3, kind: output, shape index: {0}]   ;;  %s1253_s4 = inlined_call_operand.vmem [shape: f32[2,8,128], index: 4, kind: output, shape index: {1}]   ;;  %s1254_s5 = inlined_call_operand.vmem [shape: f32[2,8,128], index: 5, kind: output, shape index: {2}]  }
   0x1   :  { %s1110_s20 = smov 0   ;;  %s1112_s21 = smov 0  }
   0x2   :  { %s1114_s22 = smov 0  }
   0x3 LB: > { %s25_s23 = sadd.s32 1, %s1065_s20  ;;  %s28_s24 = sadd.s32 1, %s1069_s21  ;;  %s1073_s22 = sphi %s1114_s22, %s16_s22   ;;  %s1069_s21 = sphi %s1112_s21, %s1258_s21   ;;  %s1065_s20 = sphi %s1110_s20, %s1257_s20   ;;  %s1061_s19 = sphi %s1108_s19, %s1256_s19   ;;  %s1057_s18 = sphi %s1106_s18, %s1255_s18  }
   0x4   : > { %p26_p0 = scmp.ge.s32.totalorder %s25_s23, 5  ;;  %p897_p1 = scmp.ge.s32.totalorder %s1073_s22, 1 }
   0x5   : > { %p240_p2 = scmp.lt.s32.totalorder %s1073_s22, 11 }
   0x6   : > { %s1260_s23 = smov (%p26_p0, %s25_s23), 0  ;;  %s1262_s24 = smov (!%p26_p0, %s28_s24), %s1069_s21 }
   0x7   : > { %p241_p3 = pnand %p897_p1, %p240_p2  ;;  %p30_p4 = scmp.ge.s32.totalorder %s1262_s24, 2 }
   0x8   : > { %s898_s25 = sshll.u32 (!%p241_p3), %s1061_s19, 1  ;;  %p297_p5 = scmp.lt.s32.totalorder (!%p241_p3), %s1057_s18, 4 }
   0x9   : > { %s1264_s24 = smov (%p30_p4, %s1262_s24), 0  ;;  %244 = sbr.rel (%p241_p3) target bundleno = 235 (0xeb), region = 32 }
   0xa   : > { %p299_p6 = scmp.lt.s32.totalorder (!%p241_p3), %s898_s25, 3  ;;  %s903_s26 = sshll.u32 (!%p241_p3), %s1061_s19, 2 }
   0xb   : > { %p324_p7 = scmp.lt.s32.totalorder (!%p241_p3), %s903_s26, 7  ;;  %p329_p8 = scmp.lt.s32.totalorder (!%p241_p3), %s1061_s19, 1 }
   0xc   : > { %p907_p9 = scmp.ne.s32.totalorder (!%p241_p3), %s1057_s18, 0 }
   0xe   : > { %s298_s27 = scalar_select %p297_p5, %s1057_s18, 4 }
   0xf   : > { %s1266_s25 = smov (!%p299_p6, %s898_s25), 3  ;;  %s1268_s26 = smov (!%p324_p7, %s903_s26), 7 }
  0x10   : > { %s982_s28 = smul.u32 12, %s298_s27  ;;  %s1270_s19 = smov (!%p329_p8, %s1061_s19), 1 }
  0x11   : > { %s981_s29 = smul.u32 3, %s1266_s25  ;;  %s904_s17 = sshll.u32 %s1268_s26, 2 }
  0x12   : > { %s983_s30 = smul.u32 20, %s298_s27 }
  0x13   : > { %s303_s6 = sadd.s32 %s982_s28, %s981_s29  ;;  %s1164_s28 = scalar_lea.vmem %s1252_s3, %s904_s17 }
  0x14   : > { %s899_s7 = sshll.u32 %s303_s6, 2  ;;  %s1148_s10 = scalar_lea.vmem %s1251_s2, %s983_s30 }
  0x15   : > { %s1153_s13 = scalar_lea.vmem %s1249_s0, %s899_s7  ;;  %s1158_s16 = scalar_lea.vmem %s1250_s1, %s899_s7 }
  0x16   : > { %s905_s29 = sshll.u32 %s1270_s19, 3  ;;  %341 = sbr.rel (%p907_p9) target bundleno = 32 (0x20), region = 36 }
  0x17   : > { %s1169_s8 = scalar_lea.vmem %s1253_s4, %s905_s29  ;;  %s1174_s12 = scalar_lea.vmem %s1254_s5, %s905_s29 }
  0x1b   : > { %v1075_v0 = vmov 0.0  }
  0x1c   : > { %342 = vst [vmem:[#allocation2 + $0x10] sm:$0xff] %v1075_v0 }
  0x1d   : > { %343 = vst [vmem:[#allocation2] sm:$0xff] %v1075_v0 }
  0x1e   : > { %344 = vst [vmem:[#allocation2 + $0x18] sm:$0xff] %v1075_v0 }
  0x1f   : > { %345 = vst [vmem:[#allocation2 + $0x8] sm:$0xff] %v1075_v0 }
  0x20 PF: > { %v908_v1 = vld [vmem:[%s1148_s10 + $0x4] sm:$0xf]  ;;  %vm362_vm0 = vcmask 1043456   ;;  %v348_v2 = vld [vmem:[%s1148_s10] sm:$0xf]  ;;  %vm358_vm1 = vcmask 64512  }
  0x21   : > { %v965_v3 = vld [vmem:[%s1158_s16] sm:$0xff]  ;;  %v364_v4 = vsel %vm362_vm0, %v908_v1, 0  ;;  %v389_v5 = vsel %vm362_vm0, %v348_v2, 0  ;;  %v919_v7 = vld [vmem:[%s1148_s10 + $0x8] sm:$0xf]  ;;  %vm418_vm2 = vcmask 1045504  }
  0x22   : > { %v964_v6 = vld [vmem:[%s1153_s13] sm:$0xff]  ;;  %373 = vmatpush.bf16.msra.mxu0 %v364_v4  ;;  %398 = vmatpush.bf16.msra.mxu1 %v389_v5  ;;  %v426_v8 = vsel %vm362_vm0, %v919_v7, 0  ;;  %v921_v9 = vld [vmem:[%s1148_s10 + $0xc] sm:$0xf]  ;;  %v927_v10 = vld [vmem:[%s1148_s10 + $0x10] sm:$0xf] }
  0x23   : > { %v406_v11 = vld [vmem:[%s1153_s13 + $0x4] sm:$0xff]   ;;  %435 = vmatpush.bf16.msra.mxu2 %v426_v8  ;;  %v464_v13 = vsel %vm362_vm0, %v921_v9, 0  ;;  %v492_v14 = vsel %vm362_vm0, %v927_v10, 0  ;;  %v1047_v16 = vld [vmem:[%s1153_s13] sm:$0xc]  ;;  %v945_v42 = vld [vmem:[%s1153_s13 + $0x10] sm:$0xff]  }
  0x24   : > { %v1053_v12 = vld [vmem:[%s1153_s13] sm:$0xf0]   ;;  %473 = vmatpush.bf16.msra.mxu3 %v464_v13  ;;  %v407_v18 = vld [vmem:[%s1153_s13 + $0x8] sm:$0x3]  ;;  %v924_v19 = vld [vmem:[%s1158_s16] sm:$0xc] }
  0x25   : > { %v933_v15 = vld [vmem:[%s1148_s10 + $0x4] sm:$0xf]  ;;  %913 = vmatmul.msk.bf16.vlgmr.msra.gmra.mxu0 %vm358_vm1, %v965_v3  ;;  %918 = vmatmul.msk.bf16.vlgmr.msra.gmra.mxu1 %vm358_vm1, %v964_v6  ;;  %v415_v20 = vunpack.c.l.b16 %v407_v18  ;;  %v446_v22 = vld [vmem:[%s1158_s16 + $0x8] sm:$0x3]  ;;  %v519_v23 = vld [vmem:[%s1148_s10] sm:$0xf]  ;;  %v1048_v24 = vor.u32 %v1053_v12, %v1047_v16 }
  0x26   : > { %501 = vmatpush.bf16.msrb.mxu0 %v492_v14  ;;  %v533_v17 = vsel %vm362_vm0, %v933_v15, 0  ;;  %v966_v21 = vld [vmem:[%s1158_s16] sm:$0xf0]  ;;  %v454_v25 = vunpack.c.l.b16 %v446_v22  ;;  %v558_v27 = vsel %vm362_vm0, %v519_v23, 0  ;;  %v947_v28 = vld [vmem:[%s1148_s10 + $0x8] sm:$0xf] }
  0x27   : > { %542 = vmatpush.bf16.msrb.mxu1 %v533_v17  ;;  %v925_v26 = vor.u32 %v966_v21, %v924_v19  ;;  %v952_v29 = vld [vmem:[%s1148_s10 + $0xc] sm:$0xf]  ;;  %v417_v30 = vpack.c.b16 %v415_v20, %v415_v20  ;;  %567 = vmatpush.bf16.msrb.mxu2 %v558_v27  ;;  %v593_v31 = vsel %vm362_vm0, %v947_v28, 0  ;;  %v959_v33 = vld [vmem:[%s1148_s10 + $0x10] sm:$0xf]  ;;  %v419_v34 = vrot.slane %v1048_v24, 2 }
  0x28   : > { %v630_v32 = vsel %vm362_vm0, %v952_v29, 0  ;;  %v456_v35 = vpack.c.b16 %v454_v25, %v454_v25  ;;  %602 = vmatpush.bf16.msrb.mxu3 %v593_v31  ;;  %v657_v37 = vsel %vm362_vm0, %v959_v33, 0  ;;  %v1051_v41 = vld [vmem:[%s1153_s13 + $0xc] sm:$0xc]  ;;  %v1054_v43 = vld [vmem:[%s1153_s13 + $0xc] sm:$0xf0]  }
  0x29   : > { %v457_v36 = vrot.slane %v925_v26, 2  ;;  %v420_v38 = vrot.slane %v417_v30, 2  ;;  %v946_v44 = vld [vmem:[%s1153_s13 + $0x14] sm:$0x3]  ;;  %v968_v47 = vld [vmem:[%s1158_s16 + $0xc] sm:$0xff]  ;;  %v1052_v48 = vor.u32 %v1054_v43, %v1051_v41  ;;  %v511_v20 = vld [vmem:[#allocation2] sm:$0xff] }
  0x2a   : > { %639 = vmatpush.bf16.msra.mxu0 %v630_v32  ;;  %v458_v39 = vrot.slane %v456_v35, 2  ;;  %v583_v46 = vunpack.c.l.b16 %v946_v44  ;;  %v951_v50 = vld [vmem:[%s1158_s16 + $0x14] sm:$0x3]  ;;  %v955_v54 = vld [vmem:[%s1158_s16 + $0xc] sm:$0xc]  ;;  %v675_v30 = vld [vmem:[#allocation2 + $0x18] sm:$0xff] }
  0x2b   : > { %666 = vmatpush.bf16.msra.mxu1 %v657_v37  ;;  %v421_v40 = vsel %vm418_vm2, %v419_v34, %v420_v38  ;;  %v586_v51 = vrot.slane %v1052_v48, 2  ;;  %v620_v53 = vunpack.c.l.b16 %v951_v50  ;;  %v969_v55 = vld [vmem:[%s1158_s16 + $0xc] sm:$0xf0]  ;;  %p961_p10 = scmp.ne.s32.totalorder %s1057_s18, 4 }
  0x2c   : > { %920 = vmatmul.msk.bf16.vlgmr.msra.gmra.mxu2 %vm358_vm1, %v421_v40  ;;  %v459_v45 = vsel %vm418_vm2, %v457_v36, %v458_v39  ;;  %v585_v49 = vpack.c.b16 %v583_v46, %v583_v46  ;;  %v967_v56 = vld [vmem:[%s1153_s13 + $0xc] sm:$0xff]  ;;  %v956_v58 = vor.u32 %v969_v55, %v955_v54 }
  0x2d   : > { %926 = vmatmul.msk.bf16.vlgmr.msra.gmra.mxu3 %vm358_vm1, %v459_v45  ;;  %v622_v59 = vpack.c.b16 %v620_v53, %v620_v53  ;;  %v510_v10 = vld [vmem:[#allocation2 + $0x10] sm:$0xff]  ;;  %v676_v40 = vld [vmem:[#allocation2 + $0x8] sm:$0xff] }
  0x2e   : > { %v587_v52 = vrot.slane %v585_v49, 2  ;;  %v623_v60 = vrot.slane %v956_v58, 2 }
  0x2f   : > { %v624_v61 = vrot.slane %v622_v59, 2 }
  0x30   : > { %v588_v57 = vsel %vm418_vm2, %v586_v51, %v587_v52 }
  0x31   : > { %v625_v62 = vsel %vm418_vm2, %v623_v60, %v624_v61 }
  0x35   : > { %928 = vmatmul.msk.bf16.vlgmr.msrb.gmra.mxu0 %vm358_vm1, %v406_v11  ;;  %938 = vmatmul.msk.bf16.vlgmr.msrb.gmra.mxu1 %vm358_vm1, %v968_v47 }
  0x3c   : > { %943 = vmatmul.msk.bf16.vlgmr.msrb.gmra.mxu2 %vm358_vm1, %v967_v56 }
  0x3d   : > { %948 = vmatmul.msk.bf16.vlgmr.msrb.gmra.mxu3 %vm358_vm1, %v588_v57 }
  0x45   : > { %957 = vmatmul.msk.bf16.vlgmr.msra.gmra.mxu0 %vm358_vm1, %v625_v62  ;;  %960 = vmatmul.msk.bf16.vlgmr.msra.gmra.mxu1 %vm358_vm1, %v945_v42 }
  0xa2   : > { %v375_v63 = vpop.f32.mrf.mxu0  ;;  %v400_v0 = vpop.f32.mrf.mxu1 }
  0xa3   : > { %v401_v3 = vadd.f32 %v400_v0, %v375_v63 }
  0xaa   : > { %v377_v1 = vpop.f32.mrf.mxu0  ;;  %v402_v2 = vpop.f32.mrf.mxu1 }
  0xab   : > { %v403_v12 = vadd.f32 %v402_v2, %v377_v1 }
  0xaf   : > { %v437_v4 = vpop.f32.mrf.mxu2 }
  0xb0   : > { %v442_v5 = vadd.f32 %v437_v4, %v401_v3  ;;  %v475_v6 = vpop.f32.mrf.mxu3 }
  0xb2   : > { %v480_v7 = vadd.f32 %v475_v6, %v442_v5  ;;  %v503_v8 = vpop.f32.mrf.mxu0  ;;  %v544_v9 = vpop.f32.mrf.mxu1 }
  0xb4   : > { %v508_v11 = vadd.f32 %v503_v8, %v480_v7 }
  0xb6   : > { %v512_v13 = vadd.f32 %v510_v10, %v508_v11 }
  0xb7   : > { %v439_v14 = vpop.f32.mrf.mxu2 }
  0xb8   : > { %514 = vst [vmem:[#allocation2 + $0x10] sm:$0xff] %v512_v13  ;;  %v443_v15 = vadd.f32 %v439_v14, %v403_v12  ;;  %v477_v16 = vpop.f32.mrf.mxu3 }
  0xba   : > { %v481_v17 = vadd.f32 %v477_v16, %v443_v15  ;;  %v505_v18 = vpop.f32.mrf.mxu0  ;;  %v546_v19 = vpop.f32.mrf.mxu1 }
  0xbc   : > { %v509_v21 = vadd.f32 %v505_v18, %v481_v17 }
  0xbe   : > { %v513_v22 = vadd.f32 %v511_v20, %v509_v21 }
  0xbf   : > { %v569_v23 = vpop.f32.mrf.mxu2 }
  0xc0   : > { %515 = vst [vmem:[#allocation2] sm:$0xff] %v513_v22  ;;  %v570_v24 = vadd.f32 %v569_v23, %v544_v9  ;;  %v604_v25 = vpop.f32.mrf.mxu3 }
  0xc2   : > { %v609_v26 = vadd.f32 %v604_v25, %v570_v24  ;;  %v641_v27 = vpop.f32.mrf.mxu0  ;;  %v668_v28 = vpop.f32.mrf.mxu1 }
  0xc4   : > { %v646_v29 = vadd.f32 %v641_v27, %v609_v26 }
  0xc6   : > { %v673_v31 = vadd.f32 %v668_v28, %v646_v29 }
  0xc7   : > { %v571_v32 = vpop.f32.mrf.mxu2 }
  0xc8   : > { %v677_v33 = vadd.f32 %v675_v30, %v673_v31  ;;  %v572_v34 = vadd.f32 %v571_v32, %v546_v19  ;;  %v606_v35 = vpop.f32.mrf.mxu3 }
  0xca   : > { %679 = vst [vmem:[#allocation2 + $0x18] sm:$0xff] %v677_v33  ;;  %v610_v36 = vadd.f32 %v606_v35, %v572_v34  ;;  %v643_v37 = vpop.f32.mrf.mxu0  ;;  %v670_v39 = vpop.f32.mrf.mxu1 }
  0xcc   : > { %v647_v38 = vadd.f32 %v643_v37, %v610_v36 }
  0xce   : > { %v674_v41 = vadd.f32 %v670_v39, %v647_v38  ;;  %684 = sbr.rel (%p961_p10) target bundleno = 235 (0xeb), region = 40 }
  0xd0   : > { %v678_v42 = vadd.f32 %v676_v40, %v674_v41 }
  0xd2   : > { %680 = vst [vmem:[#allocation2 + $0x8] sm:$0xff] %v678_v42 }
  0xd3   : > { %v685_v43 = vld [vmem:[#allocation2 + $0x10] sm:$0xff]  ;;  %v686_v44 = vld [vmem:[#allocation2] sm:$0xff]  ;;  %v687_v45 = vld [vmem:[#allocation2 + $0x18] sm:$0xff] }
  0xd4   : > { %v973_v46 = vpack.c.bf16 %v686_v44, %v685_v43  ;;  %v697_v47 = vadd.f32 %v686_v44, %v685_v43  ;;  %v706_v48 = vmul.f32 %v685_v43, %v685_v43  ;;  %v707_v49 = vmul.f32 %v686_v44, %v686_v44 }
  0xd5   : > { %v708_v52 = vmul.f32 %v687_v45, %v687_v45 }
  0xd6   : > { %974 = vst [vmem:[%s1164_s28] sm:$0xff] %v973_v46   ;;  %v710_v53 = vadd.f32 %v707_v49, %v706_v48  ;;  %v698_v54 = vadd.f32 %v697_v47, %v687_v45 }
  0xd8   : > { %v711_v57 = vadd.f32 %v710_v53, %v708_v52 }
  0xd9   : > { %v688_v50 = vld [vmem:[#allocation2 + $0x8] sm:$0xff] }
  0xda   : > { %v978_v51 = vpack.c.bf16 %v688_v50, %v687_v45  ;;  %v709_v55 = vmul.f32 %v688_v50, %v688_v50  ;;  %v699_v56 = vadd.f32 %v698_v54, %v688_v50 }
  0xdc   : > { %980 = vst [vmem:[%s1164_s28 + $0x8] sm:$0xff] %v978_v51   ;;  %v700_v58 = vrot.slane %v699_v56, 4  ;;  %v712_v59 = vadd.f32 %v711_v57, %v709_v55 }
  0xde   : > { %v701_v60 = vadd.f32 %v700_v58, %v699_v56  ;;  %v713_v61 = vrot.slane %v712_v59, 4 }
  0xe0   : > { %v702_v62 = vrot.slane %v701_v60, 2  ;;  %v714_v63 = vadd.f32 %v713_v61, %v712_v59 }
  0xe2   : > { %v703_v0 = vadd.f32 %v702_v62, %v701_v60  ;;  %v715_v1 = vrot.slane %v714_v63, 2 }
  0xe4   : > { %v704_v2 = vrot.slane %v703_v0, 1  ;;  %v716_v3 = vadd.f32 %v715_v1, %v714_v63 }
  0xe6   : > { %v705_v4 = vadd.f32 %v704_v2, %v703_v0  ;;  %v717_v5 = vrot.slane %v716_v3, 1 }
  0xe8   : > { %719 = vst [vmem:[%s1169_s8] sm:$0xff] %v705_v4  ;;  %v718_v6 = vadd.f32 %v717_v5, %v716_v3 }
  0xea   : > { %720 = vst [vmem:[%s1174_s12] sm:$0xff] %v718_v6 }
  0xeb PF: > { %s16_s22 = sadd.s32 1, %s1073_s22   ;;  %s1255_s18 = smov %s1065_s20 }
  0xec   : > { %p13_p11 = scmp.ge.s32.totalorder %s16_s22, 12   ;;  %s1256_s19 = smov %s1069_s21 }
  0xed   : > { %s1257_s20 = smov %s1260_s23  ;;  %s1258_s21 = smov %s1264_s24 }
  0xee   :  { %15 = sbr.rel (!%p13_p11) target bundleno = 3 (0x3), region = 106 }

// kernel: discriminator_forward.14
= control target key start
LH: loop header
LB: loop body
LE: loop exit
PB: predicated region body
PF: predicated region fallthrough
CT: control target
= control target key end

     0   :  { %s87_s0 = inlined_call_operand.vmem [shape: bf16[16,128], index: 0, kind: input, shape index: {}]   ;;  %s88_s1 = inlined_call_operand.vmem [shape: f32[1,128], index: 1, kind: input, shape index: {}]   ;;  %s89_s2 = inlined_call_operand.vmem [shape: f32[1,128], index: 2, kind: input, shape index: {}]   ;;  %s90_s3 = inlined_call_operand.vmem [shape: bf16[16,128], index: 3, kind: output, shape index: {}]  }
   0x1   :  { %v45_v0 = vld [vmem:[%s87_s0] sm:$0xff]  }
   0x2   :  { %v53_v1 = vld [vmem:[%s88_s1] ss:$0 sm:$0xff]  ;;  %v46_v2 = vunpack.c.l.bf16 %v45_v0  ;;  %v47_v3 = vunpack.c.h.bf16 %v45_v0 }
   0x3   :  { %v54_v4 = vld [vmem:[%s89_s2] ss:$0 sm:$0xff] }
   0x4   :  { %v22_v5 = vmul.f32 %v53_v1, %v46_v2  ;;  %v23_v6 = vmul.f32 %v53_v1, %v47_v3 }
   0x6   :  { %v28_v7 = vadd.f32 %v54_v4, %v22_v5  ;;  %v29_v8 = vadd.f32 %v54_v4, %v23_v6 }
   0x8   :  { %vm30_vm0 = vcmp.ge.f32.partialorder %v28_v7, 0.0  ;;  %vm31_vm1 = vcmp.ge.f32.partialorder %v29_v8, 0.0  ;;  %v32_v9 = vmul.f32 0.2, %v28_v7  ;;  %v33_v10 = vmul.f32 0.2, %v29_v8 }
   0xa   :  { %v34_v11 = vsel %vm30_vm0, %v28_v7, %v32_v9  ;;  %v35_v12 = vsel %vm31_vm1, %v29_v8, %v33_v10 }
   0xb   :  { %v51_v13 = vpack.c.bf16 %v35_v12, %v34_v11 }
   0xd   :  { %52 = vst [vmem:[%s90_s3] sm:$0xff] %v51_v13  }

// kernel: discriminator_forward.13
= control target key start
LH: loop header
LB: loop body
LE: loop exit
PB: predicated region body
PF: predicated region fallthrough
CT: control target
= control target key end

     0   :  { %s1375_s18 = smov 0   ;;  %s1377_s19 = smov 0   ;;  %s1492_s0 = inlined_call_operand.vmem [shape: bf16[5,4,8,16], index: 0, kind: input, shape index: {}]   ;;  %s1493_s1 = inlined_call_operand.vmem [shape: bf16[5,4,8,16], index: 1, kind: input, shape index: {}]   ;;  %s1494_s2 = inlined_call_operand.vmem [shape: bf16[5,5,16,128], index: 2, kind: input, shape index: {}]   ;;  %s1495_s3 = inlined_call_operand.vmem [shape: bf16[16,128], index: 3, kind: output, shape index: {0}]   ;;  %s1496_s4 = inlined_call_operand.vmem [shape: f32[1,8,128], index: 4, kind: output, shape index: {1}]   ;;  %s1497_s5 = inlined_call_operand.vmem [shape: f32[1,8,128], index: 5, kind: output, shape index: {2}]  }
   0x1   :  { %s1379_s20 = smov 0  }
   0x2 LB: > { %s25_s21 = sadd.s32 1, %s1338_s19  ;;  %p1106_p0 = scmp.ge.s32.totalorder %s1342_s20, 1  ;;  %s1342_s20 = sphi %s1379_s20, %s16_s20   ;;  %s1338_s19 = sphi %s1377_s19, %s1499_s19   ;;  %s1334_s18 = sphi %s1375_s18, %s1498_s18  }
   0x3   : > { %p26_p1 = scmp.ge.s32.totalorder %s25_s21, 5  ;;  %p238_p2 = scmp.lt.s32.totalorder %s1342_s20, 6 }
   0x5   : > { %s1501_s21 = smov (%p26_p1, %s25_s21), 0  ;;  %p239_p3 = pnand %p1106_p0, %p238_p2 }
   0x6   : > { %p293_p4 = scmp.lt.s32.totalorder (!%p239_p3), %s1334_s18, 4  ;;  %p1112_p5 = scmp.ne.s32.totalorder (!%p239_p3), %s1334_s18, 0 }
   0x7   : > { %242 = sbr.rel (%p239_p3) target bundleno = 258 (0x102), region = 32 }
   0xc   : > { %s294_s22 = scalar_select %p293_p4, %s1334_s18, 4 }
   0xd   : > { %335 = sbr.rel (%p1112_p5) target bundleno = 21 (0x15), region = 36 }
   0xe   : > { %s1267_s23 = sshll.u32 %s294_s22, 4  ;;  %s1294_s24 = smul.u32 40, %s294_s22 }
   0xf   : > { %s1400_s27 = scalar_lea.vmem %s1492_s0, %s1267_s23  ;;  %s1405_s30 = scalar_lea.vmem %s1493_s1, %s1267_s23 }
  0x10   : > { %s1410_s8 = scalar_lea.vmem %s1494_s2, %s1294_s24 }
  0x12   : > { %v1344_v0 = vmov 0.0  }
  0x13   : > { %336 = vst [vmem:[#allocation2] sm:$0xff] %v1344_v0 }
  0x14   : > { %337 = vst [vmem:[#allocation2 + $0x8] sm:$0xff] %v1344_v0 }
  0x15 PF: > { %v1270_v1 = vld [vmem:[%s1410_s8 + $0x8] sm:$0xff]  ;;  %v1269_v2 = vld [vmem:[%s1410_s8] sm:$0xff]  ;;  %v1271_v3 = vld [vmem:[%s1410_s8 + $0x10] sm:$0xff]  ;;  %vm351_vm0 = vcmask 130048   ;;  %p1260_p6 = scmp.ne.s32.totalorder %s1334_s18, 4 }
  0x16   : > { %v1272_v4 = vld [vmem:[%s1410_s8 + $0x18] sm:$0xff]  ;;  %v341_v5 = vld [vmem:[%s1405_s30] sm:$0x3]  ;;  %362 = vmatpush.bf16.msra.mxu0 %v1270_v1  ;;  %384 = vmatpush.bf16.msra.mxu1 %v1269_v2  ;;  %v1276_v12 = vld [vmem:[%s1410_s8 + $0x10] sm:$0xff] }
  0x17   : > { %v338_v6 = vld [vmem:[%s1400_s27] sm:$0x3]  ;;  %414 = vmatpush.bf16.msra.mxu2 %v1271_v3  ;;  %445 = vmatpush.bf16.msra.mxu3 %v1272_v4  ;;  %v1275_v14 = vld [vmem:[%s1410_s8 + $0x8] sm:$0xff]  ;;  %v452_v17 = vld [vmem:[%s1400_s27] sm:$0xc] }
  0x18   : > { %v390_v7 = vld [vmem:[%s1400_s27] sm:$0x6]  ;;  %v1280_v18 = vld [vmem:[%s1410_s8 + $0x8] sm:$0xff]  ;;  %v1277_v20 = vld [vmem:[%s1410_s8 + $0x18] sm:$0xff]  ;;  %v457_v24 = vunpack.c.l.b16 %v452_v17 }
  0x19   : > { %v421_v8 = vld [vmem:[%s1405_s30] sm:$0x6]  ;;  %v395_v10 = vunpack.c.l.b16 %v390_v7  ;;  %1119 = vmatmul.msk.bf16.vlgmr.msra.gmra.mxu0 %vm351_vm0, %v341_v5  ;;  %1124 = vmatmul.msk.bf16.vlgmr.msra.gmra.mxu1 %vm351_vm0, %v338_v6  ;;  %v1160_v25 = vld [vmem:[%s1400_s27 + $0x4] sm:$0x6]  ;;  %v1281_v31 = vld [vmem:[%s1410_s8 + $0x10] sm:$0xff] }
  0x1a   : > { %v1274_v9 = vld [vmem:[%s1410_s8] sm:$0xff]  ;;  %v426_v11 = vunpack.c.l.b16 %v421_v8  ;;  %510 = vmatpush.bf16.msrb.mxu1 %v1275_v14  ;;  %v458_v26 = vpack.c.b16 %v457_v24, %v457_v24  ;;  %v542_v27 = vunpack.c.l.b16 %v1160_v25  ;;  %v1282_v32 = vld [vmem:[%s1410_s8 + $0x18] sm:$0xff]  ;;  %v1285_v38 = vld [vmem:[%s1410_s8 + $0x8] sm:$0xff] }
  0x1b   : > { %v1273_v13 = vld [vmem:[%s1410_s8 + $0x20] sm:$0xff]  ;;  %532 = vmatpush.bf16.msrb.mxu2 %v1274_v9  ;;  %v396_v15 = vpack.c.b16 %v395_v10, %v395_v10  ;;  %561 = vmatpush.bf16.msrb.mxu3 %v1276_v12  ;;  %v1286_v46 = vld [vmem:[%s1410_s8 + $0x10] sm:$0xff]  ;;  %v1185_v47 = vld [vmem:[%s1405_s30 + $0x8] sm:$0x3] }
  0x1c   : > { %v427_v16 = vpack.c.b16 %v426_v11, %v426_v11  ;;  %476 = vmatpush.bf16.msrb.mxu0 %v1273_v13  ;;  %v1279_v19 = vld [vmem:[%s1410_s8] sm:$0xff]  ;;  %v459_v28 = vrot.slane %v458_v26, 2  ;;  %v543_v29 = vpack.c.b16 %v542_v27, %v542_v27  ;;  %v1184_v48 = vld [vmem:[%s1400_s27 + $0x8] sm:$0x3]  ;;  %v1287_v51 = vld [vmem:[%s1410_s8 + $0x18] sm:$0xff] }
  0x1d   : > { %v1278_v21 = vld [vmem:[%s1410_s8 + $0x20] sm:$0xff]  ;;  %v397_v22 = vrot.slane %v396_v15, 1  ;;  %v1198_v49 = vld [vmem:[%s1400_s27 + $0x8] sm:$0x6]  ;;  %v1223_v63 = vld [vmem:[%s1405_s30 + $0xc] sm:$0x3] }
  0x1e   : > { %v428_v23 = vrot.slane %v427_v16, 1  ;;  %621 = vmatpush.bf16.msra.mxu1 %v1278_v21  ;;  %v1147_v30 = vld [vmem:[%s1405_s30 + $0x4] sm:$0x3]  ;;  %v544_v34 = vrot.slane %v543_v29, 1  ;;  %v1176_v36 = vld [vmem:[%s1400_s27 + $0x4] sm:$0xc]  ;;  %v687_v53 = vunpack.c.l.b16 %v1198_v49 }
  0x1f   : > { %1131 = vmatmul.msk.bf16.vlgmr.msra.gmra.mxu2 %vm351_vm0, %v397_v22  ;;  %v1146_v33 = vld [vmem:[%s1400_s27 + $0x4] sm:$0x3]  ;;  %v602_v40 = vunpack.c.l.b16 %v1176_v36  ;;  %v1206_v50 = vld [vmem:[%s1405_s30 + $0x8] sm:$0x6]  ;;  %v1236_v0 = vld [vmem:[%s1400_s27 + $0xc] sm:$0x6] }
  0x20   : > { %591 = vmatpush.bf16.msra.mxu0 %v1277_v20  ;;  %1138 = vmatmul.msk.bf16.vlgmr.msra.gmra.mxu3 %vm351_vm0, %v428_v23  ;;  %v1168_v35 = vld [vmem:[%s1405_s30 + $0x4] sm:$0x6]  ;;  %v717_v54 = vunpack.c.l.b16 %v1206_v50  ;;  %v1214_v55 = vld [vmem:[%s1400_s27 + $0x8] sm:$0xc]  ;;  %v688_v56 = vpack.c.b16 %v687_v53, %v687_v53  ;;  %v832_v1 = vunpack.c.l.b16 %v1236_v0  ;;  %v1244_v2 = vld [vmem:[%s1405_s30 + $0xc] sm:$0x6] }
  0x21   : > { %655 = vmatpush.bf16.msra.mxu2 %v1280_v18  ;;  %677 = vmatpush.bf16.msra.mxu3 %v1279_v19  ;;  %v1283_v37 = vld [vmem:[%s1410_s8 + $0x20] sm:$0xff]  ;;  %v572_v39 = vunpack.c.l.b16 %v1168_v35  ;;  %v603_v42 = vpack.c.b16 %v602_v40, %v602_v40  ;;  %v747_v58 = vunpack.c.l.b16 %v1214_v55  ;;  %v1252_v3 = vld [vmem:[%s1400_s27 + $0xc] sm:$0xc]  ;;  %v862_v5 = vunpack.c.l.b16 %v1244_v2  ;;  %v1222_v10 = vld [vmem:[%s1400_s27 + $0xc] sm:$0x3] }
  0x22   : > { %v1284_v45 = vld [vmem:[%s1410_s8] sm:$0xff]  ;;  %v718_v57 = vpack.c.b16 %v717_v54, %v717_v54  ;;  %v689_v59 = vrot.slane %v688_v56, 1  ;;  %v833_v4 = vpack.c.b16 %v832_v1, %v832_v1  ;;  %v892_v6 = vunpack.c.l.b16 %v1252_v3 }
  0x23   : > { %v573_v41 = vpack.c.b16 %v572_v39, %v572_v39  ;;  %v604_v44 = vrot.slane %v603_v42, 2  ;;  %v1288_v52 = vld [vmem:[%s1410_s8 + $0x20] sm:$0xff]  ;;  %v748_v61 = vpack.c.b16 %v747_v58, %v747_v58  ;;  %v863_v8 = vpack.c.b16 %v862_v5, %v862_v5 }
  0x24   : > { %v719_v60 = vrot.slane %v718_v57, 1  ;;  %v834_v7 = vrot.slane %v833_v4, 1  ;;  %v893_v9 = vpack.c.b16 %v892_v6, %v892_v6  ;;  %v483_v23 = vld [vmem:[#allocation2] sm:$0xf]  ;;  %v628_v40 = vld [vmem:[#allocation2 + $0x4] sm:$0xf] }
  0x25   : > { %v574_v43 = vrot.slane %v573_v41, 1  ;;  %v749_v62 = vrot.slane %v748_v61, 2  ;;  %v864_v11 = vrot.slane %v863_v8, 1  ;;  %v773_v57 = vld [vmem:[#allocation2 + $0x8] sm:$0xf] }
  0x26   : > { %v894_v12 = vrot.slane %v893_v9, 2  ;;  %v918_v8 = vld [vmem:[#allocation2 + $0xc] sm:$0xf] }
  0x29   : > { %1145 = vmatmul.msk.bf16.vlgmr.msrb.gmra.mxu0 %vm351_vm0, %v459_v28  ;;  %1154 = vmatmul.msk.bf16.vlgmr.msrb.gmra.mxu1 %vm351_vm0, %v1147_v30 }
  0x2a   : > { %706 = vmatpush.bf16.msrb.mxu0 %v1281_v31  ;;  %736 = vmatpush.bf16.msrb.mxu1 %v1282_v32 }
  0x2f   : > { %1159 = vmatmul.msk.bf16.vlgmr.msrb.gmra.mxu2 %vm351_vm0, %v1146_v33 }
  0x30   : > { %1167 = vmatmul.msk.bf16.vlgmr.msrb.gmra.mxu3 %vm351_vm0, %v544_v34  ;;  %766 = vmatpush.bf16.msrb.mxu2 %v1283_v37 }
  0x31   : > { %800 = vmatpush.bf16.msrb.mxu3 %v1285_v38 }
  0x39   : > { %1175 = vmatmul.msk.bf16.vlgmr.msra.gmra.mxu0 %vm351_vm0, %v574_v43  ;;  %1183 = vmatmul.msk.bf16.vlgmr.msra.gmra.mxu1 %vm351_vm0, %v604_v44 }
  0x3a   : > { %822 = vmatpush.bf16.msra.mxu0 %v1284_v45  ;;  %851 = vmatpush.bf16.msra.mxu1 %v1286_v46 }
  0x3f   : > { %1192 = vmatmul.msk.bf16.vlgmr.msra.gmra.mxu2 %vm351_vm0, %v1185_v47 }
  0x40   : > { %1197 = vmatmul.msk.bf16.vlgmr.msra.gmra.mxu3 %vm351_vm0, %v1184_v48  ;;  %881 = vmatpush.bf16.msra.mxu2 %v1287_v51 }
  0x41   : > { %911 = vmatpush.bf16.msra.mxu3 %v1288_v52 }
  0x49   : > { %1205 = vmatmul.msk.bf16.vlgmr.msrb.gmra.mxu0 %vm351_vm0, %v689_v59  ;;  %1213 = vmatmul.msk.bf16.vlgmr.msrb.gmra.mxu1 %vm351_vm0, %v719_v60 }
  0x4f   : > { %1221 = vmatmul.msk.bf16.vlgmr.msrb.gmra.mxu2 %vm351_vm0, %v749_v62 }
  0x50   : > { %1230 = vmatmul.msk.bf16.vlgmr.msrb.gmra.mxu3 %vm351_vm0, %v1223_v63 }
  0x59   : > { %1235 = vmatmul.msk.bf16.vlgmr.msra.gmra.mxu0 %vm351_vm0, %v1222_v10  ;;  %1243 = vmatmul.msk.bf16.vlgmr.msra.gmra.mxu1 %vm351_vm0, %v834_v7 }
  0x5f   : > { %1251 = vmatmul.msk.bf16.vlgmr.msra.gmra.mxu2 %vm351_vm0, %v864_v11 }
  0x60   : > { %1259 = vmatmul.msk.bf16.vlgmr.msra.gmra.mxu3 %vm351_vm0, %v894_v12 }
  0x96   : > { %v364_v13 = vpop.f32.mrf.mxu0  ;;  %v386_v14 = vpop.f32.mrf.mxu1 }
  0x97   : > { %v387_v15 = vadd.f32 %v386_v14, %v364_v13 }
  0x9e   : > { %v366_v16 = vpop.f32.mrf.mxu0  ;;  %v388_v17 = vpop.f32.mrf.mxu1 }
  0xa2   : > { %v416_v18 = vpop.f32.mrf.mxu2 }
  0xa3   : > { %v447_v19 = vpop.f32.mrf.mxu3  ;;  %v420_v20 = vadd.f32 %v416_v18, %v387_v15 }
  0xa5   : > { %v451_v21 = vadd.f32 %v447_v19, %v420_v20 }
  0xa6   : > { %v478_v22 = vpop.f32.mrf.mxu0  ;;  %v512_v24 = vpop.f32.mrf.mxu1 }
  0xa7   : > { %v482_v25 = vadd.f32 %v478_v22, %v451_v21 }
  0xa9   : > { %v484_v28 = vadd.f32 %v483_v23, %v482_v25 }
  0xaa   : > { %v418_v26 = vpop.f32.mrf.mxu2 }
  0xab   : > { %v449_v27 = vpop.f32.mrf.mxu3  ;;  %485 = vst [vmem:[#allocation2] sm:$0xf] %v484_v28 }
  0xae   : > { %v480_v29 = vpop.f32.mrf.mxu0  ;;  %v514_v30 = vpop.f32.mrf.mxu1 }
  0xb2   : > { %v534_v31 = vpop.f32.mrf.mxu2 }
  0xb3   : > { %v563_v32 = vpop.f32.mrf.mxu3  ;;  %v535_v33 = vadd.f32 %v534_v31, %v512_v24 }
  0xb5   : > { %v567_v34 = vadd.f32 %v563_v32, %v535_v33 }
  0xb6   : > { %v593_v35 = vpop.f32.mrf.mxu0  ;;  %v623_v36 = vpop.f32.mrf.mxu1 }
  0xb7   : > { %v597_v37 = vadd.f32 %v593_v35, %v567_v34 }
  0xb9   : > { %v627_v41 = vadd.f32 %v623_v36, %v597_v37 }
  0xba   : > { %v536_v38 = vpop.f32.mrf.mxu2 }
  0xbb   : > { %v565_v39 = vpop.f32.mrf.mxu3  ;;  %v629_v42 = vadd.f32 %v628_v40, %v627_v41 }
  0xbd   : > { %630 = vst [vmem:[#allocation2 + $0x4] sm:$0xf] %v629_v42 }
  0xbe   : > { %v595_v43 = vpop.f32.mrf.mxu0  ;;  %v625_v44 = vpop.f32.mrf.mxu1 }
  0xc2   : > { %v657_v45 = vpop.f32.mrf.mxu2 }
  0xc3   : > { %v679_v46 = vpop.f32.mrf.mxu3 }
  0xc4   : > { %v680_v51 = vadd.f32 %v679_v46, %v657_v45 }
  0xc6   : > { %v708_v47 = vpop.f32.mrf.mxu0  ;;  %v738_v48 = vpop.f32.mrf.mxu1 }
  0xc7   : > { %v712_v52 = vadd.f32 %v708_v47, %v680_v51 }
  0xc9   : > { %v742_v55 = vadd.f32 %v738_v48, %v712_v52 }
  0xca   : > { %v659_v49 = vpop.f32.mrf.mxu2 }
  0xcb   : > { %v681_v50 = vpop.f32.mrf.mxu3 }
  0xce   : > { %v710_v53 = vpop.f32.mrf.mxu0  ;;  %v740_v54 = vpop.f32.mrf.mxu1 }
  0xd2   : > { %v768_v56 = vpop.f32.mrf.mxu2 }
  0xd3   : > { %v802_v58 = vpop.f32.mrf.mxu3  ;;  %v772_v59 = vadd.f32 %v768_v56, %v742_v55 }
  0xd5   : > { %v774_v60 = vadd.f32 %v773_v57, %v772_v59 }
  0xd6   : > { %v824_v61 = vpop.f32.mrf.mxu0  ;;  %v853_v62 = vpop.f32.mrf.mxu1 }
  0xd7   : > { %775 = vst [vmem:[#allocation2 + $0x8] sm:$0xf] %v774_v60  ;;  %v825_v1 = vadd.f32 %v824_v61, %v802_v58 }
  0xd9   : > { %v857_v4 = vadd.f32 %v853_v62, %v825_v1 }
  0xda   : > { %v770_v63 = vpop.f32.mrf.mxu2 }
  0xdb   : > { %v804_v0 = vpop.f32.mrf.mxu3 }
  0xde   : > { %v826_v2 = vpop.f32.mrf.mxu0  ;;  %v855_v3 = vpop.f32.mrf.mxu1 }
  0xe2   : > { %v883_v5 = vpop.f32.mrf.mxu2 }
  0xe3   : > { %v913_v6 = vpop.f32.mrf.mxu3  ;;  %v887_v7 = vadd.f32 %v883_v5, %v857_v4 }
  0xe5   : > { %v917_v9 = vadd.f32 %v913_v6, %v887_v7 }
  0xe7   : > { %v919_v10 = vadd.f32 %v918_v8, %v917_v9  ;;  %924 = sbr.rel (%p1260_p6) target bundleno = 258 (0x102), region = 40 }
  0xe9   : > { %920 = vst [vmem:[#allocation2 + $0xc] sm:$0xf] %v919_v10 }
  0xea   : > { %v885_v11 = vpop.f32.mrf.mxu2 }
  0xeb   : > { %v915_v12 = vpop.f32.mrf.mxu3 }
  0xec   : > { %v925_v13 = vld [vmem:[#allocation2] sm:$0xff] }
  0xed   : > { %v938_v17 = vmul.f32 %v925_v13, %v925_v13 }
  0xf0   : > { %v926_v14 = vld [vmem:[#allocation2 + $0x8] sm:$0xff] }
  0xf1   : > { %v1292_v15 = vpack.c.bf16 %v926_v14, %v925_v13  ;;  %v931_v16 = vadd.f32 %v926_v14, %v925_v13  ;;  %v939_v18 = vmul.f32 %v926_v14, %v926_v14 }
  0xf3   : > { %1293 = vst [vmem:[%s1495_s3] sm:$0xff] %v1292_v15   ;;  %v932_v19 = vrot.slane %v931_v16, 4  ;;  %v940_v20 = vadd.f32 %v939_v18, %v938_v17 }
  0xf5   : > { %v933_v21 = vadd.f32 %v932_v19, %v931_v16  ;;  %v941_v22 = vrot.slane %v940_v20, 4 }
  0xf7   : > { %v934_v23 = vrot.slane %v933_v21, 2  ;;  %v942_v24 = vadd.f32 %v941_v22, %v940_v20 }
  0xf9   : > { %v935_v25 = vadd.f32 %v934_v23, %v933_v21  ;;  %v943_v26 = vrot.slane %v942_v24, 2 }
  0xfb   : > { %v936_v27 = vrot.slane %v935_v25, 1  ;;  %v944_v28 = vadd.f32 %v943_v26, %v942_v24 }
  0xfd   : > { %v937_v29 = vadd.f32 %v936_v27, %v935_v25  ;;  %v945_v30 = vrot.slane %v944_v28, 1 }
  0xff   : > { %947 = vst [vmem:[%s1496_s4] sm:$0xff] %v937_v29  ;;  %v946_v31 = vadd.f32 %v945_v30, %v944_v28 }
 0x101   : > { %948 = vst [vmem:[%s1497_s5] sm:$0xff] %v946_v31 }
 0x102 PF: > { %s16_s20 = sadd.s32 1, %s1342_s20   ;;  %s1498_s18 = smov %s1338_s19 }
 0x103   : > { %p13_p7 = scmp.ge.s32.totalorder %s16_s20, 7   ;;  %s1499_s19 = smov %s1501_s21 }
 0x105   :  { %15 = sbr.rel (!%p13_p7) target bundleno = 2 (0x2), region = 110 }

// kernel: discriminator_forward.17
= control target key start
LH: loop header
LB: loop body
LE: loop exit
PB: predicated region body
PF: predicated region fallthrough
CT: control target
= control target key end

     0   :  { %vm22_vm0 = vcmask 519168   ;;  %vm48_vm4 = vcmask 3072   ;;  %s91_s0 = inlined_call_operand.vmem [shape: bf16[4,64], index: 0, kind: input, shape index: {}]   ;;  %s92_s1 = inlined_call_operand.vmem [shape: f32[1,64], index: 1, kind: input, shape index: {}]   ;;  %s93_s2 = inlined_call_operand.<no memory space> [shape: f32[1,1], index: 2, kind: input, shape index: {}]   ;;  %s94_s3 = inlined_call_operand.vmem [shape: f32[4,1], index: 3, kind: output, shape index: {}]  }
   0x1   :  { %v15_v0 = vld [vmem:[%s91_s0] sm:$0x3]  ;;  %v27_v5 = vstv %s93_s2 }
   0x2   :  { %v54_v1 = vld [vmem:[%s92_s1] ss:$0 sm:$0xff]  ;;  %v16_v2 = vunpack.c.l.bf16 %v15_v0 }
   0x4   :  { %v21_v3 = vmul.f32 %v54_v1, %v16_v2 }
   0x6   :  { %v23_v4 = vsel %vm22_vm0, %v21_v3, 0.0 }
   0x7   :  { %24 = vadd.xlane.f32.xlu0 %v23_v4 }
  0x7a   :  { %v25_v6 = vpop.xlane.xlu0 %24 }
  0x7b   :  { %v28_v7 = vadd.f32 %v27_v5, %v25_v6 }
  0x7d   :  { %v29_v8 = vsub.f32 0.0, %v28_v7 }
  0x7f   :  { %v30_v9 = vmul.f32 1.442695, %v29_v8 }
  0x81   :  { %55 = vpow2.f32 %v30_v9 }
  0x87   :  { %v56_v10 = vpop.eup %55 }
  0x88   :  { %v32_v11 = vadd.f32 1.0, %v56_v10 }
  0x8a   :  { %57 = vrcp.f32 %v32_v11  ;;  %v44_v15 = vand.u32 2147483648, %v32_v11  ;;  %v42_v17 = vand.u32 2147483647, %v32_v11  ;;  %vm38_vm2 = vweird.f32 %v32_v11 }
  0x8c   :  { %v45_v19 = vor.u32 1.1754944e-38, %v44_v15  ;;  %vm43_vm5 = vcmp.eq.f32.partialorder %v42_v17, 8.507059e+37 }
  0x90   :  { %v58_v12 = vpop.eup %57 }
  0x91   :  { %v34_v13 = vmul.f32 %v58_v12, %v32_v11  ;;  %vm39_vm1 = vweird.f32 %v58_v12 }
  0x92   :  { %vm40_vm3 = vmor %vm38_vm2, %vm39_vm1 }
  0x93   :  { %v35_v14 = vsub.f32 1.0, %v34_v13 }
  0x95   :  { %v36_v16 = vmul.f32 %v58_v12, %v35_v14 }
  0x97   :  { %v37_v18 = vadd.f32 %v58_v12, %v36_v16 }
  0x99   :  { %v41_v20 = vsel %vm40_vm3, %v58_v12, %v37_v18 }
  0x9a   :  { %v46_v21 = vsel %vm43_vm5, %v45_v19, %v41_v20 }
  0x9b   :  { %49 = vst.msk [vmem:[%s94_s3] sm:$0xf] %vm48_vm4, %v46_v21 }

// kernel: discriminator_forward.16
= control target key start
LH: loop header
LB: loop body
LE: loop exit
PB: predicated region body
PF: predicated region fallthrough
CT: control target
= control target key end

     0   :  { %s69_s0 = inlined_call_operand.vmem [shape: bf16[4,128], index: 0, kind: input, shape index: {}]   ;;  %s70_s1 = inlined_call_operand.vmem [shape: f32[1,128], index: 1, kind: input, shape index: {}]   ;;  %s71_s2 = inlined_call_operand.vmem [shape: f32[1,128], index: 2, kind: input, shape index: {}]   ;;  %s72_s3 = inlined_call_operand.vmem [shape: bf16[4,128], index: 3, kind: output, shape index: {}]  }
   0x1   :  { %v14_v0 = vld [vmem:[%s69_s0] sm:$0x3] }
   0x2   :  { %v35_v1 = vld [vmem:[%s70_s1] ss:$0 sm:$0xff]  ;;  %v15_v2 = vunpack.c.l.bf16 %v14_v0 }
   0x3   :  { %v36_v3 = vld [vmem:[%s71_s2] ss:$0 sm:$0xff] }
   0x4   :  { %v20_v4 = vmul.f32 %v35_v1, %v15_v2 }
   0x6   :  { %v25_v5 = vadd.f32 %v36_v3, %v20_v4 }
   0x8   :  { %vm26_vm0 = vcmp.ge.f32.partialorder %v25_v5, 0.0  ;;  %v27_v6 = vmul.f32 0.2, %v25_v5 }
   0xa   :  { %v28_v7 = vsel %vm26_vm0, %v25_v5, %v27_v6 }
   0xb   :  { %v29_v8 = vpack.c.bf16 %v28_v7, %v28_v7 }
   0xd   :  { %30 = vst [vmem:[%s72_s3] sm:$0x3] %v29_v8 }

// kernel: discriminator_forward.15
= control target key start
LH: loop header
LB: loop body
LE: loop exit
PB: predicated region body
PF: predicated region fallthrough
CT: control target
= control target key end

     0   :  { %s1652_s18 = smov 0   ;;  %s1654_s19 = smov 0   ;;  %s1785_s0 = inlined_call_operand.vmem [shape: bf16[5,4,3,32], index: 0, kind: input, shape index: {}]   ;;  %s1786_s1 = inlined_call_operand.vmem [shape: bf16[5,4,3,32], index: 1, kind: input, shape index: {}]   ;;  %s1787_s2 = inlined_call_operand.vmem [shape: bf16[5,5,32,128], index: 2, kind: input, shape index: {}]   ;;  %s1788_s3 = inlined_call_operand.vmem [shape: bf16[4,128], index: 3, kind: output, shape index: {0}]   ;;  %s1789_s4 = inlined_call_operand.vmem [shape: f32[1,8,128], index: 4, kind: output, shape index: {1}]   ;;  %s1790_s5 = inlined_call_operand.vmem [shape: f32[1,8,128], index: 5, kind: output, shape index: {2}]  }
   0x1   :  { %s1656_s20 = smov 0  }
   0x2 LB: > { %s25_s21 = sadd.s32 1, %s1615_s19  ;;  %p1260_p0 = scmp.ge.s32.totalorder %s1619_s20, 1  ;;  %s1619_s20 = sphi %s1656_s20, %s16_s20   ;;  %s1615_s19 = sphi %s1654_s19, %s1792_s19   ;;  %s1611_s18 = sphi %s1652_s18, %s1791_s18  }
   0x3   : > { %p26_p1 = scmp.ge.s32.totalorder %s25_s21, 5  ;;  %p238_p2 = scmp.lt.s32.totalorder %s1619_s20, 6 }
   0x5   : > { %s1794_s21 = smov (%p26_p1, %s25_s21), 0  ;;  %p239_p3 = pnand %p1260_p0, %p238_p2 }
   0x6   : > { %p292_p4 = scmp.lt.s32.totalorder (!%p239_p3), %s1611_s18, 4  ;;  %p1266_p5 = scmp.ne.s32.totalorder (!%p239_p3), %s1611_s18, 0 }
   0x7   : > { %242 = sbr.rel (%p239_p3) target bundleno = 282 (0x11a), region = 32 }
   0xc   : > { %s293_s22 = scalar_select %p292_p4, %s1611_s18, 4 }
   0xd   : > { %332 = sbr.rel (%p1266_p5) target bundleno = 20 (0x14), region = 36 }
   0xe   : > { %s1529_s23 = sshll.u32 %s293_s22, 3  ;;  %s1571_s24 = smul.u32 80, %s293_s22 }
   0xf   : > { %s1677_s27 = scalar_lea.vmem %s1785_s0, %s1529_s23  ;;  %s1682_s30 = scalar_lea.vmem %s1786_s1, %s1529_s23 }
  0x10   : > { %s1687_s8 = scalar_lea.vmem %s1787_s2, %s1571_s24 }
  0x12   : > { %v1621_v0 = vmov 0.0  }
  0x13   : > { %333 = vst [vmem:[#allocation2] sm:$0xf] %v1621_v0 }
  0x14 PF: > { %v1534_v1 = vld [vmem:[%s1687_s8 + $0x18] sm:$0xff]  ;;  %v1532_v2 = vld [vmem:[%s1687_s8 + $0x8] sm:$0xff]  ;;  %v1533_v5 = vld [vmem:[%s1687_s8 + $0x10] sm:$0xff]  ;;  %vm357_vm0 = vcmask 261120   ;;  %p1523_p6 = scmp.ne.s32.totalorder %s1611_s18, 4 }
  0x15   : > { %v1536_v3 = vld [vmem:[%s1687_s8 + $0x28] sm:$0xff]  ;;  %v1538_v4 = vld [vmem:[%s1687_s8 + $0x38] sm:$0xff]  ;;  %367 = vmatpush.bf16.msra.mxu0 %v1534_v1  ;;  %395 = vmatpush.bf16.msra.mxu1 %v1532_v2  ;;  %v1531_v6 = vld [vmem:[%s1687_s8] sm:$0xff] }
  0x16   : > { %432 = vmatpush.bf16.msra.mxu2 %v1536_v3  ;;  %472 = vmatpush.bf16.msra.mxu3 %v1538_v4  ;;  %v1535_v7 = vld [vmem:[%s1687_s8 + $0x20] sm:$0xff]  ;;  %v1537_v8 = vld [vmem:[%s1687_s8 + $0x30] sm:$0xff]  ;;  %v1540_v10 = vld [vmem:[%s1687_s8 + $0x48] sm:$0xff] }
  0x17   : > { %v334_v9 = vld [vmem:[%s1677_s27] sm:$0x1]  ;;  %v1542_v11 = vld [vmem:[%s1687_s8 + $0x8] sm:$0xff]  ;;  %v1544_v14 = vld [vmem:[%s1687_s8 + $0x18] sm:$0xff] }
  0x18   : > { %407 = vst [vmem:[#allocation1] ss:$4 sm:$0xff] %v334_v9  ;;  %v339_v12 = vld [vmem:[%s1682_s30] sm:$0x1]  ;;  %v1546_v13 = vld [vmem:[%s1687_s8 + $0x28] sm:$0xff]  ;;  %v1548_v18 = vld [vmem:[%s1687_s8 + $0x38] sm:$0xff] }
  0x19   : > { %368 = vmatpush.bf16.msra.mxu0 %v1533_v5  ;;  %396 = vmatpush.bf16.msra.mxu1 %v1531_v6  ;;  %v1539_v15 = vld [vmem:[%s1687_s8 + $0x40] sm:$0xff]  ;;  %v1543_v19 = vld [vmem:[%s1687_s8 + $0x10] sm:$0xff]  ;;  %v1554_v22 = vld [vmem:[%s1687_s8 + $0x18] sm:$0xff] }
  0x1a   : > { %433 = vmatpush.bf16.msra.mxu2 %v1535_v7  ;;  %473 = vmatpush.bf16.msra.mxu3 %v1537_v8  ;;  %v1541_v16 = vld [vmem:[%s1687_s8] sm:$0xff]  ;;  %v1550_v24 = vld [vmem:[%s1687_s8 + $0x48] sm:$0xff]  ;;  %v1547_v25 = vld [vmem:[%s1687_s8 + $0x30] sm:$0xff] }
  0x1b   : > { %v440_v17 = vld [vmem:[%s1682_s30] sm:$0x1]  ;;  %v1553_v26 = vld [vmem:[%s1687_s8 + $0x10] sm:$0xff]  ;;  %v480_v28 = vld [vmem:[%s1677_s27] sm:$0x2] }
  0x1c   : > { %1279 = vmatmul.msk.bf16.vlgmr.msra.gmra.mxu0 %vm357_vm0, %v339_v12  ;;  %1288 = vmatmul.msk.bf16.vlgmr.msra.gmra.mxu1 %vm357_vm0, %v334_v9  ;;  %v1545_v21 = vld [vmem:[%s1687_s8 + $0x20] sm:$0xff]  ;;  %v1552_v30 = vld [vmem:[%s1687_s8 + $0x8] sm:$0xff]  ;;  %v1558_v34 = vld [vmem:[%s1687_s8 + $0x38] sm:$0xff] }
  0x1d   : > { %512 = vmatpush.bf16.msrb.mxu0 %v1540_v10  ;;  %556 = vmatpush.bf16.msrb.mxu1 %v1544_v14  ;;  %v1549_v27 = vld [vmem:[%s1687_s8 + $0x40] sm:$0xff]  ;;  %v1556_v37 = vld [vmem:[%s1687_s8 + $0x28] sm:$0xff]  ;;  %v1557_v40 = vld [vmem:[%s1687_s8 + $0x30] sm:$0xff] }
  0x1e   : > { %584 = vmatpush.bf16.msrb.mxu2 %v1542_v11  ;;  %620 = vmatpush.bf16.msrb.mxu3 %v1546_v13  ;;  %v1329_v32 = vld [vmem:[%s1682_s30 + $0x2] sm:$0x1]  ;;  %v1560_v38 = vld [vmem:[%s1687_s8 + $0x48] sm:$0xff]  ;;  %v1564_v45 = vld [vmem:[%s1687_s8 + $0x18] sm:$0xff] }
  0x1f   : > { %v408_v20 = vld.sshfl [vmem:[#allocation1] sm:$0xff pattern:$0x73625140]  ;;  %v1563_v47 = vld [vmem:[%s1687_s8 + $0x10] sm:$0xff]  ;;  %v1562_v52 = vld [vmem:[%s1687_s8 + $0x8] sm:$0xff] }
  0x20   : > { %447 = vst [vmem:[#allocation1] ss:$4 sm:$0xff] %v440_v17  ;;  %v409_v23 = vshrl.u32 %v408_v20, 16  ;;  %v1551_v33 = vld [vmem:[%s1687_s8] sm:$0xff]  ;;  %v1568_v53 = vld [vmem:[%s1687_s8 + $0x38] sm:$0xff]  ;;  %v1567_v55 = vld [vmem:[%s1687_s8 + $0x30] sm:$0xff] }
  0x21   : > { %513 = vmatpush.bf16.msrb.mxu0 %v1539_v15  ;;  %557 = vmatpush.bf16.msrb.mxu1 %v1543_v19  ;;  %v1328_v35 = vld [vmem:[%s1677_s27 + $0x2] sm:$0x1]  ;;  %v1379_v48 = vld [vmem:[%s1677_s27 + $0x2] sm:$0x2]  ;;  %v1394_v50 = vld [vmem:[%s1682_s30 + $0x4] sm:$0x1] }
  0x22   : > { %585 = vmatpush.bf16.msrb.mxu2 %v1541_v16  ;;  %621 = vmatpush.bf16.msrb.mxu3 %v1545_v21  ;;  %v1555_v41 = vld [vmem:[%s1687_s8 + $0x20] sm:$0xff]  ;;  %v1570_v58 = vld [vmem:[%s1687_s8 + $0x48] sm:$0xff] }
  0x23   : > { %1301 = vmatmul.msk.bf16.vlgmr.msra.gmra.mxu2 %vm357_vm0, %v409_v23  ;;  %v1559_v42 = vld [vmem:[%s1687_s8 + $0x40] sm:$0xff]  ;;  %v1566_v59 = vld [vmem:[%s1687_s8 + $0x28] sm:$0xff] }
  0x24   : > { %v1365_v43 = vld [vmem:[%s1682_s30 + $0x2] sm:$0x1]  ;;  %v1393_v56 = vld [vmem:[%s1677_s27 + $0x4] sm:$0x1]  ;;  %v1444_v2 = vld [vmem:[%s1677_s27 + $0x4] sm:$0x2] }
  0x25   : > { %659 = vmatpush.bf16.msra.mxu0 %v1548_v18  ;;  %698 = vmatpush.bf16.msra.mxu1 %v1550_v24  ;;  %v1561_v54 = vld [vmem:[%s1687_s8] sm:$0xff] }
  0x26   : > { %742 = vmatpush.bf16.msra.mxu2 %v1554_v22  ;;  %v1565_v61 = vld [vmem:[%s1687_s8 + $0x20] sm:$0xff] }
  0x27   : > { %v448_v29 = vld.sshfl [vmem:[#allocation1] sm:$0xff pattern:$0x73625140] }
  0x28   : > { %487 = vst [vmem:[#allocation1] ss:$4 sm:$0xff] %v480_v28  ;;  %v449_v31 = vshrl.u32 %v448_v29, 16  ;;  %v1430_v62 = vld [vmem:[%s1682_s30 + $0x4] sm:$0x1] }
  0x29   : > { %660 = vmatpush.bf16.msra.mxu0 %v1547_v25  ;;  %699 = vmatpush.bf16.msra.mxu1 %v1549_v27  ;;  %v1569_v1 = vld [vmem:[%s1687_s8 + $0x40] sm:$0xff]  ;;  %v520_v29 = vld [vmem:[#allocation2] sm:$0x1] }
  0x2a   : > { %743 = vmatpush.bf16.msra.mxu2 %v1553_v26  ;;  %1314 = vmatmul.msk.bf16.vlgmr.msra.gmra.mxu3 %vm357_vm0, %v449_v31  ;;  %v1459_v4 = vld [vmem:[%s1682_s30 + $0x6] sm:$0x1]  ;;  %v1509_v12 = vld [vmem:[%s1677_s27 + $0x6] sm:$0x2] }
  0x2b   : > { %770 = vmatpush.bf16.msra.mxu3 %v1552_v30  ;;  %v1458_v6 = vld [vmem:[%s1677_s27 + $0x6] sm:$0x1] }
  0x2c   : > { %1342 = vmatmul.msk.bf16.vlgmr.msrb.gmra.mxu1 %vm357_vm0, %v1329_v32  ;;  %v1495_v9 = vld [vmem:[%s1682_s30 + $0x6] sm:$0x1] }
  0x2d   : > { %845 = vmatpush.bf16.msrb.mxu1 %v1558_v34 }
  0x2f   : > { %v488_v36 = vld.sshfl [vmem:[#allocation1] sm:$0xff pattern:$0x73625140]  ;;  %771 = vmatpush.bf16.msra.mxu3 %v1551_v33 }
  0x30   : > { %v490_v39 = vrot.slane %v488_v36, 1  ;;  %595 = vst [vmem:[#allocation1] ss:$4 sm:$0xff] %v1328_v35 }
  0x31   : > { %846 = vmatpush.bf16.msrb.mxu1 %v1557_v40 }
  0x32   : > { %1327 = vmatmul.msk.bf16.vlgmr.msrb.gmra.mxu0 %vm357_vm0, %v490_v39 }
  0x33   : > { %1351 = vmatmul.msk.bf16.vlgmr.msrb.gmra.mxu2 %vm357_vm0, %v1328_v35  ;;  %806 = vmatpush.bf16.msrb.mxu0 %v1556_v37 }
  0x34   : > { %884 = vmatpush.bf16.msrb.mxu2 %v1560_v38 }
  0x37   : > { %v596_v44 = vld.sshfl [vmem:[#allocation1] sm:$0xff pattern:$0x73625140]  ;;  %807 = vmatpush.bf16.msrb.mxu0 %v1555_v41 }
  0x38   : > { %885 = vmatpush.bf16.msrb.mxu2 %v1559_v42  ;;  %634 = vst [vmem:[#allocation1] ss:$4 sm:$0xff] %v1365_v43  ;;  %v597_v46 = vshrl.u32 %v596_v44, 16 }
  0x3a   : > { %1364 = vmatmul.msk.bf16.vlgmr.msrb.gmra.mxu3 %vm357_vm0, %v597_v46 }
  0x3b   : > { %928 = vmatpush.bf16.msrb.mxu3 %v1564_v45  ;;  %v706_v45 = vld [vmem:[#allocation2 + $0x1] sm:$0x1] }
  0x3f   : > { %v635_v49 = vld.sshfl [vmem:[#allocation1] sm:$0xff pattern:$0x73625140]  ;;  %929 = vmatpush.bf16.msrb.mxu3 %v1563_v47 }
  0x40   : > { %v636_v51 = vshrl.u32 %v635_v49, 16  ;;  %673 = vst [vmem:[#allocation1] ss:$4 sm:$0xff] %v1379_v48 }
  0x42   : > { %1378 = vmatmul.msk.bf16.vlgmr.msra.gmra.mxu0 %vm357_vm0, %v636_v51 }
  0x43   : > { %1407 = vmatmul.msk.bf16.vlgmr.msra.gmra.mxu2 %vm357_vm0, %v1394_v50  ;;  %956 = vmatpush.bf16.msra.mxu0 %v1562_v52 }
  0x44   : > { %1031 = vmatpush.bf16.msra.mxu2 %v1568_v53 }
  0x47   : > { %v674_v57 = vld.sshfl [vmem:[#allocation1] sm:$0xff pattern:$0x73625140]  ;;  %957 = vmatpush.bf16.msra.mxu0 %v1561_v54 }
  0x48   : > { %v676_v60 = vrot.slane %v674_v57, 1  ;;  %781 = vst [vmem:[#allocation1] ss:$4 sm:$0xff] %v1393_v56  ;;  %1032 = vmatpush.bf16.msra.mxu2 %v1567_v55 }
  0x4a   : > { %1392 = vmatmul.msk.bf16.vlgmr.msra.gmra.mxu1 %vm357_vm0, %v676_v60  ;;  %1416 = vmatmul.msk.bf16.vlgmr.msra.gmra.mxu3 %vm357_vm0, %v1393_v56 }
  0x4b   : > { %1070 = vmatpush.bf16.msra.mxu3 %v1570_v58  ;;  %992 = vmatpush.bf16.msra.mxu1 %v1566_v59 }
  0x4f   : > { %v782_v63 = vld.sshfl [vmem:[#allocation1] sm:$0xff pattern:$0x73625140]  ;;  %993 = vmatpush.bf16.msra.mxu1 %v1565_v61  ;;  %1071 = vmatpush.bf16.msra.mxu3 %v1569_v1 }
  0x50   : > { %v783_v0 = vshrl.u32 %v782_v63, 16  ;;  %820 = vst [vmem:[#allocation1] ss:$4 sm:$0xff] %v1430_v62  ;;  %v892_v63 = vld [vmem:[#allocation2 + $0x2] sm:$0x1] }
  0x52   : > { %1429 = vmatmul.msk.bf16.vlgmr.msrb.gmra.mxu0 %vm357_vm0, %v783_v0 }
  0x57   : > { %v821_v3 = vld.sshfl [vmem:[#allocation1] sm:$0xff pattern:$0x73625140] }
  0x58   : > { %v822_v5 = vshrl.u32 %v821_v3, 16  ;;  %859 = vst [vmem:[#allocation1] ss:$4 sm:$0xff] %v1444_v2 }
  0x5a   : > { %1443 = vmatmul.msk.bf16.vlgmr.msrb.gmra.mxu1 %vm357_vm0, %v822_v5  ;;  %1472 = vmatmul.msk.bf16.vlgmr.msrb.gmra.mxu3 %vm357_vm0, %v1459_v4 }
  0x5f   : > { %v860_v7 = vld.sshfl [vmem:[#allocation1] sm:$0xff pattern:$0x73625140] }
  0x60   : > { %v862_v8 = vrot.slane %v860_v7, 1  ;;  %967 = vst [vmem:[#allocation1] ss:$4 sm:$0xff] %v1458_v6 }
  0x62   : > { %1457 = vmatmul.msk.bf16.vlgmr.msrb.gmra.mxu2 %vm357_vm0, %v862_v8  ;;  %1481 = vmatmul.msk.bf16.vlgmr.msra.gmra.mxu0 %vm357_vm0, %v1458_v6 }
  0x67   : > { %v968_v10 = vld.sshfl [vmem:[#allocation1] sm:$0xff pattern:$0x73625140] }
  0x68   : > { %v969_v11 = vshrl.u32 %v968_v10, 16  ;;  %1006 = vst [vmem:[#allocation1] ss:$4 sm:$0xff] %v1495_v9 }
  0x6a   : > { %1494 = vmatmul.msk.bf16.vlgmr.msra.gmra.mxu1 %vm357_vm0, %v969_v11 }
  0x6f   : > { %v1007_v13 = vld.sshfl [vmem:[#allocation1] sm:$0xff pattern:$0x73625140] }
  0x70   : > { %v1008_v14 = vshrl.u32 %v1007_v13, 16  ;;  %1045 = vst [vmem:[#allocation1] ss:$4 sm:$0xff] %v1509_v12  ;;  %v1078_v13 = vld [vmem:[#allocation2 + $0x3] sm:$0x1] }
  0x72   : > { %1508 = vmatmul.msk.bf16.vlgmr.msra.gmra.mxu2 %vm357_vm0, %v1008_v14 }
  0x77   : > { %v1046_v15 = vld.sshfl [vmem:[#allocation1] sm:$0xff pattern:$0x73625140] }
  0x78   : > { %v1048_v16 = vrot.slane %v1046_v15, 1 }
  0x7a   : > { %1522 = vmatmul.msk.bf16.vlgmr.msra.gmra.mxu3 %vm357_vm0, %v1048_v16 }
  0x99   : > { %v370_v17 = vpop.f32.mrf.mxu0  ;;  %v398_v18 = vpop.f32.mrf.mxu1 }
  0x9a   : > { %v399_v22 = vadd.f32 %v398_v18, %v370_v17 }
  0xa1   : > { %v372_v19 = vpop.f32.mrf.mxu0  ;;  %v400_v20 = vpop.f32.mrf.mxu1 }
  0xa6   : > { %v435_v21 = vpop.f32.mrf.mxu2 }
  0xa7   : > { %v439_v23 = vadd.f32 %v435_v21, %v399_v22 }
  0xa9   : > { %v559_v24 = vpop.f32.mrf.mxu1 }
  0xad   : > { %v475_v25 = vpop.f32.mrf.mxu3 }
  0xae   : > { %v437_v26 = vpop.f32.mrf.mxu2  ;;  %v479_v27 = vadd.f32 %v475_v25, %v439_v23 }
  0xaf   : > { %v515_v28 = vpop.f32.mrf.mxu0 }
  0xb0   : > { %v519_v30 = vadd.f32 %v515_v28, %v479_v27 }
  0xb1   : > { %v561_v32 = vpop.f32.mrf.mxu1 }
  0xb2   : > { %v521_v31 = vadd.f32 %v520_v29, %v519_v30 }
  0xb4   : > { %522 = vst [vmem:[#allocation2] sm:$0x1] %v521_v31 }
  0xb5   : > { %v477_v33 = vpop.f32.mrf.mxu3 }
  0xb6   : > { %v587_v34 = vpop.f32.mrf.mxu2 }
  0xb7   : > { %v517_v35 = vpop.f32.mrf.mxu0  ;;  %v588_v36 = vadd.f32 %v587_v34, %v559_v24 }
  0xbd   : > { %v623_v37 = vpop.f32.mrf.mxu3 }
  0xbe   : > { %v589_v38 = vpop.f32.mrf.mxu2  ;;  %v627_v40 = vadd.f32 %v623_v37, %v588_v36 }
  0xbf   : > { %v662_v39 = vpop.f32.mrf.mxu0 }
  0xc0   : > { %v666_v41 = vadd.f32 %v662_v39, %v627_v40 }
  0xc5   : > { %v625_v42 = vpop.f32.mrf.mxu3 }
  0xc6   : > { %v745_v43 = vpop.f32.mrf.mxu2 }
  0xc7   : > { %v701_v44 = vpop.f32.mrf.mxu1  ;;  %v664_v46 = vpop.f32.mrf.mxu0 }
  0xc8   : > { %v705_v47 = vadd.f32 %v701_v44, %v666_v41 }
  0xca   : > { %v707_v48 = vadd.f32 %v706_v45, %v705_v47 }
  0xcc   : > { %708 = vst [vmem:[#allocation2 + $0x1] sm:$0x1] %v707_v48 }
  0xcd   : > { %v773_v49 = vpop.f32.mrf.mxu3 }
  0xce   : > { %v747_v50 = vpop.f32.mrf.mxu2  ;;  %v774_v56 = vadd.f32 %v773_v49, %v745_v43 }
  0xcf   : > { %v703_v51 = vpop.f32.mrf.mxu1  ;;  %v809_v52 = vpop.f32.mrf.mxu0 }
  0xd0   : > { %v813_v60 = vadd.f32 %v809_v52, %v774_v56 }
  0xd5   : > { %v775_v53 = vpop.f32.mrf.mxu3 }
  0xd7   : > { %v848_v54 = vpop.f32.mrf.mxu1  ;;  %v811_v55 = vpop.f32.mrf.mxu0 }
  0xd8   : > { %v852_v61 = vadd.f32 %v848_v54, %v813_v60 }
  0xdd   : > { %v931_v57 = vpop.f32.mrf.mxu3 }
  0xdf   : > { %v850_v58 = vpop.f32.mrf.mxu1  ;;  %v959_v59 = vpop.f32.mrf.mxu0 }
  0xe0   : > { %v960_v8 = vadd.f32 %v959_v59, %v931_v57 }
  0xe5   : > { %v887_v62 = vpop.f32.mrf.mxu2  ;;  %v933_v0 = vpop.f32.mrf.mxu3 }
  0xe6   : > { %v891_v1 = vadd.f32 %v887_v62, %v852_v61 }
  0xe7   : > { %v995_v2 = vpop.f32.mrf.mxu1  ;;  %v961_v3 = vpop.f32.mrf.mxu0 }
  0xe8   : > { %v893_v4 = vadd.f32 %v892_v63, %v891_v1  ;;  %v999_v9 = vadd.f32 %v995_v2, %v960_v8 }
  0xea   : > { %894 = vst [vmem:[#allocation2 + $0x2] sm:$0x1] %v893_v4 }
  0xed   : > { %v889_v5 = vpop.f32.mrf.mxu2 }
  0xef   : > { %v997_v6 = vpop.f32.mrf.mxu1 }
  0xf5   : > { %v1034_v7 = vpop.f32.mrf.mxu2 }
  0xf6   : > { %v1038_v10 = vadd.f32 %v1034_v7, %v999_v9 }
  0xfd   : > { %v1036_v11 = vpop.f32.mrf.mxu2  ;;  %v1073_v12 = vpop.f32.mrf.mxu3 }
  0xfe   : > { %v1077_v14 = vadd.f32 %v1073_v12, %v1038_v10 }
 0x100   : > { %v1079_v15 = vadd.f32 %v1078_v13, %v1077_v14 }
 0x101   : > { %1084 = sbr.rel (%p1523_p6) target bundleno = 282 (0x11a), region = 40 }
 0x102   : > { %1080 = vst [vmem:[#allocation2 + $0x3] sm:$0x1] %v1079_v15 }
 0x105   : > { %v1075_v16 = vpop.f32.mrf.mxu3 }
 0x106   : > { %vm1088_vm1 = vcmask 1043456  }
 0x109   : > { %v1085_v17 = vld [vmem:[#allocation2] sm:$0xf] }
 0x10a   : > { %v1086_v18 = vpack.c.bf16 %v1085_v17, %v1085_v17  ;;  %v1089_v19 = vsel %vm1088_vm1, %v1085_v17, 0.0  ;;  %v1096_v20 = vmul.f32 %v1085_v17, %v1085_v17 }
 0x10b   : > { %v1090_v21 = vrot.slane %v1089_v19, 4 }
 0x10c   : > { %1087 = vst [vmem:[%s1788_s3] sm:$0x3] %v1086_v18  ;;  %v1097_v22 = vsel %vm1088_vm1, %v1096_v20, 0.0 }
 0x10d   : > { %v1091_v23 = vadd.f32 %v1090_v21, %v1089_v19  ;;  %v1098_v24 = vrot.slane %v1097_v22, 4 }
 0x10f   : > { %v1092_v25 = vrot.slane %v1091_v23, 2  ;;  %v1099_v26 = vadd.f32 %v1098_v24, %v1097_v22 }
 0x111   : > { %v1093_v27 = vadd.f32 %v1092_v25, %v1091_v23  ;;  %v1100_v28 = vrot.slane %v1099_v26, 2 }
 0x113   : > { %v1094_v29 = vrot.slane %v1093_v27, 1  ;;  %v1101_v30 = vadd.f32 %v1100_v28, %v1099_v26 }
 0x115   : > { %v1095_v31 = vadd.f32 %v1094_v29, %v1093_v27  ;;  %v1102_v32 = vrot.slane %v1101_v30, 1 }
 0x117   : > { %1104 = vst [vmem:[%s1789_s4] sm:$0xff] %v1095_v31  ;;  %v1103_v33 = vadd.f32 %v1102_v32, %v1101_v30 }
 0x119   : > { %1105 = vst [vmem:[%s1790_s5] sm:$0xff] %v1103_v33 }
 0x11a PF: > { %s16_s20 = sadd.s32 1, %s1619_s20   ;;  %s1791_s18 = smov %s1615_s19 }
 0x11b   : > { %p13_p7 = scmp.ge.s32.totalorder %s16_s20, 7   ;;  %s1792_s19 = smov %s1794_s21 }
 0x11d   :  { %15 = sbr.rel (!%p13_p7) target bundleno = 2 (0x2), region = 110 }

</bundles_post_ra>
